<compile_context>
chip_gen: v5e
topology: v5e:2x2
jax: 0.10.0
libtpu: 0.0.40
codegen_flags: <defaults>
</compile_context>

<pallas_src>
import functools

import jax
import jax.numpy as jnp
from jax import lax
from jax.experimental import pallas as pl
from jax.experimental.pallas import tpu as pltpu


def _vmem_limit_bytes():
    # ~75% of physical VMEM, capped at 96 MiB: 48 MiB on v7x (64 MiB part),
    # 96 MiB on v5e/v6e (128 MiB parts).
    try:
        cap = pltpu.get_tpu_info().vmem_capacity_bytes
    except Exception:
        cap = 128 * 1024 * 1024
    return int(min(cap * 3 // 4, 96 * 1024 * 1024))


def _pick_row_tile(Ho, Wo, Kp, itemsize=2, budget=4 * 1024 * 1024):
    """Largest row tile TH (dividing Ho) whose bf16 im2col patch fits `budget`.

    When Ho is split, TH*Wo is kept a multiple of 128 so conv_y blocks stay
    lane-dense.
    """
    if Ho * Wo * Kp * itemsize <= budget:
        return Ho                                   # whole image in one tile
    cands = [th for th in range(1, Ho)
             if Ho % th == 0 and (th * Wo) % 128 == 0
             and th * Wo * Kp * itemsize <= budget]
    # TODO(synk): ragged / non-128-aligned spatial tiling for awkward Ho*Wo.
    return max(cands) if cands else Ho


def _conv_im2col_kernel(x_ref, w_ref, y_ref, stats_ref, xpad_ref, patch_ref,
                        *, H, W, Cin, Cout, KH, KW, PAD, TH, Wo, K, Kp):
    # x_ref:     (1, H, W, Cin)        one image (native dtype, NHWC)
    # w_ref:     (Cout, Kp)            bf16, K-tail zero-padded
    # y_ref:     (1, Cout, TH*Wo)      conv output tile (f32, spatial on lanes)
    # stats_ref: (1, Cout, 2)          per-image [sum, sum(x^2)] accumulator
    # xpad_ref:  VMEM (H+2P, W+2P, Cin) bf16 padded image (persists over tiles)
    # patch_ref: VMEM (TH, Wo, Kp)      bf16 im2col patch for this row tile
    t = pl.program_id(1)
    Hp = H + 2 * PAD
    Wp = W + 2 * PAD

    # ---- Per-image setup (once per image; scratch persists across tiles) ----
    @pl.when(t == 0)
    def _setup():
        if PAD > 0:
            # Zero only the halo ring (interior is fully overwritten below).
            zrow = jnp.zeros((PAD, Wp, Cin), xpad_ref.dtype)
            xpad_ref[0:PAD, :, :] = zrow
            xpad_ref[PAD + H:Hp, :, :] = zrow
            zcol = jnp.zeros((Hp, PAD, Cin), xpad_ref.dtype)
            xpad_ref[:, 0:PAD, :] = zcol
            xpad_ref[:, PAD + W:Wp, :] = zcol
        # Cast to bf16 here: activations are DMA'd in their native dtype.
        xpad_ref[PAD:PAD + H, PAD:PAD + W, :] = x_ref[0].astype(xpad_ref.dtype)
        if Kp > K:
            # Padded K tail must not be uninitialized VMEM (0 * NaN = NaN).
            patch_ref[:, :, K:Kp] = jnp.zeros((TH, Wo, Kp - K), patch_ref.dtype)

    @pl.when(t == 0)
    def _init_stats():
        stats_ref[...] = jnp.zeros_like(stats_ref)

    # ---- im2col for this row tile: output rows [t*TH, (t+1)*TH) -------------
    # TODO(synk): tap copies touch only Cin lanes each (fine for small Cin);
    # a lane-dense tap packing would help large-Cin cases on v5e's single vst.
    row0 = pl.multiple_of(t * TH, TH)
    for kh in range(KH):
        for kw in range(KW):
            tap = kh * KW + kw
            patch_ref[:, :, tap * Cin:(tap + 1) * Cin] = \
                xpad_ref[pl.ds(row0 + kh, TH), kw:kw + Wo, :]

    # ---- Single MXU matmul: bf16 operands, f32 accumulation ------------------
    #   acc[c, s] = sum_k W[c, k] * patch[s, k]      (contract last dims)
    # Result is (Cout, TH*Wo): channels on sublanes, spatial on lanes, so the
    # store below is a full-width vst and conv_y carries no channel padding.
    patch2d = patch_ref[...].reshape(TH * Wo, Kp)
    acc = lax.dot_general(w_ref[...], patch2d,
                          dimension_numbers=(((1,), (1,)), ((), ())),
                          preferred_element_type=jnp.float32)
    y_ref[0] = acc

    # ---- Per-image partial BatchNorm statistics (finalized in the wrapper;
    # training-mode batch stats need every tile of every image). ---------------
    stats_ref[0, :, 0:1] += jnp.sum(acc, axis=1, keepdims=True)
    stats_ref[0, :, 1:2] += jnp.sum(acc * acc, axis=1, keepdims=True)


def _bn_relu_kernel(y_ref, scale_ref, shift_ref, o_ref):
    # Fused BatchNorm apply + ReLU: y = max(conv * scale + shift, 0).
    y = y_ref[0] * scale_ref[...] + shift_ref[...]
    o_ref[0] = jnp.maximum(y, 0.0).astype(o_ref.dtype)


def basic_conv(x_nchw, w_oihw, gamma, beta, *, stride=1, padding=0, dilation=1,
               groups=1, eps=1e-5):
    """BasicConv forward. x_nchw: (N, Cin, H, W); w_oihw: (Cout, Cin, KH, KW)."""
    assert stride == 1 and dilation == 1 and groups == 1, \
        "only BasicConv defaults (stride=1, dilation=1, groups=1) supported"
    N, Cin, H, W = x_nchw.shape
    Cout, cin_w, KH, KW = w_oihw.shape
    assert cin_w == Cin, "groups != 1 not supported"
    Ho = H + 2 * padding - KH + 1
    Wo = W + 2 * padding - KW + 1
    assert Ho > 0 and Wo > 0
    K = KH * KW * Cin
    Kp = ((K + 7) // 8) * 8                 # sublane-align the contraction dim
    S = Ho * Wo

    TH = _pick_row_tile(Ho, Wo, Kp)
    n_tiles = Ho // TH
    vmem_limit = _vmem_limit_bytes()

    # Boundary layout plumbing. Weights: OIHW -> (Cout, (kh,kw,c)) bf16, K-tail
    # zero padded. Activations: NHWC transpose only (native dtype, cast
    # happens inside the kernel).
    x_nhwc = jnp.transpose(x_nchw, (0, 2, 3, 1))
    w_k = jnp.transpose(w_oihw, (0, 2, 3, 1)).reshape(Cout, K)
    w_k = jnp.pad(w_k, ((0, 0), (0, Kp - K))).astype(jnp.bfloat16)

    # ---- Pass 1: conv (im2col + one MXU matmul per row tile) + BN partials ---
    conv_kernel = functools.partial(
        _conv_im2col_kernel, H=H, W=W, Cin=Cin, Cout=Cout, KH=KH, KW=KW,
        PAD=padding, TH=TH, Wo=Wo, K=K, Kp=Kp)

    conv_y, stats = pl.pallas_call(
        conv_kernel,
        out_shape=(jax.ShapeDtypeStruct((N, Cout, S), jnp.float32),
                   jax.ShapeDtypeStruct((N, Cout, 2), jnp.float32)),
        grid_spec=pltpu.PrefetchScalarGridSpec(
            num_scalar_prefetch=0,
            grid=(N, n_tiles),
            in_specs=[
                # Full image per block; block index constant over t, so the
                # input is DMA'd once per image.
                pl.BlockSpec((1, H, W, Cin), lambda n, t: (n, 0, 0, 0)),
                pl.BlockSpec((Cout, Kp), lambda n, t: (0, 0)),
            ],
            out_specs=[
                pl.BlockSpec((1, Cout, TH * Wo), lambda n, t: (n, 0, t)),
                pl.BlockSpec((1, Cout, 2), lambda n, t: (n, 0, 0)),
            ],
            scratch_shapes=[
                pltpu.VMEM((H + 2 * padding, W + 2 * padding, Cin), jnp.bfloat16),
                pltpu.VMEM((TH, Wo, Kp), jnp.bfloat16),
            ]),
        compiler_params=pltpu.CompilerParams(
            # Batch axis megacore-shardable; tile axis carries xpad + BN stats
            # in scratch so it must stay "arbitrary".
            dimension_semantics=("parallel", "arbitrary"),
            vmem_limit_bytes=vmem_limit),
    )(x_nhwc, w_k)

    # ---- Finalize training-mode BatchNorm into a per-channel FMA ------------
    # NOTE: E[x^2] - mean^2 in f32 (clamped) is fine at these activation
    # scales; switch to a two-pass/Welford variant if activations grow large.
    cnt = jnp.float32(N * S)
    mean = jnp.sum(stats[:, :, 0], axis=0) / cnt
    var = jnp.maximum(jnp.sum(stats[:, :, 1], axis=0) / cnt - mean * mean, 0.0)
    scale = gamma.astype(jnp.float32) * lax.rsqrt(var + eps)
    shift = beta.astype(jnp.float32) - mean * scale
    scale = scale.reshape(Cout, 1)
    shift = shift.reshape(Cout, 1)

    # ---- Pass 2: fused BN apply + ReLU, in place over conv_y when possible ---
    out_dtype = x_nchw.dtype
    alias = {0: 0} if out_dtype == jnp.float32 else {}
    out = pl.pallas_call(
        _bn_relu_kernel,
        out_shape=jax.ShapeDtypeStruct((N, Cout, S), out_dtype),
        grid_spec=pltpu.PrefetchScalarGridSpec(
            num_scalar_prefetch=0,
            grid=(N,),
            in_specs=[
                pl.BlockSpec((1, Cout, S), lambda n: (n, 0, 0)),
                pl.BlockSpec((Cout, 1), lambda n: (0, 0)),
                pl.BlockSpec((Cout, 1), lambda n: (0, 0)),
            ],
            out_specs=pl.BlockSpec((1, Cout, S), lambda n: (n, 0, 0))),
        compiler_params=pltpu.CompilerParams(
            dimension_semantics=("parallel",),
            vmem_limit_bytes=vmem_limit),
        input_output_aliases=alias,
    )(conv_y, scale, shift)

    # Channels are already on the row axis: NCHW is a free reshape.
    return out.reshape(N, Cout, Ho, Wo)


def _reference(x_nchw, w_oihw, gamma, beta, *, padding=0, eps=1e-5):
    """Plain-JAX reference (Conv2d -> training-mode BN -> ReLU), f32."""
    y = lax.conv_general_dilated(
        x_nchw, w_oihw, window_strides=(1, 1),
        padding=[(padding, padding), (padding, padding)],
        dimension_numbers=("NCHW", "OIHW", "NCHW"))
    mean = jnp.mean(y, axis=(0, 2, 3), keepdims=True)
    var = jnp.mean((y - mean) ** 2, axis=(0, 2, 3), keepdims=True)
    y = (y - mean) * lax.rsqrt(var + eps)
    y = y * gamma.reshape(1, -1, 1, 1) + beta.reshape(1, -1, 1, 1)
    return jnp.maximum(y, 0.0)


if __name__ == "__main__":
    # BasicConv(in_planes=4, out_planes=8, kernel_size=3, padding=1)
    N, Cin, H, W = 2, 4, 16, 16
    Cout, KH, KW = 8, 3, 3
    padding = 1

    key = jax.random.PRNGKey(0)
    kx, kw = jax.random.split(key)
    x = jax.random.normal(kx, (N, Cin, H, W), dtype=jnp.float32)
    w = jax.random.normal(kw, (Cout, Cin, KH, KW), dtype=jnp.float32) * 0.1
    # BatchNorm2d default init: weight=1, bias=0.
    gamma = jnp.ones((Cout,), dtype=jnp.float32)
    beta = jnp.zeros((Cout,), dtype=jnp.float32)

    fwd = jax.jit(functools.partial(basic_conv, padding=padding))
    out = jax.block_until_ready(fwd(x, w, gamma, beta))

    ref = _reference(x, w, gamma, beta, padding=padding)
    assert out.shape == (N, Cout, H, W)
    # bf16 MXU operands (f32 accumulation) -> tolerance covers input rounding.
    assert jnp.allclose(out, ref, atol=2e-2, rtol=2e-2), "mismatch vs reference"

    print("KERNEL_OK")
</pallas_src>

<mosaic_0001>
module attributes {stable_mosaic.version = 11 : i64} {
  func.func @_conv_im2col_kernel(%arg0: i32, %arg1: i32, %arg2: memref<1x16x16x4xf32, #tpu.memory_space<vmem>>, %arg3: memref<8x40xbf16, #tpu.memory_space<vmem>>, %arg4: memref<1x8x256xf32, #tpu.memory_space<vmem>>, %arg5: memref<1x8x2xf32, #tpu.memory_space<vmem>>, %arg6: memref<18x18x4xbf16, #tpu.memory_space<vmem>>, %arg7: memref<16x16x40xbf16, #tpu.memory_space<vmem>>) attributes {dimension_semantics = [#tpu.dimension_semantics<parallel>, #tpu.dimension_semantics<arbitrary>], iteration_bounds = array<i64: 2, 1>, scalar_prefetch = 0 : i64, scratch_operands = 2 : i64, tpu.core_type = #tpu.core_type<tc>, window_params = [{transform_indices = @transform_0, window_bounds = array<i64: 1, 16, 16, 4>}, {pipeline_mode = #tpu.pipeline_mode<synchronous>, transform_indices = @transform_1, window_bounds = array<i64: 8, 40>}, {transform_indices = @transform_2, window_bounds = array<i64: 1, 8, 256>}, {transform_indices = @transform_3, window_bounds = array<i64: 1, 8, 2>}]} {
    %c0_i32 = arith.constant 0 : i32
    %0 = arith.cmpi eq, %arg1, %c0_i32 : i32
    %1 = arith.extui %0 : i1 to i32
    %c0_i32_0 = arith.constant 0 : i32
    %2 = arith.cmpi ne, %1, %c0_i32_0 : i32
    scf.if %2 {
      %cst_66 = arith.constant 0.000000e+00 : bf16
      %68 = vector.broadcast %cst_66 : bf16 to vector<1x18x4xbf16>
      %c0_67 = arith.constant 0 : index
      %c0_68 = arith.constant 0 : index
      %c0_69 = arith.constant 0 : index
      %69 = vector.load %arg6[%c0_67, %c0_68, %c0_69] : memref<18x18x4xbf16, #tpu.memory_space<vmem>>, vector<1x18x4xbf16>
      tpu.vector_store %arg6[%c0_67, %c0_68, %c0_69], %68 {strides = array<i32>} : memref<18x18x4xbf16, #tpu.memory_space<vmem>>, vector<1x18x4xbf16>,
      %c17 = arith.constant 17 : index
      %c0_70 = arith.constant 0 : index
      %c0_71 = arith.constant 0 : index
      %70 = vector.load %arg6[%c17, %c0_70, %c0_71] : memref<18x18x4xbf16, #tpu.memory_space<vmem>>, vector<1x18x4xbf16>
      tpu.vector_store %arg6[%c17, %c0_70, %c0_71], %68 {strides = array<i32>} : memref<18x18x4xbf16, #tpu.memory_space<vmem>>, vector<1x18x4xbf16>,
      %cst_72 = arith.constant 0.000000e+00 : bf16
      %71 = vector.broadcast %cst_72 : bf16 to vector<18x1x4xbf16>
      %c0_73 = arith.constant 0 : index
      %c0_74 = arith.constant 0 : index
      %c0_75 = arith.constant 0 : index
      %72 = vector.load %arg6[%c0_73, %c0_74, %c0_75] : memref<18x18x4xbf16, #tpu.memory_space<vmem>>, vector<18x1x4xbf16>
      tpu.vector_store %arg6[%c0_73, %c0_74, %c0_75], %71 {strides = array<i32>} : memref<18x18x4xbf16, #tpu.memory_space<vmem>>, vector<18x1x4xbf16>,
      %c0_76 = arith.constant 0 : index
      %c17_77 = arith.constant 17 : index
      %c0_78 = arith.constant 0 : index
      %73 = vector.load %arg6[%c0_76, %c17_77, %c0_78] : memref<18x18x4xbf16, #tpu.memory_space<vmem>>, vector<18x1x4xbf16>
      tpu.vector_store %arg6[%c0_76, %c17_77, %c0_78], %71 {strides = array<i32>} : memref<18x18x4xbf16, #tpu.memory_space<vmem>>, vector<18x1x4xbf16>,
      %c0_79 = arith.constant 0 : index
      %c0_80 = arith.constant 0 : index
      %c0_81 = arith.constant 0 : index
      %c0_82 = arith.constant 0 : index
      %74 = vector.load %arg2[%c0_79, %c0_80, %c0_81, %c0_82] : memref<1x16x16x4xf32, #tpu.memory_space<vmem>>, vector<1x16x16x4xf32>
      %75 = vector.shape_cast %74 : vector<1x16x16x4xf32> to vector<16x16x4xf32>
      %76 = arith.truncf %75 : vector<16x16x4xf32> to vector<16x16x4xbf16>
      %c1_83 = arith.constant 1 : index
      %c1_84 = arith.constant 1 : index
      %c0_85 = arith.constant 0 : index
      %77 = vector.load %arg6[%c1_83, %c1_84, %c0_85] : memref<18x18x4xbf16, #tpu.memory_space<vmem>>, vector<16x16x4xbf16>
      tpu.vector_store %arg6[%c1_83, %c1_84, %c0_85], %76 {strides = array<i32>} : memref<18x18x4xbf16, #tpu.memory_space<vmem>>, vector<16x16x4xbf16>,
      %cst_86 = arith.constant 0.000000e+00 : bf16
      %78 = vector.broadcast %cst_86 : bf16 to vector<16x16x4xbf16>
      %c0_87 = arith.constant 0 : index
      %c0_88 = arith.constant 0 : index
      %c36 = arith.constant 36 : index
      %79 = vector.load %arg7[%c0_87, %c0_88, %c36] : memref<16x16x40xbf16, #tpu.memory_space<vmem>>, vector<16x16x4xbf16>
      tpu.vector_store %arg7[%c0_87, %c0_88, %c36], %78 {strides = array<i32>} : memref<16x16x40xbf16, #tpu.memory_space<vmem>>, vector<16x16x4xbf16>,
    } else {
    }
    %c0_i32_1 = arith.constant 0 : i32
    %3 = arith.cmpi eq, %arg1, %c0_i32_1 : i32
    %4 = arith.extui %3 : i1 to i32
    %c0_i32_2 = arith.constant 0 : i32
    %5 = arith.cmpi ne, %4, %c0_i32_2 : i32
    scf.if %5 {
      %cst_66 = arith.constant 0.000000e+00 : f32
      %68 = vector.broadcast %cst_66 : f32 to vector<1x8x2xf32>
      %c0_67 = arith.constant 0 : index
      %c0_68 = arith.constant 0 : index
      %c0_69 = arith.constant 0 : index
      %69 = vector.load %arg5[%c0_67, %c0_68, %c0_69] : memref<1x8x2xf32, #tpu.memory_space<vmem>>, vector<1x8x2xf32>
      tpu.vector_store %arg5[%c0_67, %c0_68, %c0_69], %68 {strides = array<i32>} : memref<1x8x2xf32, #tpu.memory_space<vmem>>, vector<1x8x2xf32>,
    } else {
    }
    %c16_i32 = arith.constant 16 : i32
    %6 = arith.muli %arg1, %c16_i32 : i32
    %7 = tpu.assume_multiple %6, 16 : i32
    %c0_i32_3 = arith.constant 0 : i32
    %8 = arith.addi %7, %c0_i32_3 : i32
    %9 = arith.index_cast %8 : i32 to index
    %c0 = arith.constant 0 : index
    %c0_4 = arith.constant 0 : index
    %10 = vector.load %arg6[%9, %c0, %c0_4] : memref<18x18x4xbf16, #tpu.memory_space<vmem>>, vector<16x16x4xbf16>
    %c0_5 = arith.constant 0 : index
    %c0_6 = arith.constant 0 : index
    %c0_7 = arith.constant 0 : index
    %11 = vector.load %arg7[%c0_5, %c0_6, %c0_7] : memref<16x16x40xbf16, #tpu.memory_space<vmem>>, vector<16x16x4xbf16>
    tpu.vector_store %arg7[%c0_5, %c0_6, %c0_7], %10 {strides = array<i32>} : memref<16x16x40xbf16, #tpu.memory_space<vmem>>, vector<16x16x4xbf16>,
    %c0_i32_8 = arith.constant 0 : i32
    %12 = arith.addi %7, %c0_i32_8 : i32
    %13 = arith.index_cast %12 : i32 to index
    %c1 = arith.constant 1 : index
    %c0_9 = arith.constant 0 : index
    %14 = vector.load %arg6[%13, %c1, %c0_9] : memref<18x18x4xbf16, #tpu.memory_space<vmem>>, vector<16x16x4xbf16>
    %c0_10 = arith.constant 0 : index
    %c0_11 = arith.constant 0 : index
    %c4 = arith.constant 4 : index
    %15 = vector.load %arg7[%c0_10, %c0_11, %c4] : memref<16x16x40xbf16, #tpu.memory_space<vmem>>, vector<16x16x4xbf16>
    tpu.vector_store %arg7[%c0_10, %c0_11, %c4], %14 {strides = array<i32>} : memref<16x16x40xbf16, #tpu.memory_space<vmem>>, vector<16x16x4xbf16>,
    %c0_i32_12 = arith.constant 0 : i32
    %16 = arith.addi %7, %c0_i32_12 : i32
    %17 = arith.index_cast %16 : i32 to index
    %c2 = arith.constant 2 : index
    %c0_13 = arith.constant 0 : index
    %18 = vector.load %arg6[%17, %c2, %c0_13] : memref<18x18x4xbf16, #tpu.memory_space<vmem>>, vector<16x16x4xbf16>
    %c0_14 = arith.constant 0 : index
    %c0_15 = arith.constant 0 : index
    %c8 = arith.constant 8 : index
    %19 = vector.load %arg7[%c0_14, %c0_15, %c8] : memref<16x16x40xbf16, #tpu.memory_space<vmem>>, vector<16x16x4xbf16>
    tpu.vector_store %arg7[%c0_14, %c0_15, %c8], %18 {strides = array<i32>} : memref<16x16x40xbf16, #tpu.memory_space<vmem>>, vector<16x16x4xbf16>,
    %c1_i32 = arith.constant 1 : i32
    %20 = arith.addi %7, %c1_i32 : i32
    %21 = arith.index_cast %20 : i32 to index
    %c0_16 = arith.constant 0 : index
    %c0_17 = arith.constant 0 : index
    %22 = vector.load %arg6[%21, %c0_16, %c0_17] : memref<18x18x4xbf16, #tpu.memory_space<vmem>>, vector<16x16x4xbf16>
    %c0_18 = arith.constant 0 : index
    %c0_19 = arith.constant 0 : index
    %c12 = arith.constant 12 : index
    %23 = vector.load %arg7[%c0_18, %c0_19, %c12] : memref<16x16x40xbf16, #tpu.memory_space<vmem>>, vector<16x16x4xbf16>
    tpu.vector_store %arg7[%c0_18, %c0_19, %c12], %22 {strides = array<i32>} : memref<16x16x40xbf16, #tpu.memory_space<vmem>>, vector<16x16x4xbf16>,
    %c1_i32_20 = arith.constant 1 : i32
    %24 = arith.addi %7, %c1_i32_20 : i32
    %25 = arith.index_cast %24 : i32 to index
    %c1_21 = arith.constant 1 : index
    %c0_22 = arith.constant 0 : index
    %26 = vector.load %arg6[%25, %c1_21, %c0_22] : memref<18x18x4xbf16, #tpu.memory_space<vmem>>, vector<16x16x4xbf16>
    %c0_23 = arith.constant 0 : index
    %c0_24 = arith.constant 0 : index
    %c16 = arith.constant 16 : index
    %27 = vector.load %arg7[%c0_23, %c0_24, %c16] : memref<16x16x40xbf16, #tpu.memory_space<vmem>>, vector<16x16x4xbf16>
    tpu.vector_store %arg7[%c0_23, %c0_24, %c16], %26 {strides = array<i32>} : memref<16x16x40xbf16, #tpu.memory_space<vmem>>, vector<16x16x4xbf16>,
    %c1_i32_25 = arith.constant 1 : i32
    %28 = arith.addi %7, %c1_i32_25 : i32
    %29 = arith.index_cast %28 : i32 to index
    %c2_26 = arith.constant 2 : index
    %c0_27 = arith.constant 0 : index
    %30 = vector.load %arg6[%29, %c2_26, %c0_27] : memref<18x18x4xbf16, #tpu.memory_space<vmem>>, vector<16x16x4xbf16>
    %c0_28 = arith.constant 0 : index
    %c0_29 = arith.constant 0 : index
    %c20 = arith.constant 20 : index
    %31 = vector.load %arg7[%c0_28, %c0_29, %c20] : memref<16x16x40xbf16, #tpu.memory_space<vmem>>, vector<16x16x4xbf16>
    tpu.vector_store %arg7[%c0_28, %c0_29, %c20], %30 {strides = array<i32>} : memref<16x16x40xbf16, #tpu.memory_space<vmem>>, vector<16x16x4xbf16>,
    %c2_i32 = arith.constant 2 : i32
    %32 = arith.addi %7, %c2_i32 : i32
    %33 = arith.index_cast %32 : i32 to index
    %c0_30 = arith.constant 0 : index
    %c0_31 = arith.constant 0 : index
    %34 = vector.load %arg6[%33, %c0_30, %c0_31] : memref<18x18x4xbf16, #tpu.memory_space<vmem>>, vector<16x16x4xbf16>
    %c0_32 = arith.constant 0 : index
    %c0_33 = arith.constant 0 : index
    %c24 = arith.constant 24 : index
    %35 = vector.load %arg7[%c0_32, %c0_33, %c24] : memref<16x16x40xbf16, #tpu.memory_space<vmem>>, vector<16x16x4xbf16>
    tpu.vector_store %arg7[%c0_32, %c0_33, %c24], %34 {strides = array<i32>} : memref<16x16x40xbf16, #tpu.memory_space<vmem>>, vector<16x16x4xbf16>,
    %c2_i32_34 = arith.constant 2 : i32
    %36 = arith.addi %7, %c2_i32_34 : i32
    %37 = arith.index_cast %36 : i32 to index
    %c1_35 = arith.constant 1 : index
    %c0_36 = arith.constant 0 : index
    %38 = vector.load %arg6[%37, %c1_35, %c0_36] : memref<18x18x4xbf16, #tpu.memory_space<vmem>>, vector<16x16x4xbf16>
    %c0_37 = arith.constant 0 : index
    %c0_38 = arith.constant 0 : index
    %c28 = arith.constant 28 : index
    %39 = vector.load %arg7[%c0_37, %c0_38, %c28] : memref<16x16x40xbf16, #tpu.memory_space<vmem>>, vector<16x16x4xbf16>
    tpu.vector_store %arg7[%c0_37, %c0_38, %c28], %38 {strides = array<i32>} : memref<16x16x40xbf16, #tpu.memory_space<vmem>>, vector<16x16x4xbf16>,
    %c2_i32_39 = arith.constant 2 : i32
    %40 = arith.addi %7, %c2_i32_39 : i32
    %41 = arith.index_cast %40 : i32 to index
    %c2_40 = arith.constant 2 : index
    %c0_41 = arith.constant 0 : index
    %42 = vector.load %arg6[%41, %c2_40, %c0_41] : memref<18x18x4xbf16, #tpu.memory_space<vmem>>, vector<16x16x4xbf16>
    %c0_42 = arith.constant 0 : index
    %c0_43 = arith.constant 0 : index
    %c32 = arith.constant 32 : index
    %43 = vector.load %arg7[%c0_42, %c0_43, %c32] : memref<16x16x40xbf16, #tpu.memory_space<vmem>>, vector<16x16x4xbf16>
    tpu.vector_store %arg7[%c0_42, %c0_43, %c32], %42 {strides = array<i32>} : memref<16x16x40xbf16, #tpu.memory_space<vmem>>, vector<16x16x4xbf16>,
    %c0_44 = arith.constant 0 : index
    %c0_45 = arith.constant 0 : index
    %c0_46 = arith.constant 0 : index
    %44 = vector.load %arg7[%c0_44, %c0_45, %c0_46] : memref<16x16x40xbf16, #tpu.memory_space<vmem>>, vector<16x16x40xbf16>
    %45 = vector.shape_cast %44 : vector<16x16x40xbf16> to vector<256x40xbf16>
    %c0_47 = arith.constant 0 : index
    %c0_48 = arith.constant 0 : index
    %46 = vector.load %arg3[%c0_47, %c0_48] : memref<8x40xbf16, #tpu.memory_space<vmem>>, vector<8x40xbf16>
    %cst = arith.constant dense<0.000000e+00> : vector<8x256xf32>
    %47 = tpu.matmul %46, %45, %cst {dimension_numbers = #tpu.dot_dimension_numbers<[1], [1], [0], [0], [0, 0, 1, 0], [], []>} : vector<8x40xbf16>, vector<256x40xbf16>, vector<8x256xf32> -> vector<8x256xf32>
    %c0_49 = arith.constant 0 : index
    %c0_50 = arith.constant 0 : index
    %c0_51 = arith.constant 0 : index
    %48 = vector.load %arg4[%c0_49, %c0_50, %c0_51] : memref<1x8x256xf32, #tpu.memory_space<vmem>>, vector<1x8x256xf32>
    %49 = vector.shape_cast %48 : vector<1x8x256xf32> to vector<8x256xf32>
    %50 = vector.shape_cast %47 : vector<8x256xf32> to vector<1x8x256xf32>
    tpu.vector_store %arg4[%c0_49, %c0_50, %c0_51], %50 {strides = array<i32>} : memref<1x8x256xf32, #tpu.memory_space<vmem>>, vector<1x8x256xf32>,
    %c0_52 = arith.constant 0 : index
    %c0_53 = arith.constant 0 : index
    %c0_54 = arith.constant 0 : index
    %51 = vector.load %arg5[%c0_52, %c0_53, %c0_54] : memref<1x8x2xf32, #tpu.memory_space<vmem>>, vector<1x8x1xf32>
    %52 = vector.shape_cast %51 : vector<1x8x1xf32> to vector<8x1xf32>
    %cst_55 = arith.constant dense<0.000000e+00> : vector<8xf32>
    %53 = vector.multi_reduction <add>, %47, %cst_55 [1] : vector<8x256xf32> to vector<8xf32>
    %54 = vector.shape_cast %53 : vector<8xf32> to vector<8x1xf32>
    %55 = arith.addf %52, %54 : vector<8x1xf32>
    %c0_56 = arith.constant 0 : index
    %c0_57 = arith.constant 0 : index
    %c0_58 = arith.constant 0 : index
    %56 = vector.load %arg5[%c0_56, %c0_57, %c0_58] : memref<1x8x2xf32, #tpu.memory_space<vmem>>, vector<1x8x1xf32>
    %57 = vector.shape_cast %56 : vector<1x8x1xf32> to vector<8x1xf32>
    %58 = vector.shape_cast %55 : vector<8x1xf32> to vector<1x8x1xf32>
    tpu.vector_store %arg5[%c0_56, %c0_57, %c0_58], %58 {strides = array<i32>} : memref<1x8x2xf32, #tpu.memory_space<vmem>>, vector<1x8x1xf32>,
    %c0_59 = arith.constant 0 : index
    %c0_60 = arith.constant 0 : index
    %c1_61 = arith.constant 1 : index
    %59 = vector.load %arg5[%c0_59, %c0_60, %c1_61] : memref<1x8x2xf32, #tpu.memory_space<vmem>>, vector<1x8x1xf32>
    %60 = vector.shape_cast %59 : vector<1x8x1xf32> to vector<8x1xf32>
    %61 = arith.mulf %47, %47 : vector<8x256xf32>
    %cst_62 = arith.constant dense<0.000000e+00> : vector<8xf32>
    %62 = vector.multi_reduction <add>, %61, %cst_62 [1] : vector<8x256xf32> to vector<8xf32>
    %63 = vector.shape_cast %62 : vector<8xf32> to vector<8x1xf32>
    %64 = arith.addf %60, %63 : vector<8x1xf32>
    %c0_63 = arith.constant 0 : index
    %c0_64 = arith.constant 0 : index
    %c1_65 = arith.constant 1 : index
    %65 = vector.load %arg5[%c0_63, %c0_64, %c1_65] : memref<1x8x2xf32, #tpu.memory_space<vmem>>, vector<1x8x1xf32>
    %66 = vector.shape_cast %65 : vector<1x8x1xf32> to vector<8x1xf32>
    %67 = vector.shape_cast %64 : vector<8x1xf32> to vector<1x8x1xf32>
    tpu.vector_store %arg5[%c0_63, %c0_64, %c1_65], %67 {strides = array<i32>} : memref<1x8x2xf32, #tpu.memory_space<vmem>>, vector<1x8x1xf32>,
    return
  }
  func.func @transform_0(%arg0: i32, %arg1: i32) -> (i32, i32, i32, i32) {
    %c0_i32 = arith.constant 0 : i32
    %c0_i32_0 = arith.constant 0 : i32
    %c0_i32_1 = arith.constant 0 : i32
    %c0_i32_2 = arith.constant 0 : i32
    return %arg0, %c0_i32, %c0_i32_0, %c0_i32_1 : i32, i32, i32, i32
  }
  func.func @transform_1(%arg0: i32, %arg1: i32) -> (i32, i32) {
    %c0_i32 = arith.constant 0 : i32
    %c0_i32_0 = arith.constant 0 : i32
    %c0_i32_1 = arith.constant 0 : i32
    return %c0_i32, %c0_i32_0 : i32, i32
  }
  func.func @transform_2(%arg0: i32, %arg1: i32) -> (i32, i32, i32) {
    %c0_i32 = arith.constant 0 : i32
    %c0_i32_0 = arith.constant 0 : i32
    return %arg0, %c0_i32, %arg1 : i32, i32, i32
  }
  func.func @transform_3(%arg0: i32, %arg1: i32) -> (i32, i32, i32) {
    %c0_i32 = arith.constant 0 : i32
    %c0_i32_0 = arith.constant 0 : i32
    %c0_i32_1 = arith.constant 0 : i32
    return %arg0, %c0_i32, %c0_i32_0 : i32, i32, i32
  }
}

module attributes {stable_mosaic.version = 11 : i64} {
  func.func @_bn_relu_kernel(%arg0: i32, %arg1: memref<1x8x256xf32, #tpu.memory_space<vmem>>, %arg2: memref<8x1xf32, #tpu.memory_space<vmem>>, %arg3: memref<8x1xf32, #tpu.memory_space<vmem>>, %arg4: memref<1x8x256xf32, #tpu.memory_space<vmem>>) attributes {dimension_semantics = [#tpu.dimension_semantics<parallel>], iteration_bounds = array<i64: 2>, scalar_prefetch = 0 : i64, scratch_operands = 0 : i64, tpu.core_type = #tpu.core_type<tc>, window_params = [{transform_indices = @transform_0, window_bounds = array<i64: 1, 8, 256>}, {pipeline_mode = #tpu.pipeline_mode<synchronous>, transform_indices = @transform_1, window_bounds = array<i64: 8, 1>}, {pipeline_mode = #tpu.pipeline_mode<synchronous>, transform_indices = @transform_2, window_bounds = array<i64: 8, 1>}, {transform_indices = @transform_3, window_bounds = array<i64: 1, 8, 256>}]} {
    %c0 = arith.constant 0 : index
    %c0_0 = arith.constant 0 : index
    %c0_1 = arith.constant 0 : index
    %0 = vector.load %arg1[%c0, %c0_0, %c0_1] : memref<1x8x256xf32, #tpu.memory_space<vmem>>, vector<1x8x256xf32>
    %1 = vector.shape_cast %0 : vector<1x8x256xf32> to vector<8x256xf32>
    %c0_2 = arith.constant 0 : index
    %c0_3 = arith.constant 0 : index
    %2 = vector.load %arg2[%c0_2, %c0_3] : memref<8x1xf32, #tpu.memory_space<vmem>>, vector<8x1xf32>
    %3 = vector.broadcast %2 : vector<8x1xf32> to vector<8x256xf32>
    %4 = arith.mulf %1, %3 : vector<8x256xf32>
    %c0_4 = arith.constant 0 : index
    %c0_5 = arith.constant 0 : index
    %5 = vector.load %arg3[%c0_4, %c0_5] : memref<8x1xf32, #tpu.memory_space<vmem>>, vector<8x1xf32>
    %6 = vector.broadcast %5 : vector<8x1xf32> to vector<8x256xf32>
    %7 = arith.addf %4, %6 : vector<8x256xf32>
    %cst = arith.constant 0.000000e+00 : f32
    %8 = vector.broadcast %cst : f32 to vector<8x256xf32>
    %9 = arith.maximumf %7, %8 : vector<8x256xf32>
    %c0_6 = arith.constant 0 : index
    %c0_7 = arith.constant 0 : index
    %c0_8 = arith.constant 0 : index
    %10 = vector.load %arg4[%c0_6, %c0_7, %c0_8] : memref<1x8x256xf32, #tpu.memory_space<vmem>>, vector<1x8x256xf32>
    %11 = vector.shape_cast %10 : vector<1x8x256xf32> to vector<8x256xf32>
    %12 = vector.shape_cast %9 : vector<8x256xf32> to vector<1x8x256xf32>
    tpu.vector_store %arg4[%c0_6, %c0_7, %c0_8], %12 {strides = array<i32>} : memref<1x8x256xf32, #tpu.memory_space<vmem>>, vector<1x8x256xf32>,
    return
  }
  func.func @transform_0(%arg0: i32) -> (i32, i32, i32) {
    %c0_i32 = arith.constant 0 : i32
    %c0_i32_0 = arith.constant 0 : i32
    %c0_i32_1 = arith.constant 0 : i32
    return %arg0, %c0_i32, %c0_i32_0 : i32, i32, i32
  }
  func.func @transform_1(%arg0: i32) -> (i32, i32) {
    %c0_i32 = arith.constant 0 : i32
    %c0_i32_0 = arith.constant 0 : i32
    %c0_i32_1 = arith.constant 0 : i32
    return %c0_i32, %c0_i32_0 : i32, i32
  }
  func.func @transform_2(%arg0: i32) -> (i32, i32) {
    %c0_i32 = arith.constant 0 : i32
    %c0_i32_0 = arith.constant 0 : i32
    %c0_i32_1 = arith.constant 0 : i32
    return %c0_i32, %c0_i32_0 : i32, i32
  }
  func.func @transform_3(%arg0: i32) -> (i32, i32, i32) {
    %c0_i32 = arith.constant 0 : i32
    %c0_i32_0 = arith.constant 0 : i32
    %c0_i32_1 = arith.constant 0 : i32
    return %arg0, %c0_i32, %c0_i32_0 : i32, i32, i32
  }
}

</mosaic_0001>

<bundles_post_ra>
// kernel: basic_conv.3
= control target key start
LH: loop header
LB: loop body
LE: loop exit
PB: predicated region body
PF: predicated region fallthrough
CT: control target
= control target key end

     0   :  { %s300_s12 = smov 0   ;;  %s323_s0 = inlined_call_operand.vmem [shape: f32[2,8,256], index: 0, kind: input, shape index: {}, may-alias: {0,3}]   ;;  %s324_s1 = inlined_call_operand.vmem [shape: f32[8,1], index: 1, kind: input, shape index: {}]   ;;  %s325_s2 = inlined_call_operand.vmem [shape: f32[8,1], index: 2, kind: input, shape index: {}]   ;;  %s326_s3 = inlined_call_operand.vmem [shape: f32[2,8,256], index: 3, kind: output, shape index: {}, may-alias: {0,3}]  }
   0x1 LB: > { %s248_s13 = sadd.s32 4294967295, %s277_s12   ;;  %p252_p0 = scmp.ge.s32.totalorder %s277_s12, 1  ;;  %s277_s12 = sphi %s300_s12, %s13_s12  }
   0x2   : > { %p137_p1 = scmp.lt.s32.totalorder %s277_s12, 3 }
   0x4   : > { %p138_p2 = pnand %p252_p0, %p137_p1 }
   0x5   : > { %p161_p3 = scmp.lt.s32.totalorder (!%p138_p2), %s248_s13, 1 }
   0x6   : > { %141 = sbr.rel (%p138_p2) target bundleno = 142 (0x8e), region = 32 }
   0xb   : > { %v173_v0 = vld [vmem:[%s324_s1] sm:$0xff]  ;;  %v279_v1 = vmov 0   ;;  %s328_s13 = smov (!%p161_p3, %s248_s13), 1 }
   0xc   : > { %270 = vset.pattern.permute.xlu0 %v279_v1  ;;  %v181_v2 = vld [vmem:[%s325_s2] sm:$0xff]  ;;  %s259_s18 = sshll.u32 %s328_s13, 4 }
   0xd   : > { %176 = vperm.xlu0 %270, %v173_v0   ;;  %s165_s21 = scalar_lea.vmem %s323_s0, %s259_s18  ;;  %s170_s24 = scalar_lea.vmem %s326_s3, %s259_s18 }
   0xe   : > { %v171_v4 = vld [vmem:[%s165_s21] sm:$0xff]  ;;  %v172_v5 = vld [vmem:[%s165_s21 + $0x8] sm:$0xff] }
  0x15   : > { %184 = vperm.xlu0 %270, %v181_v2  }
  0x7f   : > { %v177_v3 = vpop.permute.xlu0 %176 }
  0x80   : > { %v179_v6 = vmul.f32 %v177_v3, %v171_v4  ;;  %v180_v7 = vmul.f32 %v177_v3, %v172_v5 }
  0x87   : > { %v185_v8 = vpop.permute.xlu0 %184 }
  0x88   : > { %v187_v9 = vadd.f32 %v185_v8, %v179_v6  ;;  %v188_v10 = vadd.f32 %v185_v8, %v180_v7 }
  0x8a   : > { %v189_v11 = vmax.f32 %v187_v9, 0.0  ;;  %v190_v12 = vmax.f32 %v188_v10, 0.0 }
  0x8c   : > { %191 = vst [vmem:[%s170_s24] sm:$0xff] %v189_v11 }
  0x8d   : > { %192 = vst [vmem:[%s170_s24 + $0x8] sm:$0xff] %v190_v12 }
  0x8e PF: > { %s13_s12 = sadd.s32 1, %s277_s12  }
  0x8f   : > { %p10_p4 = scmp.ge.s32.totalorder %s13_s12, 4  }
  0x91   :  { %12 = sbr.rel (!%p10_p4) target bundleno = 1 (0x1), region = 62 }

// kernel: basic_conv.2
= control target key start
LH: loop header
LB: loop body
LE: loop exit
PB: predicated region body
PF: predicated region fallthrough
CT: control target
= control target key end

     0   :  { %s4850_s12 = smov 0   ;;  %s4852_s13 = smov 0   ;;  %s6836_s0 = inlined_call_operand.vmem [shape: f32[2,16,16,4], index: 0, kind: input, shape index: {}]   ;;  %s6837_s1 = inlined_call_operand.vmem [shape: bf16[8,40], index: 1, kind: input, shape index: {}]   ;;  %s6838_s2 = inlined_call_operand.vmem [shape: f32[2,8,256], index: 2, kind: output, shape index: {0}]   ;;  %s6839_s3 = inlined_call_operand.vmem [shape: f32[2,8,2], index: 3, kind: output, shape index: {1}]  }
   0x1   :  { %s4854_s14 = smov 0  }
   0x2 LB: > { %s26_s15 = sadd.s32 1, %s4814_s13  ;;  %p4366_p0 = scmp.ge.s32.totalorder %s4818_s14, 1  ;;  %s4818_s14 = sphi %s4854_s14, %s14_s14   ;;  %s4814_s13 = sphi %s4852_s13, %s6853_s13   ;;  %s4810_s12 = sphi %s4850_s12, %s6852_s12  }
   0x3   : > { %p28_p1 = scmp.ge.s32.totalorder %s26_s15, 2  ;;  %p154_p2 = scmp.lt.s32.totalorder %s4818_s14, 3 }
   0x5   : > { %s6855_s15 = smov (%p28_p1, %s26_s15), 0  ;;  %p155_p3 = pnand %p4366_p0, %p154_p2 }
   0x6   : > { %p186_p4 = scmp.lt.s32.totalorder (!%p155_p3), %s4810_s12, 1  ;;  %s4821_s20 = smov (!%p155_p3), 4  }
   0x7   : > { %158 = sbr.rel (%p155_p3) target bundleno = 1143 (0x477), region = 28  ;;  %s4822_s21 = smov (!%p155_p3), 8  }
   0x8   : > { %s4823_s22 = smov (!%p155_p3), 12   ;;  %s4824_s23 = smov (!%p155_p3), 16  }
   0x9   : > { %s4825_s24 = smov (!%p155_p3), 20   ;;  %s4826_s25 = smov (!%p155_p3), 24  }
   0xa   : > { %s4827_s26 = smov (!%p155_p3), 28   ;;  %s4828_s27 = smov (!%p155_p3), 32  }
   0xc   : > { %vm210_vm0 = vcmask 27648   ;;  %vm213_vm1 = vcmask 24576   ;;  %vm220_vm2 = vsmask.f32 256  ;;  %v4820_v0 = vmov 0   ;;  %s6857_s12 = smov (!%p186_p4, %s4810_s12), 1 }
   0xd   : > { %212 = vst.msk [vmem:[#allocation2 + $0x4] sm:$0xf] %vm210_vm0, %v4820_v0  ;;  %vm4872_vm3 = vmand %vm213_vm1, %vm220_vm2  ;;  %vm276_vm4 = vsmask.f32 7938  ;;  %v225_v2 = vld [vmem:[#allocation2 + $0xc] sm:$0x1] }
   0xe   : > { %214 = vst.msk [vmem:[#allocation2 + $0x8] sm:$0x1] %vm213_vm1, %v4820_v0  ;;  %v226_v3 = vsel %vm4872_vm3, 0, %v225_v2  ;;  %v231_v4 = vld [vmem:[#allocation2 + $0x24] sm:$0x1]  ;;  %vm4892_vm5 = vmand %vm213_vm1, %vm276_vm4  ;;  %s4744_s16 = sshll.u32 %s6857_s12, 8 }
   0xf   : > { %211 = vst.msk [vmem:[#allocation2] sm:$0xf] %vm210_vm0, %v4820_v0  ;;  %v232_v5 = vsel %vm4872_vm3, 0, %v231_v4  ;;  %v281_v6 = vld [vmem:[#allocation2 + $0x14] sm:$0x1]  ;;  %s4902_s19 = scalar_lea.vmem %s6836_s0, %s4744_s16  ;;  %vm4922_vm9 = vmand %vm210_vm0, %vm276_vm4  ;;  %vm1597_vm12 = vcmask 1042432  }
  0x10   : > { %216 = vst.msk [vmem:[#allocation2 + $0xcc] sm:$0xf] %vm210_vm0, %v4820_v0  ;;  %v290_v8 = vld [vmem:[#allocation2 + $0x38] sm:$0x1]  ;;  %vm396_vm6 = vsmask.f32 4368 }
  0x11   : > { %217 = vst.msk [vmem:[#allocation2 + $0xd0] sm:$0xf] %vm210_vm0, %v4820_v0  ;;  %v282_v9 = vsel %vm4892_vm5, 0, %v281_v6  ;;  %v291_v10 = vsel %vm4892_vm5, 0, %v290_v8  ;;  %v332_v12 = vld [vmem:[%s4902_s19] sm:$0xff]  ;;  %v333_v13 = vld [vmem:[%s4902_s19 + $0x8] sm:$0xff]  ;;  %vm4931_vm10 = vmor %vm220_vm2, %vm396_vm6 }
  0x12   : > { %218 = vst.msk [vmem:[#allocation2 + $0xd4] sm:$0x1] %vm213_vm1, %v4820_v0  ;;  %vm985_vm7 = vsmask.f32 3328  ;;  %vm986_vm8 = vsmask.f32 7440  ;;  %v364_v17 = vpack.c.bf16 %v332_v12, %v332_v12  ;;  %v365_v18 = vpack.c.bf16 %v333_v13, %v333_v13 }
  0x13   : > { %227 = vst [vmem:[#allocation2 + $0xc] sm:$0x1] %v226_v3  ;;  %v336_v19 = vld [vmem:[%s4902_s19 + $0x20] sm:$0xff]  ;;  %v337_v20 = vld [vmem:[%s4902_s19 + $0x28] sm:$0xff]  ;;  %v338_v25 = vld [vmem:[%s4902_s19 + $0x30] sm:$0xff]  ;;  %vm1598_vm13 = vcmask 1046532  }
  0x14   : > { %v938_v11 = vld [vmem:[#allocation2 + $0x4] sm:$0xf]  ;;  %233 = vst [vmem:[#allocation2 + $0x24] sm:$0x1] %v232_v5  ;;  %v368_v23 = vpack.c.bf16 %v336_v19, %v336_v19  ;;  %v369_v24 = vpack.c.bf16 %v337_v20, %v337_v20  ;;  %v399_v29 = vshrl.u32 %v364_v17, 16  ;;  %v402_v30 = vshll.u32 %v364_v17, 16  ;;  %vm4959_vm11 = vmor %vm985_vm7, %vm986_vm8 }
  0x15   : > { %v278_v14 = vld [vmem:[#allocation2 + $0x8] sm:$0x1]  ;;  %v998_v15 = vshll.u32 %v938_v11, 16  ;;  %v1002_v16 = vshrl.u32 %v938_v11, 16  ;;  %283 = vst [vmem:[#allocation2 + $0x14] sm:$0x1] %v282_v9  ;;  %v4927_v45 = vpack.c.bf16 %v338_v25, %v338_v25  ;;  %vm5401_vm14 = vmor %vm1597_vm12, %vm1598_vm13 }
  0x16   : > { %v279_v21 = vsel %vm4892_vm5, 0, %v278_v14  ;;  %v222_v22 = vld [vmem:[#allocation2] sm:$0x1]  ;;  %v407_v31 = vshrl.u32 %v365_v18, 16  ;;  %v410_v32 = vshll.u32 %v365_v18, 16  ;;  %v433_v33 = vshrl.u32 %v368_v23, 16 }
  0x17   : > { %280 = vst [vmem:[#allocation2 + $0x8] sm:$0x1] %v279_v21  ;;  %v4915_v26 = vrot.slane %v998_v15, 5  ;;  %v1004_v27 = vrot.slane %v1002_v16, 4  ;;  %v223_v28 = vsel %vm4872_vm3, 0, %v222_v22  ;;  %v401_v35 = vrot.slane %v399_v29, 7 }
  0x18   : > { %224 = vst [vmem:[#allocation2] sm:$0x1] %v223_v28  ;;  %v436_v36 = vshll.u32 %v368_v23, 16  ;;  %v441_v37 = vshrl.u32 %v369_v24, 16  ;;  %v287_v38 = vld [vmem:[#allocation2 + $0x2c] sm:$0x1] }
  0x19   : > { %v1005_v34 = vor.u32 %v1004_v27, %v4915_v26  ;;  %292 = vst [vmem:[#allocation2 + $0x38] sm:$0x1] %v291_v10  ;;  %v409_v40 = vrot.slane %v407_v31, 7  ;;  %v435_v42 = vrot.slane %v433_v33, 7  ;;  %v444_v43 = vshll.u32 %v369_v24, 16  ;;  %v339_v44 = vld [vmem:[%s4902_s19 + $0x38] sm:$0xff] }
  0x1a   : > { %v721_v41 = vld [vmem:[#allocation2 + $0xc] sm:$0xf]  ;;  %v404_v48 = vor.u32 %v402_v30, %v401_v35  ;;  %v405_v49 = vrot.slane %v401_v35, 4  ;;  %v4935_v50 = vrot.slane %v441_v37, 7  ;;  %v342_v56 = vld [vmem:[%s4902_s19 + $0x50] sm:$0xff]  ;;  %v371_v60 = vpack.c.bf16 %v339_v44, %v339_v44  ;;  %v343_v62 = vld [vmem:[%s4902_s19 + $0x58] sm:$0xff] }
  0x1b   : > { %v1006_v46 = vrot.slane %v1005_v34, 4  ;;  %v735_v51 = vld [vmem:[#allocation2 + $0x24] sm:$0xf]  ;;  %v412_v52 = vor.u32 %v410_v32, %v409_v40  ;;  %v438_v53 = vor.u32 %v436_v36, %v435_v42  ;;  %v439_v54 = vrot.slane %v435_v42, 4  ;;  %v240_v6 = vld [vmem:[#allocation2 + $0x48] sm:$0x1] }
  0x1c   : > { %v414_v55 = vrot.slane %v409_v40, 4  ;;  %v722_v57 = vsel %vm4922_vm9, %v404_v48, %v721_v41  ;;  %v446_v58 = vor.u32 %v444_v43, %v4935_v50  ;;  %v725_v59 = vld [vmem:[#allocation2 + $0x14] sm:$0x1]  ;;  %v450_v61 = vshrl.u32 %v4927_v45, 16  ;;  %v4963_v19 = vld [vmem:[#allocation2 + $0x18] sm:$0x1] }
  0x1d   : > { %v413_v2 = vsel %vm4931_vm10, %v405_v49, %v412_v52  ;;  %723 = vst [vmem:[#allocation2 + $0xc] sm:$0xf] %v722_v57  ;;  %v736_v3 = vsel %vm4922_vm9, %v438_v53, %v735_v51  ;;  %v288_v5 = vsel %vm4892_vm5, 0, %v287_v38  ;;  %v334_v8 = vld [vmem:[%s4902_s19 + $0x10] sm:$0xff]  ;;  %v374_v13 = vpack.c.bf16 %v342_v56, %v342_v56  ;;  %v335_v23 = vld [vmem:[%s4902_s19 + $0x18] sm:$0xff]  ;;  %s4371_s30 = sshll.u32 %s6857_s12, 3 }
  0x1e   : > { %v939_v63 = vld [vmem:[#allocation2 + $0x8] sm:$0x1]  ;;  %v726_v4 = vsel %vm4872_vm3, %v414_v55, %v725_v59  ;;  %724 = vst.msk [vmem:[#allocation2 + $0x10] sm:$0xf] %vm210_vm0, %v413_v2  ;;  %v447_v11 = vsel %vm4931_vm10, %v439_v54, %v446_v58  ;;  %v4955_v12 = vrot.slane %v450_v61, 7  ;;  %v458_v17 = vshrl.u32 %v371_v60, 16  ;;  %s204_s6 = scalar_lea.vmem %s6839_s3, %s4371_s30 }
  0x1f   : > { %v1008_v9 = vshll.u32 %v939_v63, 16  ;;  %v937_v10 = vld [vmem:[#allocation2] sm:$0xf]  ;;  %737 = vst [vmem:[#allocation2 + $0x24] sm:$0xf] %v736_v3  ;;  %v461_v18 = vshll.u32 %v371_v60, 16  ;;  %v4967_v22 = vpack.c.bf16 %v343_v62, %v343_v62  ;;  %v4970_v24 = vpack.c.bf16 %v334_v8, %v334_v8 }
  0x20   : > { %v989_v15 = vshrl.u32 %v937_v10, 16  ;;  %v992_v16 = vshll.u32 %v937_v10, 16  ;;  %738 = vst.msk [vmem:[#allocation2 + $0x28] sm:$0xf] %vm210_vm0, %v447_v11  ;;  %v456_v21 = vrot.slane %v4955_v12, 4  ;;  %v460_v28 = vrot.slane %v458_v17, 7 }
  0x21   : > { %v1010_v20 = vrot.slane %v1008_v9, 5  ;;  %727 = vst [vmem:[#allocation2 + $0x14] sm:$0x1] %v726_v4  ;;  %v448_v29 = vrot.slane %v4935_v50, 4  ;;  %v241_v31 = vsel %vm4872_vm3, 0, %v240_v6  ;;  %v484_v32 = vshrl.u32 %v374_v13, 16 }
  0x22   : > { %v991_v25 = vrot.slane %v989_v15, 4  ;;  %v994_v27 = vrot.slane %v992_v16, 5  ;;  %289 = vst [vmem:[#allocation2 + $0x2c] sm:$0x1] %v288_v5  ;;  %v487_v33 = vshll.u32 %v374_v13, 16  ;;  %v463_v35 = vor.u32 %v461_v18, %v460_v28  ;;  %s4745_s7 = sshll.u32 %s6857_s12, 4 }
  0x23   : > { %v1011_v30 = vsel %vm4959_vm11, %v1006_v46, %v1010_v20  ;;  %v465_v36 = vrot.slane %v460_v28, 4  ;;  %v746_v37 = vld [vmem:[#allocation2 + $0x38] sm:$0x1]  ;;  %242 = vst [vmem:[#allocation2 + $0x48] sm:$0x1] %v241_v31  ;;  %v492_v38 = vshrl.u32 %v4967_v22, 16  ;;  %v4985_v44 = vpack.c.bf16 %v335_v23, %v335_v23  ;;  %s199_s10 = scalar_lea.vmem %s6838_s2, %s4745_s7 }
  0x24   : > { %1374 = vrot.lane.b32.xlu0 %v1011_v30, %s4821_s20  ;;  %v995_v34 = vor.u32 %v994_v27, %v991_v25  ;;  %v940_v40 = vld [vmem:[#allocation2 + $0xc] sm:$0xf]  ;;  %v4979_v41 = vrot.slane %v484_v32, 7  ;;  %v495_v42 = vshll.u32 %v4967_v22, 16  ;;  %v229_v43 = vsel %vm4872_vm3, 0, %v4963_v19 }
  0x25   : > { %v941_v48 = vld [vmem:[#allocation2 + $0x10] sm:$0xf]  ;;  %v1013_v49 = vshrl.u32 %v940_v40, 16  ;;  %v1016_v50 = vshll.u32 %v940_v40, 16  ;;  %v464_v51 = vsel %vm4931_vm10, %v456_v21, %v463_v35  ;;  %v747_v55 = vsel %vm4872_vm3, %v465_v36, %v746_v37  ;;  %v237_v32 = vld [vmem:[#allocation2 + $0x3c] sm:$0x1] }
  0x26   : > { %v996_v46 = vrot.slane %v995_v34, 4  ;;  %v1022_v52 = vshll.u32 %v941_v48, 16  ;;  %v1026_v53 = vshrl.u32 %v941_v48, 16  ;;  %v946_v54 = vld [vmem:[#allocation2 + $0x24] sm:$0xf]  ;;  %v489_v56 = vor.u32 %v487_v33, %v4979_v41 }
  0x27   : > { %745 = vst.msk [vmem:[#allocation2 + $0x34] sm:$0xf] %vm210_vm0, %v464_v51  ;;  %v1015_v58 = vrot.slane %v1013_v49, 4  ;;  %v1018_v59 = vrot.slane %v1016_v50, 5  ;;  %v947_v60 = vld [vmem:[#allocation2 + $0x28] sm:$0xf] }
  0x28   : > { %v1001_v57 = vsel %vm4959_vm11, %v996_v46, %v4915_v26  ;;  %v1061_v61 = vshrl.u32 %v946_v54, 16  ;;  %v1024_v62 = vrot.slane %v1022_v52, 5  ;;  %v1028_v63 = vrot.slane %v1026_v53, 4  ;;  %v942_v4 = vld [vmem:[#allocation2 + $0x14] sm:$0x1]  ;;  %v340_v37 = vld [vmem:[%s4902_s19 + $0x40] sm:$0xff] }
  0x29   : > { %v1064_v2 = vshll.u32 %v946_v54, 16  ;;  %v1070_v3 = vshll.u32 %v947_v60, 16  ;;  %v1019_v5 = vor.u32 %v1018_v59, %v1015_v58  ;;  %v1074_v8 = vshrl.u32 %v947_v60, 16  ;;  %748 = vst [vmem:[#allocation2 + $0x38] sm:$0x1] %v747_v55 }
  0x2a   : > { %v1063_v6 = vrot.slane %v1061_v61, 4  ;;  %v1032_v9 = vshll.u32 %v942_v4, 16  ;;  %v1029_v13 = vor.u32 %v1028_v63, %v1024_v62  ;;  %v739_v15 = vld [vmem:[#allocation2 + $0x2c] sm:$0x1]  ;;  %v490_v26 = vrot.slane %v4979_v41, 4 }
  0x2b   : > { %v1066_v10 = vrot.slane %v1064_v2, 5  ;;  %v1072_v11 = vrot.slane %v1070_v3, 5  ;;  %v1020_v16 = vrot.slane %v1019_v5, 4  ;;  %v740_v18 = vsel %vm4872_vm3, %v448_v29, %v739_v15  ;;  %v756_v20 = vld [vmem:[#allocation2 + $0x48] sm:$0xf] }
  0x2c   : > { %1372 = vrot.lane.b32.xlu0 %v1001_v57, %s4821_s20  ;;  %v1034_v17 = vrot.slane %v1032_v9, 5  ;;  %v1076_v19 = vrot.slane %v1074_v8, 4  ;;  %v1030_v22 = vrot.slane %v1029_v13, 4  ;;  %741 = vst [vmem:[#allocation2 + $0x2c] sm:$0x1] %v740_v18  ;;  %v5000_v23 = vrot.slane %v492_v38, 7 }
  0x2d   : > { %v1067_v21 = vor.u32 %v1066_v10, %v1063_v6  ;;  %v757_v25 = vsel %vm4922_vm9, %v489_v56, %v756_v20  ;;  %v1025_v27 = vsel %vm4959_vm11, %v1020_v16, %v1024_v62  ;;  %v416_v29 = vshrl.u32 %v4970_v24, 16  ;;  %230 = vst [vmem:[#allocation2 + $0x18] sm:$0x1] %v229_v43  ;;  %v299_v48 = vld [vmem:[#allocation2 + $0x5c] sm:$0x1]  ;;  %v344_v43 = vld [vmem:[%s4902_s19 + $0x60] sm:$0xff] }
  0x2e   : > { %v950_v28 = vld [vmem:[#allocation2 + $0x34] sm:$0xf]  ;;  %v1077_v30 = vor.u32 %v1076_v19, %v1072_v11  ;;  %758 = vst [vmem:[#allocation2 + $0x48] sm:$0xf] %v757_v25  ;;  %v419_v31 = vshll.u32 %v4970_v24, 16  ;;  %1376 = vrot.lane.b32.xlu1 %v1025_v27, %s4821_s20  ;;  %v1035_v34 = vsel %vm4959_vm11, %v1030_v22, %v1034_v17  ;;  %v497_v40 = vor.u32 %v495_v42, %v5000_v23  ;;  %v341_v24 = vld [vmem:[%s4902_s19 + $0x48] sm:$0xff] }
  0x2f   : > { %v1068_v33 = vrot.slane %v1067_v21, 4  ;;  %v1094_v35 = vshll.u32 %v950_v28, 16  ;;  %v1098_v36 = vshrl.u32 %v950_v28, 16  ;;  %v418_v41 = vrot.slane %v416_v29, 7  ;;  %v345_v9 = vld [vmem:[%s4902_s19 + $0x68] sm:$0xff] }
  0x30   : > { %v5012_v38 = vrot.slane %v1077_v30, 4  ;;  %v424_v46 = vshrl.u32 %v4985_v44, 16  ;;  %v951_v50 = vld [vmem:[#allocation2 + $0x38] sm:$0x1]  ;;  %v427_v53 = vshll.u32 %v4985_v44, 16  ;;  %v498_v55 = vsel %vm4931_vm10, %v490_v26, %v497_v40 }
  0x31   : > { %v1073_v49 = vsel %vm4959_vm11, %v1068_v33, %v1072_v11  ;;  %v5019_v51 = vrot.slane %v1094_v35, 5  ;;  %v1100_v52 = vrot.slane %v1098_v36, 4  ;;  %v1104_v54 = vshll.u32 %v951_v50, 16  ;;  %759 = vst.msk [vmem:[#allocation2 + $0x4c] sm:$0xf] %vm210_vm0, %v498_v55 }
  0x32   : > { %v421_v42 = vor.u32 %v419_v31, %v418_v41  ;;  %v422_v56 = vrot.slane %v418_v41, 4  ;;  %v5027_v58 = vrot.slane %v424_v46, 7  ;;  %v238_v59 = vsel %vm4872_vm3, 0, %v237_v32  ;;  %v284_v20 = vld [vmem:[#allocation2 + $0x20] sm:$0x1] }
  0x33   : > { %v1101_v57 = vor.u32 %v1100_v52, %v5019_v51  ;;  %v372_v60 = vpack.c.bf16 %v340_v37, %v340_v37  ;;  %v1106_v44 = vrot.slane %v1104_v54, 5  ;;  %v948_v61 = vld [vmem:[#allocation2 + $0x2c] sm:$0x1]  ;;  %239 = vst [vmem:[#allocation2 + $0x3c] sm:$0x1] %v238_v59  ;;  %v373_v62 = vpack.c.bf16 %v341_v24, %v341_v24 }
  0x34   : > { %1384 = vrot.lane.b32.xlu0 %v1073_v49, %s4821_s20  ;;  %v300_v63 = vsel %vm4892_vm5, 0, %v299_v48  ;;  %v5034_v2 = vpack.c.bf16 %v344_v43, %v344_v43  ;;  %v1080_v4 = vshll.u32 %v948_v61, 16  ;;  %v429_v6 = vor.u32 %v427_v53, %v5027_v58  ;;  %v728_v13 = vld [vmem:[#allocation2 + $0x18] sm:$0xf]  ;;  %v296_v37 = vld [vmem:[#allocation2 + $0x50] sm:$0x1] }
  0x35   : > { %v1102_v3 = vrot.slane %v1101_v57, 4  ;;  %v955_v5 = vld [vmem:[#allocation2 + $0x48] sm:$0xf]  ;;  %v467_v8 = vshrl.u32 %v372_v60, 16  ;;  %v470_v15 = vshll.u32 %v372_v60, 16  ;;  %v475_v26 = vshrl.u32 %v373_v62, 16 }
  0x36   : > { %v1133_v10 = vshrl.u32 %v955_v5, 16  ;;  %v1136_v11 = vshll.u32 %v955_v5, 16  ;;  %1378 = vrot.lane.b32.xlu1 %v1035_v34, %s4821_s20  ;;  %v1082_v17 = vrot.slane %v1080_v4, 5  ;;  %v430_v18 = vsel %vm4931_vm10, %v422_v56, %v429_v6  ;;  %301 = vst [vmem:[#allocation2 + $0x5c] sm:$0x1] %v300_v63  ;;  %v348_v48 = vld [vmem:[%s4902_s19 + $0x80] sm:$0xff] }
  0x37   : > { %v1107_v16 = vsel %vm4959_vm11, %v1102_v3, %v1106_v44  ;;  %v729_v19 = vsel %vm4922_vm9, %v421_v42, %v728_v13  ;;  %v469_v25 = vrot.slane %v467_v8, 7  ;;  %v5045_v27 = vrot.slane %v475_v26, 7  ;;  %731 = vst.msk [vmem:[#allocation2 + $0x1c] sm:$0xf] %vm210_vm0, %v430_v18  ;;  %v249_v43 = vld [vmem:[#allocation2 + $0x6c] sm:$0x1] }
  0x38   : > { %v1135_v21 = vrot.slane %v1133_v10, 4  ;;  %v1138_v22 = vrot.slane %v1136_v11, 5  ;;  %730 = vst [vmem:[#allocation2 + $0x18] sm:$0xf] %v729_v19  ;;  %v1083_v28 = vsel %vm4959_vm11, %v5012_v38, %v1082_v17  ;;  %v478_v30 = vshll.u32 %v373_v62, 16  ;;  %v349_v54 = vld [vmem:[%s4902_s19 + $0x88] sm:$0xff] }
  0x39   : > { %v377_v29 = vpack.c.bf16 %v345_v9, %v345_v9  ;;  %v501_v31 = vshrl.u32 %v5034_v2, 16  ;;  %v956_v32 = vld [vmem:[#allocation2 + $0x4c] sm:$0xf]  ;;  %v472_v34 = vor.u32 %v470_v15, %v469_v25  ;;  %v473_v35 = vrot.slane %v469_v25, 4  ;;  %v346_v62 = vld [vmem:[%s4902_s19 + $0x70] sm:$0xff]  ;;  %v347_v13 = vld [vmem:[%s4902_s19 + $0x78] sm:$0xff] }
  0x3a   : > { %v1139_v33 = vor.u32 %v1138_v22, %v1135_v21  ;;  %v285_v36 = vsel %vm4892_vm5, 0, %v284_v20  ;;  %v1142_v40 = vshll.u32 %v956_v32, 16  ;;  %v1146_v41 = vshrl.u32 %v956_v32, 16  ;;  %v749_v46 = vld [vmem:[#allocation2 + $0x3c] sm:$0xf]  ;;  %v350_v21 = vld [vmem:[%s4902_s19 + $0x90] sm:$0xff] }
  0x3b   : > { %v480_v38 = vor.u32 %v478_v30, %v5045_v27  ;;  %v5055_v24 = vrot.slane %v501_v31, 7  ;;  %v750_v50 = vsel %vm4922_vm9, %v472_v34, %v749_v46  ;;  %v509_v52 = vshrl.u32 %v377_v29, 16  ;;  %286 = vst [vmem:[#allocation2 + $0x20] sm:$0x1] %v285_v36  ;;  %v234_v36 = vld [vmem:[#allocation2 + $0x30] sm:$0x1] }
  0x3c   : > { %1390 = vrot.lane.b32.xlu0 %v1107_v16, %s4821_s20  ;;  %v1140_v49 = vrot.slane %v1139_v33, 4  ;;  %v512_v53 = vshll.u32 %v377_v29, 16  ;;  %v1144_v55 = vrot.slane %v1142_v40, 5  ;;  %751 = vst [vmem:[#allocation2 + $0x3c] sm:$0xf] %v750_v50  ;;  %v431_v57 = vrot.slane %v5027_v58, 4 }
  0x3d   : > { %v481_v42 = vsel %vm4931_vm10, %v473_v35, %v480_v38  ;;  %v507_v56 = vrot.slane %v5055_v24, 4  ;;  %v511_v59 = vrot.slane %v509_v52, 7  ;;  %v767_v60 = vld [vmem:[#allocation2 + $0x5c] sm:$0x1]  ;;  %v297_v44 = vsel %vm4892_vm5, 0, %v296_v37 }
  0x3e   : > { %752 = vst.msk [vmem:[#allocation2 + $0x40] sm:$0xf] %vm210_vm0, %v481_v42  ;;  %v5069_v61 = vpack.c.bf16 %v348_v48, %v348_v48  ;;  %1386 = vrot.lane.b32.xlu1 %v1083_v28, %s4821_s20  ;;  %v1145_v63 = vsel %vm4959_vm11, %v1140_v49, %v1144_v55  ;;  %v499_v58 = vrot.slane %v5000_v23, 4  ;;  %v1148_v4 = vrot.slane %v1146_v41, 4  ;;  %v944_v6 = vld [vmem:[#allocation2 + $0x1c] sm:$0xf] }
  0x3f   : > { %v943_v3 = vld [vmem:[#allocation2 + $0x18] sm:$0xf]  ;;  %298 = vst [vmem:[#allocation2 + $0x50] sm:$0x1] %v297_v44  ;;  %v5076_v5 = vpack.c.bf16 %v349_v54, %v349_v54  ;;  %v514_v10 = vor.u32 %v512_v53, %v511_v59  ;;  %v516_v11 = vrot.slane %v511_v59, 4  ;;  %v1046_v15 = vshll.u32 %v944_v6, 16 }
  0x40   : > { %v1037_v8 = vshrl.u32 %v943_v3, 16  ;;  %v1040_v9 = vshll.u32 %v943_v3, 16  ;;  %v1050_v26 = vshrl.u32 %v944_v6, 16  ;;  %v1149_v16 = vor.u32 %v1148_v4, %v1144_v55 }
  0x41   : > { %v250_v17 = vsel %vm4872_vm3, 0, %v249_v43  ;;  %v515_v23 = vsel %vm4931_vm10, %v507_v56, %v514_v10  ;;  %v768_v20 = vsel %vm4872_vm3, %v516_v11, %v767_v60  ;;  %v1048_v22 = vrot.slane %v1046_v15, 5  ;;  %v246_v56 = vld [vmem:[#allocation2 + $0x60] sm:$0x1] }
  0x42   : > { %v1039_v18 = vrot.slane %v1037_v8, 4  ;;  %v1042_v19 = vrot.slane %v1040_v9, 5  ;;  %251 = vst [vmem:[#allocation2 + $0x6c] sm:$0x1] %v250_v17  ;;  %v1052_v25 = vrot.slane %v1050_v26, 4  ;;  %v5087_v30 = vpack.c.bf16 %v346_v62, %v346_v62 }
  0x43   : > { %766 = vst.msk [vmem:[#allocation2 + $0x58] sm:$0xf] %vm210_vm0, %v515_v23  ;;  %v732_v28 = vld [vmem:[#allocation2 + $0x20] sm:$0x1]  ;;  %v5089_v29 = vpack.c.bf16 %v347_v13, %v347_v13  ;;  %v952_v32 = vld [vmem:[#allocation2 + $0x3c] sm:$0xf]  ;;  %v5099_v46 = vpack.c.bf16 %v350_v21, %v350_v21 }
  0x44   : > { %1396 = vrot.lane.b32.xlu0 %v1145_v63, %s4821_s20  ;;  %v1043_v31 = vor.u32 %v1042_v19, %v1039_v18  ;;  %769 = vst [vmem:[#allocation2 + $0x5c] sm:$0x1] %v768_v20  ;;  %v733_v33 = vsel %vm4872_vm3, %v431_v57, %v732_v28  ;;  %v5094_v34 = vrot.slane %v1149_v16, 4  ;;  %v535_v35 = vshrl.u32 %v5069_v61, 16  ;;  %v351_v57 = vld [vmem:[%s4902_s19 + $0x98] sm:$0xff] }
  0x45   : > { %v5097_v37 = vld [vmem:[#allocation2 + $0x40] sm:$0xf]  ;;  %v1109_v40 = vshrl.u32 %v952_v32, 16  ;;  %v1112_v41 = vshll.u32 %v952_v32, 16  ;;  %734 = vst [vmem:[#allocation2 + $0x20] sm:$0x1] %v733_v33  ;;  %v1053_v38 = vor.u32 %v1052_v25, %v1048_v22  ;;  %v5119_v11 = vpack.c.bf16 %v351_v57, %v351_v57 }
  0x46   : > { %v1044_v48 = vrot.slane %v1043_v31, 4  ;;  %v1118_v49 = vshll.u32 %v5097_v37, 16  ;;  %v1122_v50 = vshrl.u32 %v5097_v37, 16  ;;  %v760_v52 = vld [vmem:[#allocation2 + $0x50] sm:$0x1]  ;;  %v537_v53 = vrot.slane %v535_v35, 7 }
  0x47   : > { %v1111_v43 = vrot.slane %v1109_v40, 4  ;;  %v1114_v54 = vrot.slane %v1112_v41, 5  ;;  %v1054_v55 = vrot.slane %v1053_v38, 4  ;;  %v761_v42 = vsel %vm4872_vm3, %v499_v58, %v760_v52  ;;  %v308_v33 = vld [vmem:[#allocation2 + $0x80] sm:$0x1]  ;;  %v354_v35 = vld [vmem:[%s4902_s19 + $0xb0] sm:$0xff] }
  0x48   : > { %v1049_v59 = vsel %vm4959_vm11, %v1044_v48, %v1048_v22  ;;  %v5108_v60 = vrot.slane %v1118_v49, 5  ;;  %762 = vst [vmem:[#allocation2 + $0x50] sm:$0x1] %v761_v42  ;;  %v538_v44 = vshll.u32 %v5069_v61, 16  ;;  %v541_v62 = vrot.slane %v537_v53, 4 }
  0x49   : > { %1380 = vrot.lane.b32.xlu2 %v1049_v59, %s4821_s20  ;;  %v1115_v63 = vor.u32 %v1114_v54, %v1111_v43  ;;  %v543_v3 = vshrl.u32 %v5076_v5, 16  ;;  %v546_v4 = vshll.u32 %v5076_v5, 16  ;;  %v777_v6 = vld [vmem:[#allocation2 + $0x6c] sm:$0xf]  ;;  %v235_v58 = vsel %vm4872_vm3, 0, %v234_v36 }
  0x4a   : > { %v959_v8 = vld [vmem:[#allocation2 + $0x58] sm:$0xf]  ;;  %v540_v9 = vor.u32 %v538_v44, %v537_v53  ;;  %236 = vst [vmem:[#allocation2 + $0x30] sm:$0x1] %v235_v58  ;;  %v453_v10 = vshll.u32 %v4927_v45, 16  ;;  %v247_v61 = vsel %vm4872_vm3, 0, %v246_v56  ;;  %v5146_v59 = vpack.c.bf16 %v354_v35, %v354_v35 }
  0x4b   : > { %v1116_v13 = vrot.slane %v1115_v63, 4  ;;  %v960_v15 = vld [vmem:[#allocation2 + $0x5c] sm:$0x1]  ;;  %v1166_v26 = vshll.u32 %v959_v8, 16  ;;  %v1170_v16 = vshrl.u32 %v959_v8, 16  ;;  %v5121_v17 = vrot.slane %v543_v3, 7 }
  0x4c   : > { %v1176_v5 = vshll.u32 %v960_v15, 16  ;;  %v945_v18 = vld [vmem:[#allocation2 + $0x20] sm:$0x1]  ;;  %v778_v19 = vsel %vm4922_vm9, %v540_v9, %v777_v6  ;;  %v455_v23 = vor.u32 %v453_v10, %v4955_v12  ;;  %248 = vst [vmem:[#allocation2 + $0x60] sm:$0x1] %v247_v61  ;;  %v518_v45 = vshrl.u32 %v5087_v30, 16 }
  0x4d   : > { %v1121_v20 = vsel %vm4959_vm11, %v1116_v13, %v5108_v60  ;;  %v5130_v21 = vrot.slane %v1166_v26, 5  ;;  %v1172_v22 = vrot.slane %v1170_v16, 4  ;;  %v1056_v25 = vshll.u32 %v945_v18, 16  ;;  %779 = vst [vmem:[#allocation2 + $0x6c] sm:$0xf] %v778_v19  ;;  %v355_v10 = vld [vmem:[%s4902_s19 + $0xb8] sm:$0xff] }
  0x4e   : > { %1392 = vrot.lane.b32.xlu1 %v1121_v20, %s4821_s20  ;;  %v1178_v28 = vrot.slane %v1176_v5, 5  ;;  %v548_v31 = vor.u32 %v546_v4, %v5121_v17  ;;  %v520_v32 = vrot.slane %v518_v45, 7  ;;  %v521_v12 = vshll.u32 %v5087_v30, 16  ;;  %v293_v54 = vld [vmem:[#allocation2 + $0x44] sm:$0x1] }
  0x4f   : > { %v1173_v36 = vor.u32 %v1172_v22, %v5130_v21  ;;  %v1058_v40 = vrot.slane %v1056_v25, 5  ;;  %v957_v41 = vld [vmem:[#allocation2 + $0x50] sm:$0x1]  ;;  %v526_v38 = vshrl.u32 %v5089_v29, 16  ;;  %v529_v48 = vshll.u32 %v5089_v29, 16 }
  0x50   : > { %v1152_v49 = vshll.u32 %v957_v41, 16  ;;  %v549_v52 = vsel %vm4931_vm10, %v541_v62, %v548_v31  ;;  %v523_v53 = vor.u32 %v521_v12, %v520_v32  ;;  %v524_v43 = vrot.slane %v520_v32, 4  ;;  %v258_v9 = vld [vmem:[#allocation2 + $0x90] sm:$0x1]  ;;  %v353_v12 = vld [vmem:[%s4902_s19 + $0xa8] sm:$0xff] }
  0x51   : > { %v1174_v42 = vrot.slane %v1173_v36, 4  ;;  %v1059_v30 = vsel %vm4959_vm11, %v1054_v55, %v1058_v40  ;;  %780 = vst.msk [vmem:[#allocation2 + $0x70] sm:$0xf] %vm210_vm0, %v549_v52  ;;  %v742_v56 = vld [vmem:[#allocation2 + $0x30] sm:$0xf]  ;;  %v5144_v57 = vrot.slane %v526_v38, 7  ;;  %v5186_v37 = vpack.c.bf16 %v355_v10, %v355_v10 }
  0x52   : > { %1382 = vrot.lane.b32.xlu2 %v1059_v30, %s4821_s20  ;;  %v1154_v29 = vrot.slane %v1152_v49, 5  ;;  %v743_v44 = vsel %vm4922_vm9, %v455_v23, %v742_v56  ;;  %v309_v62 = vsel %vm4892_vm5, 0, %v308_v33  ;;  %v552_v63 = vshrl.u32 %v5099_v46, 16  ;;  %v305_v55 = vld [vmem:[#allocation2 + $0x74] sm:$0x1]  ;;  %v352_v23 = vld [vmem:[%s4902_s19 + $0xa0] sm:$0xff] }
  0x53   : > { %v1179_v3 = vsel %vm4959_vm11, %v1174_v42, %v1178_v28  ;;  %744 = vst [vmem:[#allocation2 + $0x30] sm:$0xf] %v743_v44  ;;  %v531_v4 = vor.u32 %v529_v48, %v5144_v57  ;;  %v770_v6 = vld [vmem:[#allocation2 + $0x60] sm:$0xf]  ;;  %v560_v58 = vshrl.u32 %v5119_v11, 16  ;;  %v563_v8 = vshll.u32 %v5119_v11, 16 }
  0x54   : > { %1402 = vrot.lane.b32.xlu0 %v1179_v3, %s4821_s20  ;;  %v1155_v61 = vsel %vm4959_vm11, %v5094_v34, %v1154_v29  ;;  %v964_v13 = vld [vmem:[#allocation2 + $0x6c] sm:$0xf]  ;;  %v771_v15 = vsel %vm4922_vm9, %v523_v53, %v770_v6  ;;  %310 = vst [vmem:[#allocation2 + $0x80] sm:$0x1] %v309_v62  ;;  %v5166_v26 = vrot.slane %v552_v63, 7  ;;  %v294_v16 = vsel %vm4892_vm5, 0, %v293_v54 }
  0x55   : > { %v1205_v5 = vshrl.u32 %v964_v13, 16  ;;  %v1208_v11 = vshll.u32 %v964_v13, 16  ;;  %v532_v18 = vsel %vm4931_vm10, %v524_v43, %v531_v4  ;;  %772 = vst [vmem:[#allocation2 + $0x60] sm:$0xf] %v771_v15  ;;  %v562_v19 = vrot.slane %v560_v58, 7  ;;  %v356_v15 = vld [vmem:[%s4902_s19 + $0xc0] sm:$0xff] }
  0x56   : > { %1398 = vrot.lane.b32.xlu1 %v1155_v61, %s4821_s20  ;;  %773 = vst.msk [vmem:[#allocation2 + $0x64] sm:$0xf] %vm210_vm0, %v532_v18  ;;  %v558_v34 = vrot.slane %v5166_v26, 4  ;;  %v482_v45 = vrot.slane %v5045_v27, 4  ;;  %v1124_v20 = vrot.slane %v1122_v50, 4  ;;  %v306_v22 = vsel %vm4892_vm5, 0, %v305_v55 }
  0x57   : > { %v1207_v25 = vrot.slane %v1205_v5, 4  ;;  %v1210_v28 = vrot.slane %v1208_v11, 5  ;;  %v565_v31 = vor.u32 %v563_v8, %v562_v19  ;;  %v567_v32 = vrot.slane %v562_v19, 4  ;;  %295 = vst [vmem:[#allocation2 + $0x44] sm:$0x1] %v294_v16 }
  0x58   : > { %v965_v33 = vld [vmem:[#allocation2 + $0x70] sm:$0xf]  ;;  %v1125_v35 = vor.u32 %v1124_v20, %v5108_v60  ;;  %307 = vst [vmem:[#allocation2 + $0x74] sm:$0x1] %v306_v22  ;;  %v550_v36 = vrot.slane %v5121_v17, 4  ;;  %v259_v27 = vsel %vm4872_vm3, 0, %v258_v9  ;;  %v5194_v17 = vpack.c.bf16 %v352_v23, %v352_v23 }
  0x59   : > { %v1211_v50 = vor.u32 %v1210_v28, %v1207_v25  ;;  %v1214_v40 = vshll.u32 %v965_v33, 16  ;;  %v1218_v41 = vshrl.u32 %v965_v33, 16  ;;  %v566_v38 = vsel %vm4931_vm10, %v558_v34, %v565_v31  ;;  %260 = vst [vmem:[#allocation2 + $0x90] sm:$0x1] %v259_v27  ;;  %v243_v13 = vld [vmem:[#allocation2 + $0x54] sm:$0x1] }
  0x5a   : > { %v949_v48 = vld [vmem:[#allocation2 + $0x30] sm:$0xf]  ;;  %787 = vst.msk [vmem:[#allocation2 + $0x7c] sm:$0xf] %vm210_vm0, %v566_v38  ;;  %v5191_v49 = vrot.slane %v1125_v35, 4  ;;  %v586_v60 = vshrl.u32 %v5146_v59, 16  ;;  %v5196_v52 = vpack.c.bf16 %v353_v12, %v353_v12  ;;  %v5223_v35 = vpack.c.bf16 %v356_v15, %v356_v15 }
  0x5b   : > { %v1212_v53 = vrot.slane %v1211_v50, 4  ;;  %v1216_v43 = vrot.slane %v1214_v40, 5  ;;  %v1085_v54 = vshrl.u32 %v949_v48, 16  ;;  %v1088_v42 = vshll.u32 %v949_v48, 16  ;;  %v788_v30 = vld [vmem:[#allocation2 + $0x80] sm:$0x1] }
  0x5c   : > { %v961_v56 = vld [vmem:[#allocation2 + $0x60] sm:$0xf]  ;;  %v789_v29 = vsel %vm4872_vm3, %v567_v32, %v788_v30  ;;  %v1220_v44 = vrot.slane %v1218_v41, 4  ;;  %v5200_v62 = vrot.slane %v586_v60, 7  ;;  %v589_v63 = vshll.u32 %v5146_v59, 16 }
  0x5d   : > { %v1217_v55 = vsel %vm4959_vm11, %v1212_v53, %v1216_v43  ;;  %v1087_v3 = vrot.slane %v1085_v54, 4  ;;  %v1090_v4 = vrot.slane %v1088_v42, 5  ;;  %v5205_v6 = vld [vmem:[#allocation2 + $0x64] sm:$0xf]  ;;  %v1181_v58 = vshrl.u32 %v961_v56, 16 }
  0x5e   : > { %1408 = vrot.lane.b32.xlu0 %v1217_v55, %s4821_s20  ;;  %v1184_v8 = vshll.u32 %v961_v56, 16  ;;  %v1190_v9 = vshll.u32 %v5205_v6, 16  ;;  %v1194_v10 = vshrl.u32 %v5205_v6, 16  ;;  %790 = vst [vmem:[#allocation2 + $0x80] sm:$0x1] %v789_v29  ;;  %v1221_v61 = vor.u32 %v1220_v44, %v1216_v43 }
  0x5f   : > { %v1091_v59 = vor.u32 %v1090_v4, %v1087_v3  ;;  %v1183_v16 = vrot.slane %v1181_v58, 4  ;;  %v753_v5 = vld [vmem:[#allocation2 + $0x44] sm:$0x1]  ;;  %v781_v11 = vld [vmem:[#allocation2 + $0x74] sm:$0x1]  ;;  %v591_v18 = vor.u32 %v589_v63, %v5200_v62  ;;  %v592_v19 = vrot.slane %v5200_v62, 4 }
  0x60   : > { %v1186_v23 = vrot.slane %v1184_v8, 5  ;;  %v5213_v34 = vrot.slane %v1190_v9, 5  ;;  %v754_v20 = vsel %vm4872_vm3, %v482_v45, %v753_v5  ;;  %v782_v22 = vsel %vm4872_vm3, %v550_v36, %v781_v11  ;;  %v798_v25 = vld [vmem:[#allocation2 + $0x90] sm:$0xf]  ;;  %v255_v28 = vld [vmem:[#allocation2 + $0x84] sm:$0x1] }
  0x61   : > { %v1092_v31 = vrot.slane %v1091_v59, 4  ;;  %v968_v32 = vld [vmem:[#allocation2 + $0x7c] sm:$0xf]  ;;  %755 = vst [vmem:[#allocation2 + $0x44] sm:$0x1] %v754_v20  ;;  %v5219_v12 = vrot.slane %v1221_v61, 4  ;;  %v799_v33 = vsel %vm4922_vm9, %v591_v18, %v798_v25 }
  0x62   : > { %v1187_v27 = vor.u32 %v1186_v23, %v1183_v16  ;;  %v1238_v50 = vshll.u32 %v968_v32, 16  ;;  %v1242_v40 = vshrl.u32 %v968_v32, 16  ;;  %783 = vst [vmem:[#allocation2 + $0x74] sm:$0x1] %v782_v22  ;;  %v594_v45 = vshrl.u32 %v5186_v37, 16  ;;  %v357_v36 = vld [vmem:[%s4902_s19 + $0xc8] sm:$0xff] }
  0x63   : > { %v317_v41 = vld [vmem:[#allocation2 + $0xa4] sm:$0x1]  ;;  %v1097_v38 = vsel %vm4959_vm11, %v1092_v31, %v5019_v51  ;;  %v597_v48 = vshll.u32 %v5186_v37, 16  ;;  %800 = vst [vmem:[#allocation2 + $0x90] sm:$0xf] %v799_v33  ;;  %v244_v60 = vsel %vm4872_vm3, 0, %v243_v13  ;;  %v5243_v44 = vpack.c.bf16 %v357_v36, %v357_v36 }
  0x64   : > { %v504_v53 = vshll.u32 %v5034_v2, 16  ;;  %1388 = vrot.lane.b32.xlu2 %v1097_v38, %s4821_s20  ;;  %v1188_v43 = vrot.slane %v1187_v27, 4  ;;  %v5235_v54 = vrot.slane %v1238_v50, 5  ;;  %v1244_v42 = vrot.slane %v1242_v40, 4  ;;  %245 = vst [vmem:[#allocation2 + $0x54] sm:$0x1] %v244_v60 }
  0x65   : > { %v5237_v30 = vrot.slane %v594_v45, 7  ;;  %v969_v56 = vld [vmem:[#allocation2 + $0x80] sm:$0x1]  ;;  %v256_v51 = vsel %vm4872_vm3, 0, %v255_v28  ;;  %v569_v37 = vshrl.u32 %v5194_v17, 16  ;;  %v572_v29 = vshll.u32 %v5194_v17, 16 }
  0x66   : > { %v1193_v2 = vsel %vm4959_vm11, %v1188_v43, %v5213_v34  ;;  %v1245_v62 = vor.u32 %v1244_v42, %v5235_v54  ;;  %v1248_v63 = vshll.u32 %v969_v56, 16  ;;  %257 = vst [vmem:[#allocation2 + $0x84] sm:$0x1] %v256_v51  ;;  %v577_v4 = vshrl.u32 %v5196_v52, 16  ;;  %v302_v40 = vld [vmem:[#allocation2 + $0x68] sm:$0x1] }
  0x67   : > { %v599_v55 = vor.u32 %v597_v48, %v5237_v30  ;;  %1404 = vrot.lane.b32.xlu1 %v1193_v2, %s4821_s20  ;;  %v571_v3 = vrot.slane %v569_v37, 7  ;;  %v580_v58 = vshll.u32 %v5196_v52, 16  ;;  %v318_v17 = vsel %vm4892_vm5, 0, %v317_v41  ;;  %v360_v45 = vld [vmem:[%s4902_s19 + $0xe0] sm:$0xff]  ;;  %v314_v56 = vld [vmem:[#allocation2 + $0x98] sm:$0x1] }
  0x68   : > { %v1246_v8 = vrot.slane %v1245_v62, 4  ;;  %v1250_v9 = vrot.slane %v1248_v63, 5  ;;  %v954_v61 = vld [vmem:[#allocation2 + $0x44] sm:$0x1]  ;;  %v506_v15 = vor.u32 %v504_v53, %v5055_v24  ;;  %319 = vst [vmem:[#allocation2 + $0xa4] sm:$0x1] %v318_v17  ;;  %v392_v63 = vpack.c.bf16 %v360_v45, %v360_v45 }
  0x69   : > { %v600_v13 = vsel %vm4931_vm10, %v592_v19, %v599_v55  ;;  %v1128_v59 = vshll.u32 %v954_v61, 16  ;;  %v966_v16 = vld [vmem:[#allocation2 + $0x74] sm:$0x1]  ;;  %v574_v5 = vor.u32 %v572_v29, %v571_v3  ;;  %v575_v11 = vrot.slane %v571_v3, 4 }
  0x6a   : > { %801 = vst.msk [vmem:[#allocation2 + $0x94] sm:$0xf] %vm210_vm0, %v600_v13  ;;  %v1251_v52 = vsel %vm4959_vm11, %v1246_v8, %v1250_v9  ;;  %v1224_v18 = vshll.u32 %v966_v16, 16  ;;  %v973_v23 = vld [vmem:[#allocation2 + $0x90] sm:$0xf]  ;;  %v5261_v20 = vrot.slane %v577_v4, 7 }
  0x6b   : > { %v603_v22 = vshrl.u32 %v5223_v35, 16  ;;  %1414 = vrot.lane.b32.xlu0 %v1251_v52, %s4821_s20  ;;  %v1130_v24 = vrot.slane %v1128_v59, 5  ;;  %v1277_v19 = vshrl.u32 %v973_v23, 16  ;;  %v1280_v25 = vshll.u32 %v973_v23, 16  ;;  %v763_v28 = vld [vmem:[#allocation2 + $0x54] sm:$0xf] }
  0x6c   : > { %v611_v31 = vshrl.u32 %v5243_v44, 16  ;;  %v1226_v32 = vrot.slane %v1224_v18, 5  ;;  %v764_v33 = vsel %vm4922_vm9, %v506_v15, %v763_v28  ;;  %v582_v27 = vor.u32 %v580_v58, %v5261_v20  ;;  %v361_v16 = vld [vmem:[%s4902_s19 + $0xe8] sm:$0xff] }
  0x6d   : > { %v5269_v50 = vrot.slane %v603_v22, 7  ;;  %v1131_v41 = vsel %vm4959_vm11, %v5191_v49, %v1130_v24  ;;  %v1279_v36 = vrot.slane %v1277_v19, 4  ;;  %v1282_v38 = vrot.slane %v1280_v25, 5  ;;  %765 = vst [vmem:[#allocation2 + $0x54] sm:$0xf] %v764_v33 }
  0x6e   : > { %v791_v48 = vld [vmem:[#allocation2 + $0x84] sm:$0xf]  ;;  %1394 = vrot.lane.b32.xlu2 %v1131_v41, %s4821_s20  ;;  %v1227_v60 = vsel %vm4959_vm11, %v5219_v12, %v1226_v32  ;;  %v583_v53 = vsel %vm4931_vm10, %v575_v11, %v582_v27  ;;  %v267_v49 = vld [vmem:[#allocation2 + $0xb4] sm:$0x1]  ;;  %v613_v37 = vrot.slane %v611_v31, 7  ;;  %v614_v29 = vshll.u32 %v5243_v44, 16 }
  0x6f   : > { %v792_v43 = vsel %vm4922_vm9, %v574_v5, %v791_v48  ;;  %v609_v42 = vrot.slane %v5269_v50, 4  ;;  %1410 = vrot.lane.b32.xlu1 %v1227_v60, %s4821_s20  ;;  %v1283_v51 = vor.u32 %v1282_v38, %v1279_v36  ;;  %v809_v2 = vld [vmem:[#allocation2 + $0xa4] sm:$0x1]  ;;  %794 = vst.msk [vmem:[#allocation2 + $0x88] sm:$0xf] %vm210_vm0, %v583_v53  ;;  %v303_v12 = vsel %vm4892_vm5, 0, %v302_v40 }
  0x70   : > { %793 = vst [vmem:[#allocation2 + $0x84] sm:$0xf] %v792_v43  ;;  %v616_v58 = vor.u32 %v614_v29, %v613_v37  ;;  %v618_v17 = vrot.slane %v613_v37, 4  ;;  %v533_v8 = vrot.slane %v5144_v57, 4  ;;  %v1196_v44 = vrot.slane %v1194_v10, 4  ;;  %v358_v53 = vld [vmem:[%s4902_s19 + $0xd0] sm:$0xff] }
  0x71   : > { %v974_v62 = vld [vmem:[#allocation2 + $0x94] sm:$0xf]  ;;  %v1284_v55 = vrot.slane %v1283_v51, 4  ;;  %304 = vst [vmem:[#allocation2 + $0x68] sm:$0x1] %v303_v12  ;;  %v315_v9 = vsel %vm4892_vm5, 0, %v314_v56  ;;  %v393_v19 = vpack.c.bf16 %v361_v16, %v361_v16 }
  0x72   : > { %v1286_v3 = vshll.u32 %v974_v62, 16  ;;  %v1290_v4 = vshrl.u32 %v974_v62, 16  ;;  %v617_v13 = vsel %vm4931_vm10, %v609_v42, %v616_v58  ;;  %316 = vst [vmem:[#allocation2 + $0x98] sm:$0x1] %v315_v9  ;;  %v268_v59 = vsel %vm4872_vm3, 0, %v267_v49  ;;  %v359_v43 = vld [vmem:[%s4902_s19 + $0xd8] sm:$0xff] }
  0x73   : > { %808 = vst.msk [vmem:[#allocation2 + $0xa0] sm:$0xf] %vm210_vm0, %v617_v13  ;;  %v810_v57 = vsel %vm4872_vm3, %v618_v17, %v809_v2  ;;  %v1197_v6 = vor.u32 %v1196_v44, %v5213_v34  ;;  %v601_v10 = vrot.slane %v5237_v30, 4  ;;  %v637_v11 = vshrl.u32 %v392_v63, 16  ;;  %v252_v37 = vld [vmem:[#allocation2 + $0x78] sm:$0x1] }
  0x74   : > { %v1288_v61 = vrot.slane %v1286_v3, 5  ;;  %v1292_v15 = vrot.slane %v1290_v4, 4  ;;  %v958_v5 = vld [vmem:[#allocation2 + $0x54] sm:$0xf]  ;;  %811 = vst [vmem:[#allocation2 + $0xa4] sm:$0x1] %v810_v57  ;;  %v390_v17 = vpack.c.bf16 %v358_v53, %v358_v53 }
  0x75   : > { %v1157_v18 = vshrl.u32 %v958_v5, 16  ;;  %v1160_v23 = vshll.u32 %v958_v5, 16  ;;  %269 = vst [vmem:[#allocation2 + $0xb4] sm:$0x1] %v268_v59  ;;  %v5307_v25 = vrot.slane %v637_v11, 7  ;;  %v640_v34 = vshll.u32 %v392_v63, 16 }
  0x76   : > { %v1289_v52 = vsel %vm4959_vm11, %v1284_v55, %v1288_v61  ;;  %v1293_v22 = vor.u32 %v1292_v15, %v1288_v61  ;;  %v5309_v31 = vld [vmem:[#allocation2 + $0x88] sm:$0xf]  ;;  %v5312_v45 = vrot.slane %v1197_v6, 4  ;;  %v645_v63 = vshrl.u32 %v393_v19, 16 }
  0x77   : > { %1420 = vrot.lane.b32.xlu0 %v1289_v52, %s4821_s20  ;;  %v970_v24 = vld [vmem:[#allocation2 + $0x84] sm:$0xf]  ;;  %v1159_v28 = vrot.slane %v1157_v18, 4  ;;  %v1162_v30 = vrot.slane %v1160_v23, 5  ;;  %v1262_v27 = vshll.u32 %v5309_v31, 16  ;;  %v642_v49 = vor.u32 %v640_v34, %v5307_v25 }
  0x78   : > { %v1253_v32 = vshrl.u32 %v970_v24, 16  ;;  %v1256_v33 = vshll.u32 %v970_v24, 16  ;;  %v774_v40 = vld [vmem:[#allocation2 + $0x68] sm:$0x1]  ;;  %v5314_v41 = vrot.slane %v1293_v22, 4  ;;  %v643_v51 = vrot.slane %v5307_v25, 4 }
  0x79   : > { %v1163_v36 = vor.u32 %v1162_v30, %v1159_v28  ;;  %v775_v60 = vsel %vm4872_vm3, %v533_v8, %v774_v40  ;;  %v5320_v42 = vrot.slane %v1262_v27, 5  ;;  %v802_v56 = vld [vmem:[#allocation2 + $0x98] sm:$0x1]  ;;  %v264_v55 = vld [vmem:[#allocation2 + $0xa8] sm:$0x1]  ;;  %v391_v8 = vpack.c.bf16 %v359_v43, %v359_v43 }
  0x7a   : > { %v1255_v38 = vrot.slane %v1253_v32, 4  ;;  %v1258_v48 = vrot.slane %v1256_v33, 5  ;;  %776 = vst [vmem:[#allocation2 + $0x68] sm:$0x1] %v775_v60  ;;  %v977_v62 = vld [vmem:[#allocation2 + $0xa0] sm:$0xf]  ;;  %v803_v12 = vsel %vm4872_vm3, %v601_v10, %v802_v56 }
  0x7b   : > { %v1164_v29 = vrot.slane %v1163_v36, 4  ;;  %v978_v3 = vld [vmem:[#allocation2 + $0xa4] sm:$0x1]  ;;  %v1310_v4 = vshll.u32 %v977_v62, 16  ;;  %v1314_v58 = vshrl.u32 %v977_v62, 16  ;;  %v5329_v13 = vrot.slane %v645_v63, 7 }
  0x7c   : > { %v1259_v2 = vor.u32 %v1258_v48, %v1255_v38  ;;  %804 = vst [vmem:[#allocation2 + $0x98] sm:$0x1] %v803_v12  ;;  %v1320_v61 = vshll.u32 %v978_v3, 16  ;;  %v819_v15 = vld [vmem:[#allocation2 + $0xb4] sm:$0xf]  ;;  %v648_v5 = vshll.u32 %v393_v19, 16 }
  0x7d   : > { %v1169_v44 = vsel %vm4959_vm11, %v1164_v29, %v5130_v21  ;;  %v5332_v59 = vrot.slane %v1310_v4, 5  ;;  %v1316_v16 = vrot.slane %v1314_v58, 4  ;;  %v820_v57 = vsel %vm4922_vm9, %v642_v49, %v819_v15  ;;  %v311_v56 = vld [vmem:[#allocation2 + $0x8c] sm:$0x1]  ;;  %v323_v29 = vld [vmem:[#allocation2 + $0xbc] sm:$0x1] }
  0x7e   : > { %v1260_v9 = vrot.slane %v1259_v2, 4  ;;  %1400 = vrot.lane.b32.xlu2 %v1169_v44, %s4821_s20  ;;  %v1322_v10 = vrot.slane %v1320_v61, 5  ;;  %821 = vst [vmem:[#allocation2 + $0xb4] sm:$0xf] %v820_v57  ;;  %v253_v21 = vsel %vm4872_vm3, 0, %v252_v37  ;;  %v555_v11 = vshll.u32 %v5099_v46, 16 }
  0x7f   : > { %v1317_v52 = vor.u32 %v1316_v16, %v5332_v59  ;;  %v650_v18 = vor.u32 %v648_v5, %v5329_v13  ;;  %254 = vst [vmem:[#allocation2 + $0x78] sm:$0x1] %v253_v21  ;;  %v265_v23 = vsel %vm4872_vm3, 0, %v264_v55  ;;  %v620_v22 = vshrl.u32 %v390_v17, 16  ;;  %v261_v63 = vld [vmem:[#allocation2 + $0x9c] sm:$0x1] }
  0x80   : > { %v1265_v6 = vsel %vm4959_vm11, %v1260_v9, %v5320_v42  ;;  %266 = vst [vmem:[#allocation2 + $0xa8] sm:$0x1] %v265_v23  ;;  %v623_v19 = vshll.u32 %v390_v17, 16  ;;  %v628_v25 = vshrl.u32 %v391_v8, 16  ;;  %v631_v27 = vshll.u32 %v391_v8, 16 }
  0x81   : > { %1416 = vrot.lane.b32.xlu1 %v1265_v6, %s4821_s20  ;;  %v963_v24 = vld [vmem:[#allocation2 + $0x68] sm:$0x1]  ;;  %v1318_v34 = vrot.slane %v1317_v52, 4  ;;  %v651_v46 = vsel %vm4931_vm10, %v643_v51, %v650_v18  ;;  %v622_v30 = vrot.slane %v620_v22, 7  ;;  %v557_v48 = vor.u32 %v555_v11, %v5166_v26  ;;  %v5374_v44 = vld [vmem:[#allocation2 + $0x4] sm:$0xf] }
  0x82   : > { %v1200_v28 = vshll.u32 %v963_v24, 16  ;;  %822 = vst.msk [vmem:[#allocation2 + $0xb8] sm:$0xf] %vm210_vm0, %v651_v46  ;;  %v5350_v33 = vrot.slane %v628_v25, 7  ;;  %v312_v4 = vsel %vm4892_vm5, 0, %v311_v56  ;;  %v324_v9 = vsel %vm4892_vm5, 0, %v323_v29 }
  0x83   : > { %v975_v32 = vld [vmem:[#allocation2 + $0x98] sm:$0x1]  ;;  %v1323_v40 = vsel %vm4959_vm11, %v1318_v34, %v1322_v10  ;;  %v625_v60 = vor.u32 %v623_v19, %v622_v30  ;;  %v626_v53 = vrot.slane %v622_v30, 4  ;;  %v1503_v16 = vld [vmem:[#allocation2 + $0x8] sm:$0x1]  ;;  %v1602_v5 = vrot.slane %v5374_v44, 5 }
  0x84   : > { %v1202_v36 = vrot.slane %v1200_v28, 5  ;;  %v1296_v38 = vshll.u32 %v975_v32, 16  ;;  %1426 = vrot.lane.b32.xlu0 %v1323_v40, %s4821_s20  ;;  %v633_v43 = vor.u32 %v631_v27, %v5350_v33  ;;  %313 = vst [vmem:[#allocation2 + $0x8c] sm:$0x1] %v312_v4  ;;  %v262_v57 = vsel %vm4872_vm3, 0, %v261_v63 }
  0x85   : > { %v982_v37 = vld [vmem:[#allocation2 + $0xb4] sm:$0xf]  ;;  %325 = vst [vmem:[#allocation2 + $0xbc] sm:$0x1] %v324_v9  ;;  %v320_v6 = vld [vmem:[#allocation2 + $0xb0] sm:$0x1] }
  0x86   : > { %v1203_v49 = vsel %vm4959_vm11, %v5312_v45, %v1202_v36  ;;  %v1298_v51 = vrot.slane %v1296_v38, 5  ;;  %v1349_v2 = vshrl.u32 %v982_v37, 16  ;;  %v1352_v62 = vshll.u32 %v982_v37, 16  ;;  %v784_v12 = vld [vmem:[#allocation2 + $0x78] sm:$0xf] }
  0x87   : > { %1406 = vrot.lane.b32.xlu2 %v1203_v49, %s4821_s20  ;;  %v634_v26 = vsel %vm4931_vm10, %v626_v53, %v633_v43  ;;  %v785_v3 = vsel %vm4922_vm9, %v557_v48, %v784_v12  ;;  %v812_v45 = vld [vmem:[#allocation2 + $0xa8] sm:$0xf]  ;;  %263 = vst [vmem:[#allocation2 + $0x9c] sm:$0x1] %v262_v57  ;;  %v606_v11 = vshll.u32 %v5223_v35, 16  ;;  %v1266_v52 = vshrl.u32 %v5309_v31, 16 }
  0x88   : > { %v1299_v55 = vsel %vm4959_vm11, %v5314_v41, %v1298_v51  ;;  %815 = vst.msk [vmem:[#allocation2 + $0xac] sm:$0xf] %vm210_vm0, %v634_v26  ;;  %v1351_v58 = vrot.slane %v1349_v2, 4  ;;  %v1354_v17 = vrot.slane %v1352_v62, 5  ;;  %v813_v8 = vsel %vm4922_vm9, %v625_v60, %v812_v45  ;;  %v1507_v62 = vld [vmem:[#allocation2 + $0x18] sm:$0xe] }
  0x89   : > { %1422 = vrot.lane.b32.xlu1 %v1299_v55, %s4821_s20  ;;  %786 = vst [vmem:[#allocation2 + $0x78] sm:$0xf] %v785_v3  ;;  %v983_v41 = vld [vmem:[#allocation2 + $0xb8] sm:$0xf]  ;;  %v584_v22 = vrot.slane %v5261_v20, 4  ;;  %v1604_v19 = vrot.slane %v1602_v5, 4  ;;  %v608_v32 = vor.u32 %v606_v11, %v5269_v50 }
  0x8a   : > { %814 = vst [vmem:[#allocation2 + $0xa8] sm:$0xf] %v813_v8  ;;  %v1355_v61 = vor.u32 %v1354_v17, %v1351_v58  ;;  %v1358_v15 = vshll.u32 %v983_v41, 16  ;;  %v1605_v25 = vrot.slane %v1503_v16, 5  ;;  %v652_v35 = vrot.slane %v5329_v13, 4 }
  0x8b   : > { %v321_v31 = vsel %vm4892_vm5, 0, %v320_v6  ;;  %v1362_v34 = vshrl.u32 %v983_v41, 16  ;;  %v795_v13 = vld [vmem:[#allocation2 + $0x8c] sm:$0x1]  ;;  %v1268_v38 = vrot.slane %v1266_v52, 4  ;;  %v635_v4 = vrot.slane %v5350_v33, 4 }
  0x8c   : > { %v1356_v10 = vrot.slane %v1355_v61, 4  ;;  %v5381_v21 = vrot.slane %v1358_v15, 5  ;;  %v796_v53 = vsel %vm4872_vm3, %v584_v22, %v795_v13  ;;  %v823_v43 = vld [vmem:[#allocation2 + $0xbc] sm:$0x1]  ;;  %322 = vst [vmem:[#allocation2 + $0xb0] sm:$0x1] %v321_v31  ;;  %v1606_v29 = vsel %vm5401_vm14, %v1604_v19, %v1605_v25 }
  0x8d   : > { %797 = vst [vmem:[#allocation2 + $0x8c] sm:$0x1] %v796_v53  ;;  %v824_v49 = vsel %vm4872_vm3, %v652_v35, %v823_v43  ;;  %v1364_v2 = vrot.slane %v1362_v34, 4  ;;  %v5415_v55 = vld [vmem:[#allocation2 + $0x1c] sm:$0xf]  ;;  %v1269_v45 = vor.u32 %v1268_v38, %v5320_v42  ;;  %v4374_v41 = vrot.slane %v1507_v62, 9 }
  0x8e   : > { %v1361_v18 = vsel %vm4959_vm11, %v1356_v10, %v5381_v21  ;;  %v805_v51 = vld [vmem:[#allocation2 + $0x9c] sm:$0xf]  ;;  %825 = vst [vmem:[#allocation2 + $0xbc] sm:$0x1] %v824_v49  ;;  %v1616_v9 = vrot.slane %v5415_v55, 5  ;;  %vm833_vm15 = vcmask 322848  }
  0x8f   : > { %v5388_v23 = vld [vmem:[#allocation2 + $0xac] sm:$0xf]  ;;  %1432 = vrot.lane.b32.xlu0 %v1361_v18, %s4821_s20  ;;  %v806_v12 = vsel %vm4922_vm9, %v608_v32, %v805_v51  ;;  %v1365_v8 = vor.u32 %v1364_v2, %v5381_v21  ;;  %v5425_v61 = vld [vmem:[#allocation2 + $0x28] sm:$0xf]  ;;  %v873_v16 = vld [vmem:[#allocation2 + $0x4] sm:$0xf] }
  0x90   : > { %v967_v24 = vld [vmem:[#allocation2 + $0x78] sm:$0xf]  ;;  %v1334_v40 = vshll.u32 %v5388_v23, 16  ;;  %807 = vst [vmem:[#allocation2 + $0x9c] sm:$0xf] %v806_v12  ;;  %v1270_v57 = vrot.slane %v1269_v45, 4 }
  0x91   : > { %v1229_v28 = vshrl.u32 %v967_v24, 16  ;;  %v1232_v46 = vshll.u32 %v967_v24, 16  ;;  %v979_v30 = vld [vmem:[#allocation2 + $0xa8] sm:$0xf]  ;;  %835 = vst.msk [vmem:[#allocation3 + $0x4] sm:$0xf] %vm833_vm15, %v4820_v0  ;;  %v1617_v24 = vsel %vm5401_vm14, %v4374_v41, %v1616_v9 }
  0x92   : > { %v1325_v27 = vshrl.u32 %v979_v30, 16  ;;  %v1328_v20 = vshll.u32 %v979_v30, 16  ;;  %v5413_v63 = vrot.slane %v1334_v40, 5  ;;  %vm1468_vm1 = vcmask 60448   ;;  %v1512_v11 = vld [vmem:[#allocation2 + $0x2c] sm:$0x1] }
  0x93   : > { %v1231_v48 = vrot.slane %v1229_v28, 4  ;;  %v1234_v60 = vrot.slane %v1232_v46, 5  ;;  %v816_v33 = vld [vmem:[#allocation2 + $0xb0] sm:$0x1]  ;;  %v1623_v52 = vrot.slane %v5425_v61, 5  ;;  %v1366_v18 = vrot.slane %v1365_v8, 4 }
  0x94   : > { %v1327_v50 = vrot.slane %v1325_v27, 4  ;;  %v1330_v56 = vrot.slane %v1328_v20, 5  ;;  %v817_v6 = vsel %vm4872_vm3, %v635_v4, %v816_v33  ;;  %906 = vst.msk [vmem:[#allocation3 + $0x4] sm:$0xf] %vm210_vm0, %v873_v16  ;;  %v1338_v34 = vshrl.u32 %v5388_v23, 16 }
  0x95   : > { %v1235_v37 = vor.u32 %v1234_v60, %v1231_v48  ;;  %v984_v21 = vld [vmem:[#allocation2 + $0xbc] sm:$0x1]  ;;  %818 = vst [vmem:[#allocation2 + $0xb0] sm:$0x1] %v817_v6  ;;  %v1504_v27 = vld [vmem:[#allocation2 + $0xc] sm:$0xe] }
  0x96   : > { %v1331_v26 = vor.u32 %v1330_v56, %v1327_v50  ;;  %v1375_v15 = vpop.permute.xlu0 %1374  ;;  %v1368_v22 = vshll.u32 %v984_v21, 16  ;;  %834 = vst.msk [vmem:[#allocation3] sm:$0xf] %vm833_vm15, %v4820_v0  ;;  %v5453_v40 = vld [vmem:[#allocation2 + $0x10] sm:$0xf]  ;;  %v1625_v23 = vrot.slane %v1623_v52, 4 }
  0x97   : > { %v1236_v3 = vrot.slane %v1235_v37, 4  ;;  %1714 = vrot.lane.b32.xlu0 %v1606_v29, %s4822_s21  ;;  %v976_v19 = vld [vmem:[#allocation2 + $0x9c] sm:$0xf]  ;;  %1470 = vst.msk [vmem:[#allocation3 + $0x4] sm:$0xf] %vm1468_vm1, %v1375_v15  ;;  %v1626_v13 = vrot.slane %v1512_v11, 5 }
  0x98   : > { %v1332_v58 = vrot.slane %v1331_v26, 4  ;;  %v1301_v35 = vshrl.u32 %v976_v19, 16  ;;  %v1304_v31 = vshll.u32 %v976_v19, 16  ;;  %v1370_v28 = vrot.slane %v1368_v22, 5  ;;  %836 = vst.msk [vmem:[#allocation3 + $0x8] sm:$0xf] %vm833_vm15, %v4820_v0 }
  0x99   : > { %v1241_v17 = vsel %vm4959_vm11, %v1236_v3, %v5235_v54  ;;  %v972_v54 = vld [vmem:[#allocation2 + $0x8c] sm:$0x1]  ;;  %837 = vst.msk [vmem:[#allocation3 + $0xc] sm:$0xf] %vm833_vm15, %v4820_v0  ;;  %v4373_v60 = vrot.slane %v1504_v27, 9  ;;  %v1340_v53 = vrot.slane %v1338_v34, 4  ;;  %v1627_v49 = vsel %vm5401_vm14, %v1625_v23, %v1626_v13 }
  0x9a   : > { %1412 = vrot.lane.b32.xlu2 %v1241_v17, %s4821_s20  ;;  %v1337_v42 = vsel %vm4959_vm11, %v1332_v58, %v5413_v63  ;;  %v1272_v10 = vshll.u32 %v972_v54, 16  ;;  %v1303_v30 = vrot.slane %v1301_v35, 4  ;;  %v1306_v32 = vrot.slane %v1304_v31, 5  ;;  %838 = vst.msk [vmem:[#allocation3 + $0x10] sm:$0xf] %vm833_vm15, %v4820_v0 }
  0x9b   : > { %1428 = vrot.lane.b32.xlu1 %v1337_v42, %s4821_s20  ;;  %v1371_v20 = vsel %vm4959_vm11, %v1366_v18, %v1370_v28  ;;  %839 = vst.msk [vmem:[#allocation3 + $0x14] sm:$0xf] %vm833_vm15, %v4820_v0  ;;  %v1609_v50 = vrot.slane %v5453_v40, 5  ;;  %v1516_v51 = vld [vmem:[#allocation2 + $0x3c] sm:$0xe]  ;;  %v1341_v2 = vor.u32 %v1340_v53, %v5413_v63  ;;  %v1618_v17 = vrot.slane %v1616_v9, 4 }
  0x9c   : > { %v1274_v25 = vrot.slane %v1272_v10, 5  ;;  %v1307_v38 = vor.u32 %v1306_v32, %v1303_v30  ;;  %v981_v56 = vld [vmem:[#allocation2 + $0xb0] sm:$0x1]  ;;  %840 = vst.msk [vmem:[#allocation3 + $0x18] sm:$0xf] %vm833_vm15, %v4820_v0  ;;  %vm1808_vm2 = vcmask 93248  }
  0x9d   : > { %841 = vst.msk [vmem:[#allocation3 + $0x1c] sm:$0xf] %vm833_vm15, %v4820_v0  ;;  %v5474_v37 = vld [vmem:[#allocation2 + $0x40] sm:$0xf]  ;;  %v1344_v62 = vshll.u32 %v981_v56, 16  ;;  %v1610_v26 = vsel %vm5401_vm14, %v4373_v60, %v1609_v50  ;;  %v1342_v4 = vrot.slane %v1341_v2, 4 }
  0x9e   : > { %v1275_v46 = vsel %vm4959_vm11, %v1270_v57, %v1274_v25  ;;  %v5462_v48 = vpop.permute.xlu0 %1372  ;;  %v1308_v43 = vrot.slane %v1307_v38, 4  ;;  %842 = vst.msk [vmem:[#allocation3 + $0x20] sm:$0xf] %vm833_vm15, %v4820_v0  ;;  %v1509_v3 = vld [vmem:[#allocation2 + $0x20] sm:$0x1]  ;;  %v1637_v63 = vrot.slane %v5474_v37, 5 }
  0x9f   : > { %1720 = vrot.lane.b32.xlu0 %v1617_v24, %s4822_s21  ;;  %843 = vst.msk [vmem:[#allocation3 + $0x24] sm:$0xf] %vm833_vm15, %v4820_v0  ;;  %v5499_v45 = vld [vmem:[#allocation2 + $0x4c] sm:$0xf]  ;;  %v1346_v58 = vrot.slane %v1344_v62, 5  ;;  %v1619_v8 = vrot.slane %v1509_v3, 5 }
  0xa0   : > { %v1313_v29 = vsel %vm4959_vm11, %v1308_v43, %v5332_v59  ;;  %v5484_v12 = vpop.permute.xlu1 %1376  ;;  %844 = vst.msk [vmem:[#allocation3 + $0x28] sm:$0xf] %vm833_vm15, %v4820_v0  ;;  %v4377_v59 = vrot.slane %v1516_v51, 9  ;;  %v1644_v33 = vrot.slane %v5499_v45, 5  ;;  %v1521_v55 = vld [vmem:[#allocation2 + $0x50] sm:$0x1] }
  0xa1   : > { %845 = vst.msk [vmem:[#allocation3 + $0x2c] sm:$0xf] %vm833_vm15, %v4820_v0  ;;  %v1347_v9 = vsel %vm4959_vm11, %v1342_v4, %v1346_v58  ;;  %v1620_v15 = vsel %vm5401_vm14, %v1618_v17, %v1619_v8  ;;  %v1501_v16 = vld [vmem:[#allocation2] sm:$0xe]  ;;  %v1513_v54 = vld [vmem:[#allocation2 + $0x30] sm:$0xe] }
  0xa2   : > { %1418 = vrot.lane.b32.xlu2 %v1275_v46, %s4821_s20  ;;  %846 = vst.msk [vmem:[#allocation3 + $0x30] sm:$0xf] %vm833_vm15, %v4820_v0  ;;  %v1638_v42 = vsel %vm5401_vm14, %v4377_v59, %v1637_v63  ;;  %v5530_v6 = vld [vmem:[#allocation2 + $0x34] sm:$0xf]  ;;  %v1646_v10 = vrot.slane %v1644_v33, 4  ;;  %v1647_v21 = vrot.slane %v1521_v55, 5 }
  0xa3   : > { %1434 = vrot.lane.b32.xlu1 %v1371_v20, %s4821_s20  ;;  %847 = vst.msk [vmem:[#allocation3 + $0x34] sm:$0xf] %vm833_vm15, %v4820_v0  ;;  %v1381_v57 = vpop.permute.xlu2 %1380  ;;  %v4372_v18 = vrot.slane %v1501_v16, 9  ;;  %v4376_v22 = vrot.slane %v1513_v54, 9  ;;  %v1630_v24 = vrot.slane %v5530_v6, 5  ;;  %v1611_v20 = vrot.slane %v1609_v50, 4 }
  0xa4   : > { %848 = vst.msk [vmem:[#allocation3 + $0x38] sm:$0xf] %vm833_vm15, %v4820_v0  ;;  %v1648_v19 = vsel %vm5401_vm14, %v1646_v10, %v1647_v21  ;;  %v1525_v25 = vld [vmem:[#allocation2 + $0x60] sm:$0xe]  ;;  %v5551_v35 = vld [vmem:[#allocation2 + $0x64] sm:$0xf] }
  0xa5   : > { %849 = vst.msk [vmem:[#allocation3 + $0x3c] sm:$0xf] %vm833_vm15, %v4820_v0  ;;  %v1603_v34 = vsel %vm5401_vm14, %v4372_v18, %v1602_v5  ;;  %v1631_v28 = vsel %vm5401_vm14, %v4376_v22, %v1630_v24  ;;  %v1506_v46 = vld [vmem:[#allocation2 + $0x14] sm:$0x1]  ;;  %v1518_v44 = vld [vmem:[#allocation2 + $0x44] sm:$0x1] }
  0xa6   : > { %v5508_v41 = vpop.permute.xlu0 %1384  ;;  %850 = vst.msk [vmem:[#allocation3 + $0x40] sm:$0xf] %vm833_vm15, %v4820_v0  ;;  %v4380_v30 = vrot.slane %v1525_v25, 9  ;;  %v1658_v5 = vrot.slane %v5551_v35, 5  ;;  %v5574_v27 = vld [vmem:[#allocation2 + $0x70] sm:$0xf] }
  0xa7   : > { %1726 = vrot.lane.b32.xlu0 %v1627_v49, %s4822_s21  ;;  %851 = vst.msk [vmem:[#allocation3 + $0x44] sm:$0xf] %vm833_vm15, %v4820_v0  ;;  %v1612_v23 = vrot.slane %v1506_v46, 5  ;;  %v872_v13 = vld [vmem:[#allocation2] sm:$0xf]  ;;  %v1639_v60 = vrot.slane %v1637_v63, 4 }
  0xa8   : > { %852 = vst.msk [vmem:[#allocation3 + $0x48] sm:$0xf] %vm833_vm15, %v4820_v0  ;;  %v5534_v11 = vpop.permute.xlu1 %1378  ;;  %v1640_v53 = vrot.slane %v1518_v44, 5  ;;  %v876_v43 = vld [vmem:[#allocation2 + $0x18] sm:$0xf]  ;;  %v1659_v40 = vsel %vm5401_vm14, %v4380_v30, %v1658_v5  ;;  %v1665_v50 = vrot.slane %v5574_v27, 5 }
  0xa9   : > { %853 = vst.msk [vmem:[#allocation3 + $0x4c] sm:$0xf] %vm833_vm15, %v4820_v0  ;;  %v1530_v56 = vld [vmem:[#allocation2 + $0x74] sm:$0x1]  ;;  %v1613_v49 = vsel %vm5401_vm14, %v1611_v20, %v1612_v23  ;;  %v874_v51 = vld [vmem:[#allocation2 + $0xc] sm:$0xf] }
  0xaa   : > { %1424 = vrot.lane.b32.xlu2 %v1313_v29, %s4821_s20  ;;  %854 = vst.msk [vmem:[#allocation3 + $0x50] sm:$0xf] %vm833_vm15, %v4820_v0  ;;  %v1510_v37 = vld [vmem:[#allocation2 + $0x24] sm:$0xe]  ;;  %v1522_v2 = vld [vmem:[#allocation2 + $0x54] sm:$0xe] }
  0xab   : > { %1716 = vrot.lane.b32.xlu1 %v1610_v26, %s4822_s21  ;;  %855 = vst.msk [vmem:[#allocation3 + $0x54] sm:$0xf] %vm833_vm15, %v4820_v0  ;;  %v878_v29 = vld [vmem:[#allocation2 + $0x24] sm:$0xf]  ;;  %v5606_v26 = vld [vmem:[#allocation2 + $0x58] sm:$0xf] }
  0xac   : > { %856 = vst.msk [vmem:[#allocation3 + $0x58] sm:$0xf] %vm833_vm15, %v4820_v0  ;;  %v1383_v32 = vpop.permute.xlu2 %1382  ;;  %v1668_v3 = vrot.slane %v1530_v56, 5  ;;  %v4375_v59 = vrot.slane %v1510_v37, 9  ;;  %v877_v63 = vld [vmem:[#allocation2 + $0x1c] sm:$0xf] }
  0xad   : > { %857 = vst.msk [vmem:[#allocation3 + $0x5c] sm:$0xf] %vm833_vm15, %v4820_v0  ;;  %v4379_v4 = vrot.slane %v1522_v2, 9  ;;  %v1651_v58 = vrot.slane %v5606_v26, 5  ;;  %v875_v8 = vld [vmem:[#allocation2 + $0x10] sm:$0xf] }
  0xae   : > { %858 = vst.msk [vmem:[#allocation3 + $0x60] sm:$0xf] %vm833_vm15, %v4820_v0  ;;  %v5553_v31 = vpop.permute.xlu0 %1390  ;;  %v881_v16 = vld [vmem:[#allocation2 + $0x34] sm:$0xf]  ;;  %v1515_v54 = vld [vmem:[#allocation2 + $0x38] sm:$0x1] }
  0xaf   : > { %1732 = vrot.lane.b32.xlu0 %v1638_v42, %s4822_s21  ;;  %859 = vst.msk [vmem:[#allocation3 + $0x64] sm:$0xf] %vm833_vm15, %v4820_v0  ;;  %v880_v61 = vld [vmem:[#allocation2 + $0x30] sm:$0xf]  ;;  %v5640_v21 = vld [vmem:[#allocation2 + $0x94] sm:$0xf] }
  0xb0   : > { %860 = vst.msk [vmem:[#allocation3 + $0x68] sm:$0xf] %vm833_vm15, %v4820_v0  ;;  %v5581_v38 = vpop.permute.xlu1 %1386  ;;  %v1632_v22 = vrot.slane %v1630_v24, 4  ;;  %v1660_v25 = vrot.slane %v1658_v5, 4  ;;  %v884_v6 = vld [vmem:[#allocation2 + $0x48] sm:$0xf] }
  0xb1   : > { %861 = vst.msk [vmem:[#allocation3 + $0x6c] sm:$0xf] %vm833_vm15, %v4820_v0  ;;  %v1686_v24 = vrot.slane %v5640_v21, 5  ;;  %v1539_v46 = vld [vmem:[#allocation2 + $0x98] sm:$0x1]  ;;  %vm2566_vm4 = vcmask 158848  }
  0xb2   : > { %1430 = vrot.lane.b32.xlu2 %v1347_v9, %s4821_s20  ;;  %862 = vst.msk [vmem:[#allocation3 + $0x70] sm:$0xf] %vm833_vm15, %v4820_v0  ;;  %v1534_v9 = vld [vmem:[#allocation2 + $0x84] sm:$0xe]  ;;  %v1519_v35 = vld [vmem:[#allocation2 + $0x48] sm:$0xe] }
  0xb3   : > { %1722 = vrot.lane.b32.xlu1 %v1620_v15, %s4822_s21  ;;  %863 = vst.msk [vmem:[#allocation3 + $0x74] sm:$0xf] %vm833_vm15, %v4820_v0  ;;  %v1624_v15 = vsel %vm5401_vm14, %v4375_v59, %v1623_v52  ;;  %v4383_v10 = vrot.slane %v1534_v9, 9  ;;  %v883_v30 = vld [vmem:[#allocation2 + $0x40] sm:$0xf]  ;;  %vm3661_vm6 = vcmask 257248  }
  0xb4   : > { %864 = vst.msk [vmem:[#allocation3 + $0x78] sm:$0xf] %vm833_vm15, %v4820_v0  ;;  %v1531_v20 = vld [vmem:[#allocation2 + $0x78] sm:$0xe]  ;;  %v5665_v23 = vld [vmem:[#allocation2 + $0x7c] sm:$0xf] }
  0xb5   : > { %865 = vst.msk [vmem:[#allocation3 + $0x7c] sm:$0xf] %vm833_vm15, %v4820_v0  ;;  %v1641_v0 = vsel %vm5401_vm14, %v1639_v60, %v1640_v53  ;;  %v1689_v60 = vrot.slane %v1539_v46, 5  ;;  %v4378_v53 = vrot.slane %v1519_v35, 9  ;;  %v1672_v56 = vrot.slane %v5665_v23, 5 }
  0xb6   : > { %905 = vst.msk [vmem:[#allocation3] sm:$0xf] %vm210_vm0, %v872_v13  ;;  %v5603_v62 = vpop.permute.xlu0 %1396  ;;  %v882_v13 = vld [vmem:[#allocation2 + $0x3c] sm:$0xf]  ;;  %v886_v37 = vld [vmem:[#allocation2 + $0x54] sm:$0xf] }
  0xb7   : > { %1738 = vrot.lane.b32.xlu0 %v1648_v19, %s4822_s21  ;;  %1469 = vst.msk [vmem:[#allocation3] sm:$0xf] %vm1468_vm1, %v5462_v48  ;;  %v1667_v48 = vrot.slane %v1665_v50, 4  ;;  %v1633_v19 = vrot.slane %v1515_v54, 5  ;;  %v1645_v2 = vsel %vm5401_vm14, %v4378_v53, %v1644_v33  ;;  %v889_v9 = vld [vmem:[#allocation2 + $0x64] sm:$0xf] }
  0xb8   : > { %909 = vst.msk [vmem:[#allocation3 + $0x10] sm:$0xf] %vm210_vm0, %v876_v43  ;;  %v887_v43 = vld [vmem:[#allocation2 + $0x58] sm:$0xf]  ;;  %v896_v35 = vld [vmem:[#allocation2 + $0x90] sm:$0xf] }
  0xb9   : > { %1473 = vst.msk [vmem:[#allocation3 + $0x10] sm:$0xf] %vm1468_vm1, %v1381_v57  ;;  %v1669_v42 = vsel %vm5401_vm14, %v1667_v48, %v1668_v3  ;;  %v1527_v57 = vld [vmem:[#allocation2 + $0x68] sm:$0x1]  ;;  %v1634_v44 = vsel %vm5401_vm14, %v1632_v22, %v1633_v19  ;;  %v1524_v3 = vld [vmem:[#allocation2 + $0x5c] sm:$0x1] }
  0xba   : > { %1712 = vrot.lane.b32.xlu2 %v1603_v34, %s4822_s21  ;;  %907 = vst.msk [vmem:[#allocation3 + $0x8] sm:$0xf] %vm210_vm0, %v874_v51  ;;  %v1661_v34 = vrot.slane %v1527_v57, 5  ;;  %v893_v57 = vld [vmem:[#allocation2 + $0x7c] sm:$0xf]  ;;  %vm3998_vm7 = vcmask 290048  }
  0xbb   : > { %1728 = vrot.lane.b32.xlu1 %v1631_v28, %s4822_s21  ;;  %1471 = vst.msk [vmem:[#allocation3 + $0x8] sm:$0xf] %vm1468_vm1, %v5484_v12  ;;  %v5622_v12 = vld [vmem:[#allocation2 + $0x88] sm:$0xf]  ;;  %v5720_v22 = vld [vmem:[#allocation2 + $0xa0] sm:$0xf] }
  0xbc   : > { %911 = vst.msk [vmem:[#allocation3 + $0x18] sm:$0xf] %vm210_vm0, %v878_v29  ;;  %v1679_v52 = vrot.slane %v5622_v12, 5  ;;  %v5681_v29 = vld [vmem:[#allocation2 + $0xac] sm:$0xf]  ;;  %vm4144_vm8 = vcmask 326656  }
  0xbd   : > { %1475 = vst.msk [vmem:[#allocation3 + $0x18] sm:$0xf] %vm1468_vm1, %v5508_v41  ;;  %v1652_v41 = vsel %vm5401_vm14, %v4379_v4, %v1651_v58  ;;  %v1700_v33 = vrot.slane %v5681_v29, 5  ;;  %v890_v4 = vld [vmem:[#allocation2 + $0x6c] sm:$0xf] }
  0xbe   : > { %v1389_v17 = vpop.permute.xlu2 %1388  ;;  %910 = vst.msk [vmem:[#allocation3 + $0x14] sm:$0xf] %vm210_vm0, %v877_v63  ;;  %v1680_v28 = vsel %vm5401_vm14, %v4383_v10, %v1679_v52  ;;  %v1536_v63 = vld [vmem:[#allocation2 + $0x8c] sm:$0x1]  ;;  %v1528_v10 = vld [vmem:[#allocation2 + $0x6c] sm:$0xe] }
  0xbf   : > { %1744 = vrot.lane.b32.xlu0 %v1659_v40, %s4822_s21  ;;  %1474 = vst.msk [vmem:[#allocation3 + $0x14] sm:$0xf] %vm1468_vm1, %v1383_v32  ;;  %v1662_v32 = vsel %vm5401_vm14, %v1660_v25, %v1661_v34  ;;  %v4382_v40 = vrot.slane %v1531_v20, 9  ;;  %v892_v34 = vld [vmem:[#allocation2 + $0x78] sm:$0xf] }
  0xc0   : > { %v1393_v55 = vpop.permute.xlu1 %1392  ;;  %908 = vst.msk [vmem:[#allocation3 + $0xc] sm:$0xf] %vm210_vm0, %v875_v8  ;;  %v5698_v8 = vld [vmem:[#allocation2 + $0xb8] sm:$0xf]  ;;  %v894_v20 = vld [vmem:[#allocation2 + $0x84] sm:$0xf] }
  0xc1   : > { %1472 = vst.msk [vmem:[#allocation3 + $0xc] sm:$0xf] %vm1468_vm1, %v5534_v11  ;;  %v879_v11 = vld [vmem:[#allocation2 + $0x28] sm:$0xf]  ;;  %v1673_v48 = vsel %vm5401_vm14, %v4382_v40, %v1672_v56  ;;  %v1707_v26 = vrot.slane %v5698_v8, 5  ;;  %v1674_v40 = vrot.slane %v1672_v56, 4 }
  0xc2   : > { %1718 = vrot.lane.b32.xlu2 %v1613_v49, %s4822_s21  ;;  %914 = vst.msk [vmem:[#allocation3 + $0x24] sm:$0xf] %vm210_vm0, %v881_v16  ;;  %v1682_v16 = vrot.slane %v1536_v63, 5  ;;  %v899_v53 = vld [vmem:[#allocation2 + $0xa0] sm:$0xf] }
  0xc3   : > { %1734 = vrot.lane.b32.xlu1 %v1641_v0, %s4822_s21  ;;  %1478 = vst.msk [vmem:[#allocation3 + $0x24] sm:$0xf] %vm1468_vm1, %v5553_v31  ;;  %v1543_v0 = vld [vmem:[#allocation2 + $0xa8] sm:$0xe]  ;;  %v898_v27 = vld [vmem:[#allocation2 + $0x9c] sm:$0xf] }
  0xc4   : > { %913 = vst.msk [vmem:[#allocation3 + $0x20] sm:$0xf] %vm210_vm0, %v880_v61  ;;  %v4386_v45 = vrot.slane %v1543_v0, 9  ;;  %v1537_v29 = vld [vmem:[#allocation2 + $0x90] sm:$0xe] }
  0xc5   : > { %1477 = vst.msk [vmem:[#allocation3 + $0x20] sm:$0xf] %vm1468_vm1, %v1389_v17  ;;  %v4396_v21 = vld [vmem:[#allocation2 + $0x3c] sm:$0xf]  ;;  %v4389_v8 = vld [vmem:[#allocation2 + $0x10] sm:$0xf] }
  0xc6   : > { %v1403_v18 = vpop.permute.xlu0 %1402  ;;  %912 = vst.msk [vmem:[#allocation3 + $0x1c] sm:$0xf] %vm210_vm0, %v879_v11  ;;  %v1701_v54 = vsel %vm5401_vm14, %v4386_v45, %v1700_v33  ;;  %v1709_v11 = vrot.slane %v1707_v26, 4  ;;  %v4393_v45 = vld [vmem:[#allocation2 + $0x28] sm:$0xf] }
  0xc7   : > { %1750 = vrot.lane.b32.xlu0 %v1669_v42, %s4822_s21  ;;  %1476 = vst.msk [vmem:[#allocation3 + $0x1c] sm:$0xf] %vm1468_vm1, %v5581_v38  ;;  %v1688_v38 = vrot.slane %v1686_v24, 4  ;;  %v1653_v42 = vrot.slane %v1651_v58, 4  ;;  %v1548_v58 = vld [vmem:[#allocation2 + $0xbc] sm:$0x1] }
  0xc8   : > { %v1395_v31 = vpop.permute.xlu2 %1394  ;;  %v1399_v5 = vpop.permute.xlu1 %1398  ;;  %917 = vst.msk [vmem:[#allocation3 + $0x30] sm:$0xf] %vm210_vm0, %v884_v6  ;;  %v1710_v25 = vrot.slane %v1548_v58, 5  ;;  %v4381_v6 = vrot.slane %v1528_v10, 9  ;;  %v1546_v58 = vld [vmem:[#allocation2 + $0xb4] sm:$0xe] }
  0xc9   : > { %1481 = vst.msk [vmem:[#allocation3 + $0x30] sm:$0xf] %vm1468_vm1, %v5603_v62  ;;  %v1690_v51 = vsel %vm5401_vm14, %v1688_v38, %v1689_v60  ;;  %v885_v62 = vld [vmem:[#allocation2 + $0x4c] sm:$0xf]  ;;  %v1533_v38 = vld [vmem:[#allocation2 + $0x80] sm:$0x1] }
  0xca   : > { %1724 = vrot.lane.b32.xlu2 %v1624_v15, %s4822_s21  ;;  %916 = vst.msk [vmem:[#allocation3 + $0x2c] sm:$0xf] %vm210_vm0, %v883_v30  ;;  %v1681_v15 = vrot.slane %v1679_v52, 4  ;;  %v1711_v30 = vsel %vm5401_vm14, %v1709_v11, %v1710_v25  ;;  %v4399_v10 = vld [vmem:[#allocation2 + $0x4c] sm:$0xf] }
  0xcb   : > { %1740 = vrot.lane.b32.xlu1 %v1652_v41, %s4822_s21  ;;  %1480 = vst.msk [vmem:[#allocation3 + $0x2c] sm:$0xf] %vm1468_vm1, %v1395_v31  ;;  %v888_v41 = vld [vmem:[#allocation2 + $0x60] sm:$0xf] }
  0xcc   : > { %915 = vst.msk [vmem:[#allocation3 + $0x28] sm:$0xf] %vm210_vm0, %v882_v13  ;;  %v1683_v52 = vsel %vm5401_vm14, %v1681_v15, %v1682_v16  ;;  %v4402_v25 = vld [vmem:[#allocation2 + $0x60] sm:$0xf] }
  0xcd   : > { %1479 = vst.msk [vmem:[#allocation3 + $0x28] sm:$0xf] %vm1468_vm1, %v1393_v55  ;;  %v1654_v55 = vrot.slane %v1524_v3, 5 }
  0xce   : > { %920 = vst.msk [vmem:[#allocation3 + $0x3c] sm:$0xf] %vm210_vm0, %v887_v43  ;;  %v1545_v43 = vld [vmem:[#allocation2 + $0xb0] sm:$0x1] }
  0xcf   : > { %1756 = vrot.lane.b32.xlu0 %v1680_v28, %s4822_s21  ;;  %1484 = vst.msk [vmem:[#allocation3 + $0x3c] sm:$0xf] %vm1468_vm1, %v1403_v18  ;;  %v1655_v12 = vsel %vm5401_vm14, %v1653_v42, %v1654_v55  ;;  %v1540_v18 = vld [vmem:[#allocation2 + $0x9c] sm:$0xe]  ;;  %v891_v28 = vld [vmem:[#allocation2 + $0x70] sm:$0xf] }
  0xd0   : > { %v1409_v49 = vpop.permute.xlu0 %1408  ;;  %919 = vst.msk [vmem:[#allocation3 + $0x38] sm:$0xf] %vm210_vm0, %v886_v37  ;;  %v4385_v46 = vrot.slane %v1540_v18, 9  ;;  %v1702_v37 = vrot.slane %v1700_v33, 4  ;;  %v1703_v0 = vrot.slane %v1545_v43, 5 }
  0xd1   : > { %918 = vst.msk [vmem:[#allocation3 + $0x34] sm:$0xf] %vm210_vm0, %v885_v62  ;;  %v4390_v62 = vld [vmem:[#allocation2 + $0x18] sm:$0xf]  ;;  %v4388_v42 = vld [vmem:[#allocation2 + $0xc] sm:$0xf] }
  0xd2   : > { %1730 = vrot.lane.b32.xlu2 %v1634_v44, %s4822_s21  ;;  %1482 = vst.msk [vmem:[#allocation3 + $0x34] sm:$0xf] %vm1468_vm1, %v1399_v5  ;;  %v1693_v44 = vrot.slane %v5720_v22, 5  ;;  %v895_v5 = vld [vmem:[#allocation2 + $0x88] sm:$0xf]  ;;  %v1704_v56 = vsel %vm5401_vm14, %v1702_v37, %v1703_v0 }
  0xd3   : > { %1746 = vrot.lane.b32.xlu1 %v1662_v32, %s4822_s21  ;;  %923 = vst.msk [vmem:[#allocation3 + $0x48] sm:$0xf] %vm210_vm0, %v890_v4  ;;  %v1666_v32 = vsel %vm5401_vm14, %v4381_v6, %v1665_v50  ;;  %v897_v50 = vld [vmem:[#allocation2 + $0x94] sm:$0xf]  ;;  %v903_v33 = vld [vmem:[#allocation2 + $0xb8] sm:$0xf] }
  0xd4   : > { %1487 = vst.msk [vmem:[#allocation3 + $0x48] sm:$0xf] %vm1468_vm1, %v1409_v49  ;;  %v1694_v13 = vsel %vm5401_vm14, %v4385_v46, %v1693_v44  ;;  %v1675_v49 = vrot.slane %v1533_v38, 5  ;;  %v1542_v55 = vld [vmem:[#allocation2 + $0xa4] sm:$0x1] }
  0xd5   : > { %922 = vst.msk [vmem:[#allocation3 + $0x44] sm:$0xf] %vm210_vm0, %v889_v9  ;;  %v1695_v9 = vrot.slane %v1693_v44, 4  ;;  %v1696_v15 = vrot.slane %v1542_v55, 5  ;;  %v4394_v18 = vld [vmem:[#allocation2 + $0x30] sm:$0xf] }
  0xd6   : > { %921 = vst.msk [vmem:[#allocation3 + $0x40] sm:$0xf] %vm210_vm0, %v888_v41  ;;  %v1676_v23 = vsel %vm5401_vm14, %v1674_v40, %v1675_v49  ;;  %v4392_v46 = vld [vmem:[#allocation2 + $0x24] sm:$0xf]  ;;  %v4400_v44 = vld [vmem:[#allocation2 + $0x54] sm:$0xf] }
  0xd7   : > { %1762 = vrot.lane.b32.xlu0 %v1690_v51, %s4822_s21  ;;  %926 = vst.msk [vmem:[#allocation3 + $0x54] sm:$0xf] %vm210_vm0, %v893_v57  ;;  %v902_v51 = vld [vmem:[#allocation2 + $0xb4] sm:$0xf]  ;;  %v4403_v40 = vld [vmem:[#allocation2 + $0x64] sm:$0xf] }
  0xd8   : > { %v1401_v59 = vpop.permute.xlu2 %1400  ;;  %925 = vst.msk [vmem:[#allocation3 + $0x50] sm:$0xf] %vm210_vm0, %v892_v34  ;;  %v4395_v43 = vld [vmem:[#allocation2 + $0x34] sm:$0xf]  ;;  %v363_v55 = vld [vmem:[%s4902_s19 + $0xf8] sm:$0xff] }
  0xd9   : > { %1483 = vst.msk [vmem:[#allocation3 + $0x38] sm:$0xf] %vm1468_vm1, %v1401_v59  ;;  %v1405_v17 = vpop.permute.xlu1 %1404  ;;  %v4384_v59 = vrot.slane %v1537_v29, 9 }
  0xda   : > { %1736 = vrot.lane.b32.xlu2 %v1645_v2, %s4822_s21  ;;  %1485 = vst.msk [vmem:[#allocation3 + $0x40] sm:$0xf] %vm1468_vm1, %v1405_v17  ;;  %v901_v2 = vld [vmem:[#allocation2 + $0xac] sm:$0xf] }
  0xdb   : > { %1752 = vrot.lane.b32.xlu1 %v1673_v48, %s4822_s21  ;;  %924 = vst.msk [vmem:[#allocation3 + $0x4c] sm:$0xf] %vm210_vm0, %v891_v28  ;;  %v900_v48 = vld [vmem:[#allocation2 + $0xa8] sm:$0xf]  ;;  %v1687_v4 = vsel %vm5401_vm14, %v4384_v59, %v1686_v24  ;;  %v1697_v24 = vsel %vm5401_vm14, %v1695_v9, %v1696_v15 }
  0xdc   : > { %929 = vst.msk [vmem:[#allocation3 + $0x60] sm:$0xf] %vm210_vm0, %v896_v35  ;;  %v270_v35 = vld [vmem:[#allocation2 + $0xc0] sm:$0x1] }
  0xdd   : > { %v1415_v61 = vpop.permute.xlu0 %1414  ;;  %928 = vst.msk [vmem:[#allocation3 + $0x5c] sm:$0xf] %vm210_vm0, %v895_v5  ;;  %v271_v5 = vsel %vm4872_vm3, 0, %v270_v35 }
  0xde   : > { %1490 = vst.msk [vmem:[#allocation3 + $0x54] sm:$0xf] %vm1468_vm1, %v1415_v61  ;;  %v4387_v61 = vrot.slane %v1546_v58, 9 }
  0xdf   : > { %1768 = vrot.lane.b32.xlu0 %v1701_v54, %s4822_s21  ;;  %927 = vst.msk [vmem:[#allocation3 + $0x58] sm:$0xf] %vm210_vm0, %v894_v20  ;;  %v4391_v54 = vld [vmem:[#allocation2 + $0x1c] sm:$0xf] }
  0xe0   : > { %932 = vst.msk [vmem:[#allocation3 + $0x6c] sm:$0xf] %vm210_vm0, %v899_v53 }
  0xe1   : > { %v1407_v19 = vpop.permute.xlu2 %1406  ;;  %v1411_v31 = vpop.permute.xlu1 %1410  ;;  %931 = vst.msk [vmem:[#allocation3 + $0x68] sm:$0xf] %vm210_vm0, %v898_v27 }
  0xe2   : > { %1742 = vrot.lane.b32.xlu2 %v1655_v12, %s4822_s21  ;;  %1486 = vst.msk [vmem:[#allocation3 + $0x44] sm:$0xf] %vm1468_vm1, %v1407_v19 }
  0xe3   : > { %1758 = vrot.lane.b32.xlu1 %v1683_v52, %s4822_s21  ;;  %1488 = vst.msk [vmem:[#allocation3 + $0x4c] sm:$0xf] %vm1468_vm1, %v1411_v31  ;;  %v1708_v52 = vsel %vm5401_vm14, %v4387_v61, %v1707_v26  ;;  %v4397_v26 = vld [vmem:[#allocation2 + $0x40] sm:$0xf]  ;;  %v4405_v31 = vld [vmem:[#allocation2 + $0x70] sm:$0xf] }
  0xe4   : > { %930 = vst.msk [vmem:[#allocation3 + $0x64] sm:$0xf] %vm210_vm0, %v897_v50 }
  0xe5   : > { %935 = vst.msk [vmem:[#allocation3 + $0x78] sm:$0xf] %vm210_vm0, %v902_v51 }
  0xe6   : > { %934 = vst.msk [vmem:[#allocation3 + $0x74] sm:$0xf] %vm210_vm0, %v901_v2 }
  0xe7   : > { %1774 = vrot.lane.b32.xlu0 %v1711_v30, %s4822_s21  ;;  %933 = vst.msk [vmem:[#allocation3 + $0x70] sm:$0xf] %vm210_vm0, %v900_v48 }
  0xe8   : > { %936 = vst.msk [vmem:[#allocation3 + $0x7c] sm:$0xf] %vm210_vm0, %v903_v33 }
  0xe9   : > { %v1421_v60 = vpop.permute.xlu0 %1420  ;;  %272 = vst [vmem:[#allocation2 + $0xc0] sm:$0x1] %v271_v5 }
  0xea   : > { %1493 = vst.msk [vmem:[#allocation3 + $0x60] sm:$0xf] %vm1468_vm1, %v1421_v60  ;;  %1748 = vrot.lane.b32.xlu2 %v1666_v32, %s4822_s21  ;;  %v362_v32 = vld [vmem:[%s4902_s19 + $0xf0] sm:$0xff]  ;;  %v4408_v60 = vld [vmem:[#allocation2 + $0x84] sm:$0xf] }
  0xeb   : > { %1764 = vrot.lane.b32.xlu1 %v1694_v13, %s4822_s21  ;;  %v394_v20 = vpack.c.bf16 %v362_v32, %v362_v32 }
  0xed   : > { %v654_v53 = vshrl.u32 %v394_v20, 16  ;;  %v657_v50 = vshll.u32 %v394_v20, 16 }
  0xef   : > { %1913 = vrot.lane.b32.xlu0 %v4390_v62, %s4823_s22  ;;  %v5811_v27 = vrot.slane %v654_v53, 7  ;;  %v4411_v62 = vld [vmem:[#allocation2 + $0x94] sm:$0xf]  ;;  %v4407_v53 = vld [vmem:[#allocation2 + $0x7c] sm:$0xf] }
  0xf0   : > { %v826_v0 = vld [vmem:[#allocation2 + $0xc0] sm:$0xf] }
  0xf1   : > { %v659_v49 = vor.u32 %v657_v50, %v5811_v27 }
  0xf2   : > { %1754 = vrot.lane.b32.xlu2 %v1676_v23, %s4822_s21  ;;  %v4398_v23 = vld [vmem:[#allocation2 + $0x48] sm:$0xf] }
  0xf3   : > { %v1417_v3 = vpop.permute.xlu1 %1416  ;;  %1770 = vrot.lane.b32.xlu1 %v1704_v56, %s4822_s21  ;;  %v827_v48 = vsel %vm4922_vm9, %v659_v49, %v826_v0  ;;  %v4406_v56 = vld [vmem:[#allocation2 + $0x78] sm:$0xf]  ;;  %v4433_v0 = vld [vmem:[#allocation2 + $0x40] sm:$0xf]  ;;  %vm866_vm9 = vcmask 15360  }
  0xf4   : > { %1491 = vst.msk [vmem:[#allocation3 + $0x58] sm:$0xf] %vm1468_vm1, %v1417_v3  ;;  %v1413_v63 = vpop.permute.xlu2 %1412  ;;  %v4420_v3 = vld [vmem:[#allocation2 + $0xc] sm:$0xf] }
  0xf5   : > { %1489 = vst.msk [vmem:[#allocation3 + $0x50] sm:$0xf] %vm1468_vm1, %v1413_v63  ;;  %v4414_v63 = vld [vmem:[#allocation2 + $0xa8] sm:$0xf]  ;;  %v2090_v33 = vshll.u32 %v4420_v3, 16 }
  0xf6   : > { %v1427_v17 = vpop.permute.xlu0 %1426  ;;  %828 = vst [vmem:[#allocation2 + $0xc0] sm:$0xf] %v827_v48 }
  0xf7   : > { %1919 = vrot.lane.b32.xlu0 %v4393_v45, %s4823_s22  ;;  %1496 = vst.msk [vmem:[#allocation3 + $0x6c] sm:$0xf] %vm1468_vm1, %v1427_v17  ;;  %v2087_v45 = vshrl.u32 %v4420_v3, 16  ;;  %v4409_v17 = vld [vmem:[#allocation2 + $0x88] sm:$0xf]  ;;  %v2092_v15 = vrot.slane %v2090_v33, 5 }
  0xf9   : > { %v2089_v9 = vrot.slane %v2087_v45, 4 }
  0xfa   : > { %1760 = vrot.lane.b32.xlu2 %v1687_v4, %s4822_s21  ;;  %v4401_v4 = vld [vmem:[#allocation2 + $0x58] sm:$0xf] }
  0xfb   : > { %1909 = vrot.lane.b32.xlu1 %v4388_v42, %s4823_s22  ;;  %v1423_v16 = vpop.permute.xlu1 %1422  ;;  %v4424_v42 = vld [vmem:[#allocation2 + $0x1c] sm:$0xf] }
  0xfc   : > { %v1419_v41 = vpop.permute.xlu2 %1418  ;;  %1494 = vst.msk [vmem:[#allocation3 + $0x64] sm:$0xf] %vm1468_vm1, %v1423_v16  ;;  %v2124_v58 = vshrl.u32 %v4424_v42, 16 }
  0xfd   : > { %1492 = vst.msk [vmem:[#allocation3 + $0x5c] sm:$0xf] %vm1468_vm1, %v1419_v41  ;;  %v4421_v41 = vld [vmem:[#allocation2 + $0x10] sm:$0xf] }
  0xff   : > { %1925 = vrot.lane.b32.xlu0 %v4396_v21, %s4823_s22  ;;  %v395_v21 = vpack.c.bf16 %v363_v55, %v363_v55 }
 0x101   : > { %v1433_v57 = vpop.permute.xlu0 %1432 }
 0x102   : > { %1766 = vrot.lane.b32.xlu2 %v1697_v24, %s4822_s21  ;;  %1499 = vst.msk [vmem:[#allocation3 + $0x78] sm:$0xf] %vm1468_vm1, %v1433_v57  ;;  %v2120_v24 = vshll.u32 %v4424_v42, 16  ;;  %v662_v57 = vshrl.u32 %v395_v21, 16 }
 0x103   : > { %1915 = vrot.lane.b32.xlu1 %v4391_v54, %s4823_s22 }
 0x104   : > { %v1425_v12 = vpop.permute.xlu2 %1424 }
 0x105   : > { %1495 = vst.msk [vmem:[#allocation3 + $0x68] sm:$0xf] %vm1468_vm1, %v1425_v12  ;;  %v4417_v12 = vld [vmem:[#allocation2 + $0xb8] sm:$0xf] }
 0x107   : > { %1931 = vrot.lane.b32.xlu0 %v4399_v10, %s4823_s22  ;;  %v2093_v10 = vor.u32 %v2092_v15, %v2089_v9 }
 0x109   : > { %v1715_v22 = vpop.permute.xlu0 %1714 }
 0x10a   : > { %1772 = vrot.lane.b32.xlu2 %v1708_v52, %s4822_s21  ;;  %1810 = vst.msk [vmem:[#allocation3 + $0x4] sm:$0xf] %vm1808_vm2, %v1715_v22  ;;  %v2096_v52 = vshll.u32 %v4421_v41, 16  ;;  %v5835_v22 = vrot.slane %v2120_v24, 5 }
 0x10b   : > { %1921 = vrot.lane.b32.xlu1 %v4394_v18, %s4823_s22  ;;  %v4404_v18 = vld [vmem:[#allocation2 + $0x6c] sm:$0xf] }
 0x10c   : > { %v1431_v19 = vpop.permute.xlu2 %1430 }
 0x10d   : > { %1498 = vst.msk [vmem:[#allocation3 + $0x74] sm:$0xf] %vm1468_vm1, %v1431_v19  ;;  %v1429_v11 = vpop.permute.xlu1 %1428  ;;  %v4412_v19 = vld [vmem:[#allocation2 + $0x9c] sm:$0xf] }
 0x10e   : > { %1497 = vst.msk [vmem:[#allocation3 + $0x70] sm:$0xf] %vm1468_vm1, %v1429_v11  ;;  %v2126_v11 = vrot.slane %v2124_v58, 4 }
 0x10f   : > { %1937 = vrot.lane.b32.xlu0 %v4402_v25, %s4823_s22  ;;  %v660_v25 = vrot.slane %v5811_v27, 4  ;;  %v2100_v27 = vshrl.u32 %v4421_v41, 16 }
 0x111   : > { %v1721_v34 = vpop.permute.xlu0 %1720 }
 0x112   : > { %1911 = vrot.lane.b32.xlu2 %v4389_v8, %s4823_s22  ;;  %1813 = vst.msk [vmem:[#allocation3 + $0x10] sm:$0xf] %vm1808_vm2, %v1721_v34  ;;  %v5839_v8 = vrot.slane %v662_v57, 7  ;;  %v2094_v34 = vrot.slane %v2093_v10, 4  ;;  %v4434_v57 = vld [vmem:[#allocation2 + $0x44] sm:$0x1] }
 0x113   : > { %1927 = vrot.lane.b32.xlu1 %v4397_v26, %s4823_s22  ;;  %v665_v26 = vshll.u32 %v395_v21, 16  ;;  %v4438_v21 = vld [vmem:[#allocation2 + $0x54] sm:$0xf] }
 0x114   : > { %v1713_v28 = vpop.permute.xlu2 %1712 }
 0x115   : > { %1809 = vst.msk [vmem:[#allocation3] sm:$0xf] %vm1808_vm2, %v1713_v28  ;;  %v1435_v6 = vpop.permute.xlu1 %1434  ;;  %v5841_v28 = vrot.slane %v2096_v52, 5  ;;  %v5876_v52 = vld [vmem:[#allocation2 + $0x28] sm:$0xf] }
 0x116   : > { %1500 = vst.msk [vmem:[#allocation3 + $0x7c] sm:$0xf] %vm1468_vm1, %v1435_v6  ;;  %v4425_v6 = vld [vmem:[#allocation2 + $0x20] sm:$0x1] }
 0x117   : > { %1943 = vrot.lane.b32.xlu0 %v4405_v31, %s4823_s22  ;;  %v2130_v5 = vshll.u32 %v4425_v6, 16  ;;  %v4413_v6 = vld [vmem:[#allocation2 + $0xa0] sm:$0xf] }
 0x119   : > { %v1727_v30 = vpop.permute.xlu0 %1726  ;;  %v2132_v50 = vrot.slane %v2130_v5, 5 }
 0x11a   : > { %1917 = vrot.lane.b32.xlu2 %v4392_v46, %s4823_s22  ;;  %1816 = vst.msk [vmem:[#allocation3 + $0x1c] sm:$0xf] %vm1808_vm2, %v1727_v30  ;;  %v4429_v46 = vld [vmem:[#allocation2 + $0x30] sm:$0xf]  ;;  %v2127_v30 = vor.u32 %v2126_v11, %v5835_v22 }
 0x11b   : > { %1933 = vrot.lane.b32.xlu1 %v4400_v44, %s4823_s22  ;;  %v667_v44 = vor.u32 %v665_v26, %v5839_v8 }
 0x11c   : > { %v1719_v13 = vpop.permute.xlu2 %1718  ;;  %v2128_v47 = vrot.slane %v2127_v30, 4 }
 0x11d   : > { %1812 = vst.msk [vmem:[#allocation3 + $0xc] sm:$0xf] %vm1808_vm2, %v1719_v13  ;;  %v1717_v38 = vpop.permute.xlu1 %1716  ;;  %v668_v32 = vsel %vm4931_vm10, %v660_v25, %v667_v44  ;;  %v2099_v13 = vsel %vm4959_vm11, %v2094_v34, %v5841_v28  ;;  %v2202_v34 = vshll.u32 %v4434_v57, 16  ;;  %vm4229_vm10 = vcmask 7168  }
 0x11e   : > { %1811 = vst.msk [vmem:[#allocation3 + $0x8] sm:$0xf] %vm1808_vm2, %v1717_v38  ;;  %v2159_v38 = vshrl.u32 %v4429_v46, 16  ;;  %v2133_v48 = vsel %vm4959_vm11, %v2128_v47, %v2132_v50  ;;  %v4435_v47 = vld [vmem:[#allocation2 + $0x48] sm:$0xf] }
 0x11f   : > { %1949 = vrot.lane.b32.xlu0 %v4408_v60, %s4823_s22  ;;  %v2162_v60 = vshll.u32 %v4429_v46, 16  ;;  %829 = vst.msk [vmem:[#allocation2 + $0xc4] sm:$0xf] %vm210_vm0, %v668_v32  ;;  %v2144_v46 = vshll.u32 %v5876_v52, 16  ;;  %v2204_v32 = vrot.slane %v2202_v34, 5  ;;  %vm2005_vm0 = vcmask 126048  }
 0x121   : > { %v1733_v51 = vpop.permute.xlu0 %1732  ;;  %v2164_v49 = vrot.slane %v2162_v60, 5 }
 0x122   : > { %1923 = vrot.lane.b32.xlu2 %v4395_v43, %s4823_s22  ;;  %1819 = vst.msk [vmem:[#allocation3 + $0x28] sm:$0xf] %vm1808_vm2, %v1733_v51  ;;  %v4415_v43 = vld [vmem:[#allocation2 + $0xac] sm:$0xf] }
 0x123   : > { %1939 = vrot.lane.b32.xlu1 %v4403_v40, %s4823_s22  ;;  %v2161_v40 = vrot.slane %v2159_v38, 4 }
 0x124   : > { %v1725_v37 = vpop.permute.xlu2 %1724 }
 0x125   : > { %1815 = vst.msk [vmem:[#allocation3 + $0x18] sm:$0xf] %vm1808_vm2, %v1725_v37  ;;  %v1723_v2 = vpop.permute.xlu1 %1722  ;;  %v5858_v37 = vld [vmem:[#allocation2 + $0x34] sm:$0xf]  ;;  %v2165_v3 = vor.u32 %v2164_v49, %v2161_v40  ;;  %v4431_v40 = vld [vmem:[#allocation2 + $0x38] sm:$0x1] }
 0x126   : > { %1814 = vst.msk [vmem:[#allocation3 + $0x14] sm:$0xf] %vm1808_vm2, %v1723_v2  ;;  %v4426_v2 = vld [vmem:[#allocation2 + $0x24] sm:$0xf] }
 0x127   : > { %1955 = vrot.lane.b32.xlu0 %v4411_v62, %s4823_s22  ;;  %v2135_v45 = vshrl.u32 %v4426_v2, 16  ;;  %v2138_v33 = vshll.u32 %v4426_v2, 16  ;;  %v2166_v9 = vrot.slane %v2165_v3, 4  ;;  %v4416_v3 = vld [vmem:[#allocation2 + $0xb4] sm:$0xf] }
 0x129   : > { %v1739_v29 = vpop.permute.xlu0 %1738  ;;  %v2140_v58 = vrot.slane %v2138_v33, 5 }
 0x12a   : > { %1929 = vrot.lane.b32.xlu2 %v4398_v23, %s4823_s22  ;;  %1822 = vst.msk [vmem:[#allocation3 + $0x34] sm:$0xf] %vm1808_vm2, %v1739_v29  ;;  %v4422_v23 = vld [vmem:[#allocation2 + $0x14] sm:$0x1] }
 0x12b   : > { %1945 = vrot.lane.b32.xlu1 %v4406_v56, %s4823_s22  ;;  %v2102_v56 = vrot.slane %v2100_v27, 4  ;;  %v2106_v55 = vshll.u32 %v4422_v23, 16 }
 0x12c   : > { %v1731_v59 = vpop.permute.xlu2 %1730 }
 0x12d   : > { %1818 = vst.msk [vmem:[#allocation3 + $0x24] sm:$0xf] %vm1808_vm2, %v1731_v59  ;;  %v1729_v39 = vpop.permute.xlu1 %1728  ;;  %v2168_v59 = vshll.u32 %v5858_v37, 16  ;;  %v2103_v42 = vor.u32 %v2102_v56, %v5841_v28  ;;  %v2108_v10 = vrot.slane %v2106_v55, 5  ;;  %v2207_v56 = vshrl.u32 %v4435_v47, 16 }
 0x12e   : > { %1817 = vst.msk [vmem:[#allocation3 + $0x20] sm:$0xf] %vm1808_vm2, %v1729_v39  ;;  %v2192_v39 = vshll.u32 %v4433_v0, 16 }
 0x12f   : > { %1961 = vrot.lane.b32.xlu0 %v4414_v63, %s4823_s22  ;;  %v2196_v63 = vshrl.u32 %v4433_v0, 16  ;;  %v5869_v15 = vrot.slane %v2168_v59, 5 }
 0x131   : > { %v1745_v16 = vpop.permute.xlu0 %1744  ;;  %v2198_v41 = vrot.slane %v2196_v63, 4  ;;  %v2171_v25 = vsel %vm4959_vm11, %v2166_v9, %v5869_v15  ;;  %v2178_v63 = vshll.u32 %v4431_v40, 16  ;;  %v5930_v40 = vld [vmem:[#allocation2 + $0x7c] sm:$0xf] }
 0x132   : > { %1935 = vrot.lane.b32.xlu2 %v4401_v4, %s4823_s22  ;;  %1825 = vst.msk [vmem:[#allocation3 + $0x40] sm:$0xf] %vm1808_vm2, %v1745_v16  ;;  %v4410_v4 = vld [vmem:[#allocation2 + $0x90] sm:$0xf]  ;;  %v5871_v16 = vrot.slane %v2192_v39, 5 }
 0x133   : > { %1951 = vrot.lane.b32.xlu1 %v4409_v17, %s4823_s22  ;;  %v4418_v17 = vld [vmem:[#allocation2 + $0xc0] sm:$0xf]  ;;  %v2180_v57 = vrot.slane %v2178_v63, 5 }
 0x134   : > { %v1737_v54 = vpop.permute.xlu2 %1736  ;;  %v2199_v26 = vor.u32 %v2198_v41, %v5871_v16 }
 0x135   : > { %1821 = vst.msk [vmem:[#allocation3 + $0x30] sm:$0xf] %vm1808_vm2, %v1737_v54  ;;  %v1735_v61 = vpop.permute.xlu1 %1734  ;;  %v2137_v54 = vrot.slane %v2135_v45, 4 }
 0x136   : > { %1820 = vst.msk [vmem:[#allocation3 + $0x2c] sm:$0xf] %vm1808_vm2, %v1735_v61  ;;  %v2200_v5 = vrot.slane %v2199_v26, 4 }
 0x137   : > { %1967 = vrot.lane.b32.xlu0 %v4417_v12, %s4823_s22  ;;  %v2104_v12 = vrot.slane %v2103_v42, 4  ;;  %v2141_v28 = vor.u32 %v2140_v58, %v2137_v54  ;;  %v5908_v42 = vld [vmem:[#allocation2 + $0x4c] sm:$0xf]  ;;  %v4443_v54 = vld [vmem:[#allocation2 + $0x68] sm:$0x1] }
 0x138   : > { %v2274_v26 = vshll.u32 %v4443_v54, 16 }
 0x139   : > { %v1751_v31 = vpop.permute.xlu0 %1750  ;;  %v2109_v44 = vsel %vm4959_vm11, %v2104_v12, %v2108_v10  ;;  %v2142_v60 = vrot.slane %v2141_v28, 4  ;;  %v2148_v12 = vshrl.u32 %v5876_v52, 16 }
 0x13a   : > { %1941 = vrot.lane.b32.xlu2 %v4404_v18, %s4823_s22  ;;  %1828 = vst.msk [vmem:[#allocation3 + $0x4c] sm:$0xf] %vm1808_vm2, %v1751_v31  ;;  %v2231_v18 = vshrl.u32 %v4438_v21, 16  ;;  %v2172_v31 = vshrl.u32 %v5858_v37, 16 }
 0x13b   : > { %1957 = vrot.lane.b32.xlu1 %v4412_v19, %s4823_s22  ;;  %v2234_v19 = vshll.u32 %v4438_v21, 16  ;;  %v2209_v21 = vrot.slane %v2207_v56, 4 }
 0x13c   : > { %v1743_v35 = vpop.permute.xlu2 %1742  ;;  %v2174_v27 = vrot.slane %v2172_v31, 4  ;;  %v4419_v31 = vld [vmem:[#allocation2 + $0xc4] sm:$0xf] }
 0x13d   : > { %1824 = vst.msk [vmem:[#allocation3 + $0x3c] sm:$0xf] %vm1808_vm2, %v1743_v35  ;;  %v1741_v20 = vpop.permute.xlu1 %1740  ;;  %v2233_v35 = vrot.slane %v2231_v18, 4  ;;  %v2236_v30 = vrot.slane %v2234_v19, 5  ;;  %v2216_v19 = vshll.u32 %v5908_v42, 16 }
 0x13e   : > { %1823 = vst.msk [vmem:[#allocation3 + $0x38] sm:$0xf] %vm1808_vm2, %v1741_v20  ;;  %v4423_v20 = vld [vmem:[#allocation2 + $0x18] sm:$0xf]  ;;  %v2175_v39 = vor.u32 %v2174_v27, %v5869_v15 }
 0x13f   : > { %2470 = vrot.lane.b32.xlu0 %v2099_v13, %s4824_s23  ;;  %v5889_v13 = vld [vmem:[#allocation2 + $0x58] sm:$0xf]  ;;  %v2111_v49 = vshrl.u32 %v4423_v20, 16  ;;  %v2237_v37 = vor.u32 %v2236_v30, %v2233_v35  ;;  %v5927_v35 = vrot.slane %v2216_v19, 5  ;;  %v4428_v30 = vld [vmem:[#allocation2 + $0x2c] sm:$0x1] }
 0x140   : > { %v2240_v0 = vshll.u32 %v5889_v13, 16  ;;  %v4447_v15 = vld [vmem:[#allocation2 + $0x78] sm:$0xf]  ;;  %v2176_v58 = vrot.slane %v2175_v39, 4 }
 0x141   : > { %v1757_v51 = vpop.permute.xlu0 %1756  ;;  %v2113_v45 = vrot.slane %v2111_v49, 4  ;;  %v2303_v34 = vshrl.u32 %v4447_v15, 16  ;;  %v2306_v28 = vshll.u32 %v4447_v15, 16  ;;  %v4432_v49 = vld [vmem:[#allocation2 + $0x3c] sm:$0xf] }
 0x142   : > { %1947 = vrot.lane.b32.xlu2 %v4407_v53, %s4823_s22  ;;  %1831 = vst.msk [vmem:[#allocation3 + $0x58] sm:$0xf] %vm1808_vm2, %v1757_v51  ;;  %v4442_v53 = vld [vmem:[#allocation2 + $0x64] sm:$0xf]  ;;  %v2114_v51 = vshll.u32 %v4423_v20, 16  ;;  %v2276_v20 = vrot.slane %v2274_v26, 5 }
 0x143   : > { %1963 = vrot.lane.b32.xlu1 %v4415_v43, %s4823_s22  ;;  %v5894_v43 = vrot.slane %v2144_v46, 5  ;;  %v2268_v23 = vshrl.u32 %v4442_v53, 16  ;;  %v2181_v46 = vsel %vm4959_vm11, %v2176_v58, %v2180_v57  ;;  %v2183_v39 = vshrl.u32 %v4432_v49, 16 }
 0x144   : > { %v1749_v62 = vpop.permute.xlu2 %1748  ;;  %v2116_v33 = vrot.slane %v2114_v51, 5  ;;  %v4444_v51 = vld [vmem:[#allocation2 + $0x6c] sm:$0xf]  ;;  %v2186_v63 = vshll.u32 %v4432_v49, 16 }
 0x145   : > { %1827 = vst.msk [vmem:[#allocation3 + $0x48] sm:$0xf] %vm1808_vm2, %v1749_v62  ;;  %v1747_v29 = vpop.permute.xlu1 %1746  ;;  %v2205_v62 = vsel %vm4959_vm11, %v2200_v5, %v2204_v32  ;;  %v2147_v59 = vsel %vm4959_vm11, %v2142_v60, %v5894_v43  ;;  %v2270_v9 = vrot.slane %v2268_v23, 4  ;;  %v2150_v5 = vrot.slane %v2148_v12, 4  ;;  %v4456_v12 = vld [vmem:[#allocation2 + $0x9c] sm:$0xf] }
 0x146   : > { %1826 = vst.msk [vmem:[#allocation3 + $0x44] sm:$0xf] %vm1808_vm2, %v1747_v29  ;;  %v2210_v29 = vshll.u32 %v4435_v47, 16  ;;  %v2117_v10 = vor.u32 %v2116_v33, %v2113_v45  ;;  %v2308_v60 = vrot.slane %v2306_v28, 5  ;;  %v4440_v47 = vld [vmem:[#allocation2 + $0x5c] sm:$0x1] }
 0x147   : > { %2476 = vrot.lane.b32.xlu0 %v2133_v48, %s4824_s23  ;;  %v2264_v48 = vshll.u32 %v4442_v53, 16  ;;  %v4451_v53 = vld [vmem:[#allocation2 + $0x88] sm:$0xf]  ;;  %v2279_v45 = vshrl.u32 %v4444_v51, 16  ;;  %v2282_v33 = vshll.u32 %v4444_v51, 16 }
 0x148   : > { %v4441_v51 = vld [vmem:[#allocation2 + $0x60] sm:$0xf] }
 0x149   : > { %v1763_v24 = vpop.permute.xlu0 %1762  ;;  %v5910_v55 = vrot.slane %v2264_v48, 5  ;;  %v2340_v48 = vshrl.u32 %v4451_v53, 16  ;;  %v2284_v19 = vrot.slane %v2282_v33, 5  ;;  %v4453_v33 = vld [vmem:[#allocation2 + $0x90] sm:$0xf] }
 0x14a   : > { %1953 = vrot.lane.b32.xlu2 %v4410_v4, %s4823_s22  ;;  %1834 = vst.msk [vmem:[#allocation3 + $0x64] sm:$0xf] %vm1808_vm2, %v1763_v24  ;;  %v2238_v4 = vrot.slane %v2237_v37, 4  ;;  %v2212_v24 = vrot.slane %v2210_v29, 5  ;;  %v2250_v29 = vshll.u32 %v4440_v47, 16 }
 0x14b   : > { %1969 = vrot.lane.b32.xlu1 %v4418_v17, %s4823_s22  ;;  %v5906_v17 = vrot.slane %v2240_v0, 5  ;;  %v2151_v0 = vor.u32 %v2150_v5, %v5894_v43  ;;  %v2342_v54 = vrot.slane %v2340_v48, 4 }
 0x14c   : > { %v1755_v61 = vpop.permute.xlu2 %1754  ;;  %v2213_v52 = vor.u32 %v2212_v24, %v2209_v21  ;;  %v4452_v21 = vld [vmem:[#allocation2 + $0x8c] sm:$0x1]  ;;  %v2252_v58 = vrot.slane %v2250_v29, 5  ;;  %v4449_v29 = vld [vmem:[#allocation2 + $0x80] sm:$0x1] }
 0x14d   : > { %1830 = vst.msk [vmem:[#allocation3 + $0x54] sm:$0xf] %vm1808_vm2, %v1755_v61  ;;  %v1753_v11 = vpop.permute.xlu1 %1752  ;;  %v2243_v18 = vsel %vm4959_vm11, %v2238_v4, %v5906_v17  ;;  %v2346_v26 = vshll.u32 %v4452_v21, 16 }
 0x14e   : > { %1829 = vst.msk [vmem:[#allocation3 + $0x50] sm:$0xf] %vm1808_vm2, %v1753_v11  ;;  %v2214_v27 = vrot.slane %v2213_v52, 4  ;;  %v2378_v52 = vshll.u32 %v4456_v12, 16 }
 0x14f   : > { %2482 = vrot.lane.b32.xlu0 %v2171_v25, %s4824_s23  ;;  %v2271_v25 = vor.u32 %v2270_v9, %v5910_v55 }
 0x150   : > { %v2219_v9 = vsel %vm4959_vm11, %v2214_v27, %v5927_v35  ;;  %v326_v27 = vld [vmem:[#allocation2 + $0xc8] sm:$0x1] }
 0x151   : > { %v1769_v38 = vpop.permute.xlu0 %1768  ;;  %v2272_v32 = vrot.slane %v2271_v25, 4  ;;  %v5955_v25 = vld [vmem:[#allocation2 + $0x70] sm:$0xf]  ;;  %v327_v49 = vsel %vm4892_vm5, 0, %v326_v27 }
 0x152   : > { %1959 = vrot.lane.b32.xlu2 %v4413_v6, %s4823_s22  ;;  %1837 = vst.msk [vmem:[#allocation3 + $0x70] sm:$0xf] %vm1808_vm2, %v1769_v38  ;;  %v2244_v6 = vshrl.u32 %v5889_v13, 16  ;;  %v2305_v38 = vrot.slane %v2303_v34, 4 }
 0x153   : > { %2472 = vrot.lane.b32.xlu1 %v2109_v44, %s4824_s23  ;;  %v2118_v44 = vrot.slane %v2117_v10, 4  ;;  %v2277_v56 = vsel %vm4959_vm11, %v2272_v32, %v2276_v20  ;;  %v2188_v10 = vrot.slane %v2186_v63, 5  ;;  %v2288_v20 = vshll.u32 %v5955_v25, 16  ;;  %328 = vst [vmem:[#allocation2 + $0xc8] sm:$0x1] %v327_v49 }
 0x154   : > { %v1761_v50 = vpop.permute.xlu2 %1760 }
 0x155   : > { %1833 = vst.msk [vmem:[#allocation3 + $0x60] sm:$0xf] %vm1808_vm2, %v1761_v50  ;;  %v1759_v2 = vpop.permute.xlu1 %1758  ;;  %v2246_v50 = vrot.slane %v2244_v6, 4  ;;  %v2123_v43 = vsel %vm4959_vm11, %v2118_v44, %v5835_v22  ;;  %v2375_v6 = vshrl.u32 %v4456_v12, 16  ;;  %v2322_v12 = vshll.u32 %v4449_v29, 16 }
 0x156   : > { %1832 = vst.msk [vmem:[#allocation3 + $0x5c] sm:$0xf] %vm1808_vm2, %v1759_v2  ;;  %v2154_v2 = vshll.u32 %v4428_v30, 16  ;;  %v2220_v30 = vshrl.u32 %v5908_v42, 16 }
 0x157   : > { %2488 = vrot.lane.b32.xlu0 %v2205_v62, %s4824_s23  ;;  %v2336_v62 = vshll.u32 %v4451_v53, 16  ;;  %v2247_v4 = vor.u32 %v2246_v50, %v5906_v17  ;;  %v2185_v17 = vrot.slane %v2183_v39, 4  ;;  %v2316_v53 = vshrl.u32 %v5930_v40, 16 }
 0x158   : > { %v2156_v15 = vrot.slane %v2154_v2, 5  ;;  %v2377_v42 = vrot.slane %v2375_v6, 4  ;;  %v2380_v50 = vrot.slane %v2378_v52, 5  ;;  %v2222_v48 = vrot.slane %v2220_v30, 4  ;;  %v4461_v52 = vld [vmem:[#allocation2 + $0xb0] sm:$0x1] }
 0x159   : > { %v1775_v41 = vpop.permute.xlu0 %1774  ;;  %v5948_v24 = vrot.slane %v2336_v62, 5  ;;  %v2189_v5 = vor.u32 %v2188_v10, %v2185_v17  ;;  %v2255_v39 = vshrl.u32 %v4441_v51, 16  ;;  %v2354_v17 = vshll.u32 %v4453_v33, 16 }
 0x15a   : > { %1965 = vrot.lane.b32.xlu2 %v4416_v3, %s4823_s22  ;;  %1840 = vst.msk [vmem:[#allocation3 + $0x7c] sm:$0xf] %vm1808_vm2, %v1775_v41  ;;  %v2309_v3 = vor.u32 %v2308_v60, %v2305_v38  ;;  %v2152_v41 = vrot.slane %v2151_v0, 4  ;;  %v2381_v63 = vor.u32 %v2380_v50, %v2377_v42  ;;  %v2292_v50 = vshrl.u32 %v5955_v25, 16 }
 0x15b   : > { %2478 = vrot.lane.b32.xlu1 %v2147_v59, %s4824_s23  ;;  %v2312_v59 = vshll.u32 %v5930_v40, 16  ;;  %v2343_v28 = vor.u32 %v2342_v54, %v5948_v24  ;;  %v2190_v0 = vrot.slane %v2189_v5, 4  ;;  %v5977_v40 = vrot.slane %v2288_v20, 5 }
 0x15c   : > { %v1767_v61 = vpop.permute.xlu2 %1766  ;;  %v2310_v57 = vrot.slane %v2309_v3, 4  ;;  %v2157_v38 = vsel %vm4959_vm11, %v2152_v41, %v2156_v15  ;;  %v2356_v5 = vrot.slane %v2354_v17, 5 }
 0x15d   : > { %1836 = vst.msk [vmem:[#allocation3 + $0x6c] sm:$0xf] %vm1808_vm2, %v1767_v61  ;;  %v1765_v11 = vpop.permute.xlu1 %1764  ;;  %v5950_v61 = vrot.slane %v2312_v59, 5  ;;  %v2344_v47 = vrot.slane %v2343_v28, 4  ;;  %v2318_v59 = vrot.slane %v2316_v53, 4  ;;  %v2195_v54 = vsel %vm4959_vm11, %v2190_v0, %v5871_v16 }
 0x15e   : > { %1835 = vst.msk [vmem:[#allocation3 + $0x68] sm:$0xf] %vm1808_vm2, %v1765_v11  ;;  %v2248_v11 = vrot.slane %v2247_v4, 4 }
 0x15f   : > { %2494 = vrot.lane.b32.xlu0 %v2243_v18, %s4824_s23  ;;  %v2281_v18 = vrot.slane %v2279_v45, 4  ;;  %v2315_v44 = vsel %vm4959_vm11, %v2310_v57, %v5950_v61  ;;  %v2319_v10 = vor.u32 %v2318_v59, %v5950_v61  ;;  %v6023_v59 = vld [vmem:[#allocation2 + $0xc4] sm:$0xf] }
 0x160   : > { %v2253_v60 = vsel %vm4959_vm11, %v2248_v11, %v2252_v58  ;;  %v2223_v58 = vor.u32 %v2222_v48, %v5927_v35 }
 0x161   : > { %v1914_v13 = vpop.permute.xlu0 %1913  ;;  %v2285_v32 = vor.u32 %v2284_v19, %v2281_v18  ;;  %v2257_v18 = vrot.slane %v2255_v39, 4  ;;  %v2382_v19 = vrot.slane %v2381_v63, 4  ;;  %v2320_v20 = vrot.slane %v2319_v10, 4  ;;  %v4450_v63 = vld [vmem:[#allocation2 + $0x84] sm:$0xf] }
 0x162   : > { %1971 = vrot.lane.b32.xlu2 %v4419_v31, %s4823_s22  ;;  %2008 = vst.msk [vmem:[#allocation3 + $0x8] sm:$0xf] %vm2005_vm0, %v1914_v13  ;;  %v669_v31 = vrot.slane %v5839_v8, 4  ;;  %v2348_v13 = vrot.slane %v2346_v26, 5  ;;  %v830_v26 = vld [vmem:[#allocation2 + $0xc8] sm:$0x1] }
 0x163   : > { %2484 = vrot.lane.b32.xlu1 %v2181_v46, %s4824_s23  ;;  %v2286_v62 = vrot.slane %v2285_v32, 4  ;;  %v2224_v61 = vrot.slane %v2223_v58, 4  ;;  %v2324_v8 = vrot.slane %v2322_v12, 5  ;;  %v2456_v58 = vshll.u32 %v6023_v59, 16 }
 0x164   : > { %v1773_v37 = vpop.permute.xlu2 %1772  ;;  %v2349_v4 = vsel %vm4959_vm11, %v2344_v47, %v2348_v13  ;;  %v831_v35 = vsel %vm4872_vm3, %v669_v31, %v830_v26  ;;  %v2418_v13 = vshll.u32 %v4461_v52, 16  ;;  %v2327_v12 = vshrl.u32 %v4450_v63, 16 }
 0x165   : > { %1839 = vst.msk [vmem:[#allocation3 + $0x78] sm:$0xf] %vm1808_vm2, %v1773_v37  ;;  %v1771_v23 = vpop.permute.xlu1 %1770  ;;  %v5974_v37 = vld [vmem:[#allocation2 + $0xa0] sm:$0xf]  ;;  %v2291_v15 = vsel %vm4959_vm11, %v2286_v62, %v5977_v40  ;;  %v2325_v0 = vsel %vm4959_vm11, %v2320_v20, %v2324_v8 }
 0x166   : > { %1838 = vst.msk [vmem:[#allocation3 + $0x74] sm:$0xf] %vm1808_vm2, %v1771_v23  ;;  %v4460_v23 = vld [vmem:[#allocation2 + $0xac] sm:$0xf]  ;;  %v2384_v45 = vshll.u32 %v5974_v37, 16  ;;  %v2329_v52 = vrot.slane %v2327_v12, 4 }
 0x167   : > { %2500 = vrot.lane.b32.xlu0 %v2277_v56, %s4824_s23  ;;  %v4437_v56 = vld [vmem:[#allocation2 + $0x50] sm:$0x1]  ;;  %v2408_v41 = vshll.u32 %v4460_v23, 16  ;;  %v2412_v21 = vshrl.u32 %v4460_v23, 16  ;;  %832 = vst [vmem:[#allocation2 + $0xc8] sm:$0x1] %v831_v35 }
 0x168   : > { %v2226_v57 = vshll.u32 %v4437_v56, 16  ;;  %v5995_v11 = vrot.slane %v2384_v45, 5  ;;  %v2420_v23 = vrot.slane %v2418_v13, 5 }
 0x169   : > { %v1920_v22 = vpop.permute.xlu0 %1919  ;;  %v2414_v28 = vrot.slane %v2412_v21, 4 }
 0x16a   : > { %2474 = vrot.lane.b32.xlu2 %v2123_v43, %s4824_s23  ;;  %2011 = vst.msk [vmem:[#allocation3 + $0x14] sm:$0xf] %vm2005_vm0, %v1920_v22  ;;  %v2351_v22 = vshrl.u32 %v4453_v33, 16  ;;  %v2387_v31 = vsel %vm4959_vm11, %v2382_v19, %v5995_v11 }
 0x16b   : > { %2490 = vrot.lane.b32.xlu1 %v2219_v9, %s4824_s23  ;;  %v2258_v9 = vshll.u32 %v4441_v51, 16 }
 0x16c   : > { %v1912_v34 = vpop.permute.xlu2 %1911  ;;  %v2353_v30 = vrot.slane %v2351_v22, 4  ;;  %v2330_v22 = vshll.u32 %v4450_v63, 16 }
 0x16d   : > { %2007 = vst.msk [vmem:[#allocation3 + $0x4] sm:$0xf] %vm2005_vm0, %v1912_v34  ;;  %v1910_v46 = vpop.permute.xlu1 %1909  ;;  %v2260_v16 = vrot.slane %v2258_v9, 5  ;;  %v5997_v34 = vrot.slane %v2408_v41, 5  ;;  %v4462_v9 = vld [vmem:[#allocation2 + $0xb4] sm:$0xf] }
 0x16e   : > { %2006 = vst.msk [vmem:[#allocation3] sm:$0xf] %vm2005_vm0, %v1910_v46  ;;  %v4465_v46 = vld [vmem:[#allocation2 + $0xc0] sm:$0xf]  ;;  %v2357_v51 = vor.u32 %v2356_v5, %v2353_v30  ;;  %v2426_v19 = vshll.u32 %v4462_v9, 16 }
 0x16f   : > { %2506 = vrot.lane.b32.xlu0 %v2315_v44, %s4824_s23  ;;  %v2228_v44 = vrot.slane %v2226_v57, 5  ;;  %v2415_v53 = vor.u32 %v2414_v28, %v5997_v34  ;;  %v2447_v27 = vshrl.u32 %v4465_v46, 16  ;;  %v2450_v47 = vshll.u32 %v4465_v46, 16  ;;  %v6046_v46 = vld [vmem:[#allocation2 + $0x10] sm:$0xf] }
 0x170   : > { %v2261_v42 = vor.u32 %v2260_v16, %v2257_v18  ;;  %v2358_v39 = vrot.slane %v2357_v51, 4  ;;  %v2423_v18 = vshrl.u32 %v4462_v9, 16  ;;  %v2428_v5 = vrot.slane %v2426_v19, 5  ;;  %v6080_v9 = vld [vmem:[#allocation2 + $0x28] sm:$0xf] }
 0x171   : > { %v1926_v2 = vpop.permute.xlu0 %1925  ;;  %v2229_v49 = vsel %vm4959_vm11, %v2224_v61, %v2228_v44  ;;  %v2416_v48 = vrot.slane %v2415_v53, 4  ;;  %v2449_v56 = vrot.slane %v2447_v27, 4  ;;  %v2452_v29 = vrot.slane %v2450_v47, 5  ;;  %v4470_v27 = vld [vmem:[#allocation2 + $0x14] sm:$0x1] }
 0x172   : > { %2480 = vrot.lane.b32.xlu2 %v2157_v38, %s4824_s23  ;;  %2014 = vst.msk [vmem:[#allocation3 + $0x20] sm:$0xf] %vm2005_vm0, %v1926_v2  ;;  %v6009_v38 = vld [vmem:[#allocation2 + $0x94] sm:$0xf]  ;;  %v2388_v2 = vshrl.u32 %v5974_v37, 16  ;;  %v2262_v25 = vrot.slane %v2261_v42, 4 }
 0x173   : > { %2496 = vrot.lane.b32.xlu1 %v2253_v60, %s4824_s23  ;;  %v2360_v62 = vshll.u32 %v6009_v38, 16  ;;  %v2294_v37 = vrot.slane %v2292_v50, 4  ;;  %v2421_v21 = vsel %vm4959_vm11, %v2416_v48, %v2420_v23  ;;  %v2425_v30 = vrot.slane %v2423_v18, 4 }
 0x174   : > { %v1918_v3 = vpop.permute.xlu2 %1917  ;;  %v2267_v57 = vsel %vm4959_vm11, %v2262_v25, %v5910_v55  ;;  %v2697_v53 = vrot.slane %v6046_v46, 5  ;;  %v2364_v47 = vshrl.u32 %v6009_v38, 16  ;;  %v2460_v51 = vshrl.u32 %v6023_v59, 16 }
 0x175   : > { %2010 = vst.msk [vmem:[#allocation3 + $0x10] sm:$0xf] %vm2005_vm0, %v1918_v3  ;;  %v1916_v43 = vpop.permute.xlu1 %1915  ;;  %v6027_v33 = vrot.slane %v2360_v62, 5  ;;  %v2295_v17 = vor.u32 %v2294_v37, %v5977_v40  ;;  %v2332_v40 = vrot.slane %v2330_v22, 5  ;;  %v2429_v50 = vor.u32 %v2428_v5, %v2425_v30 }
 0x176   : > { %2009 = vst.msk [vmem:[#allocation3 + $0xc] sm:$0xf] %vm2005_vm0, %v1916_v43  ;;  %v4446_v43 = vld [vmem:[#allocation2 + $0x74] sm:$0x1]  ;;  %v2700_v62 = vrot.slane %v4470_v27, 5  ;;  %v2462_v59 = vrot.slane %v2460_v51, 4 }
 0x177   : > { %2512 = vrot.lane.b32.xlu0 %v2349_v4, %s4824_s23  ;;  %v2390_v4 = vrot.slane %v2388_v2, 4  ;;  %v2298_v10 = vshll.u32 %v4446_v43, 16  ;;  %v2363_v26 = vsel %vm4959_vm11, %v2358_v39, %v6027_v33  ;;  %v2296_v61 = vrot.slane %v2295_v17, 4  ;;  %v4459_v39 = vld [vmem:[#allocation2 + $0xa8] sm:$0xf] }
 0x178   : > { %v2333_v13 = vor.u32 %v2332_v40, %v2329_v52  ;;  %v2699_v2 = vrot.slane %v2697_v53, 4  ;;  %v2430_v23 = vrot.slane %v2429_v50, 4  ;;  %v4479_v40 = vld [vmem:[#allocation2 + $0x38] sm:$0x1]  ;;  %v4464_v50 = vld [vmem:[#allocation2 + $0xbc] sm:$0x1] }
 0x179   : > { %v1932_v6 = vpop.permute.xlu0 %1931  ;;  %v2391_v16 = vor.u32 %v2390_v4, %v5995_v11  ;;  %v2300_v44 = vrot.slane %v2298_v10, 5  ;;  %v4474_v4 = vld [vmem:[#allocation2 + $0x24] sm:$0xe] }
 0x17a   : > { %2486 = vrot.lane.b32.xlu2 %v2195_v54, %s4824_s23  ;;  %2017 = vst.msk [vmem:[#allocation3 + $0x2c] sm:$0xf] %vm2005_vm0, %v1932_v6  ;;  %v4458_v54 = vld [vmem:[#allocation2 + $0xa4] sm:$0x1]  ;;  %v6043_v6 = vrot.slane %v2456_v58, 5  ;;  %v2334_v38 = vrot.slane %v2333_v13, 4  ;;  %v2701_v63 = vsel %vm5401_vm14, %v2699_v2, %v2700_v62 }
 0x17b   : > { %2502 = vrot.lane.b32.xlu1 %v2291_v15, %s4824_s23  ;;  %v2453_v15 = vor.u32 %v2452_v29, %v2449_v56  ;;  %v2394_v28 = vshll.u32 %v4458_v54, 16  ;;  %v2301_v42 = vsel %vm4959_vm11, %v2296_v61, %v2300_v44  ;;  %v2366_v56 = vrot.slane %v2364_v47, 4  ;;  %v6117_v2 = vld [vmem:[#allocation2 + $0x4c] sm:$0xf] }
 0x17c   : > { %v1924_v32 = vpop.permute.xlu2 %1923  ;;  %v2339_v43 = vsel %vm4959_vm11, %v2334_v38, %v5948_v24  ;;  %v2399_v54 = vshrl.u32 %v4459_v39, 16  ;;  %v4518_v22 = vrot.slane %v4474_v4, 9  ;;  %v2711_v24 = vrot.slane %v6080_v9, 5 }
 0x17d   : > { %2013 = vst.msk [vmem:[#allocation3 + $0x1c] sm:$0xf] %vm2005_vm0, %v1924_v32  ;;  %v1922_v60 = vpop.permute.xlu1 %1921  ;;  %v2454_v35 = vrot.slane %v2453_v15, 4  ;;  %v2392_v32 = vrot.slane %v2391_v16, 4  ;;  %v2396_v20 = vrot.slane %v2394_v28, 5  ;;  %v2402_v15 = vshll.u32 %v4459_v39, 16 }
 0x17e   : > { %2012 = vst.msk [vmem:[#allocation3 + $0x18] sm:$0xf] %vm2005_vm0, %v1922_v60  ;;  %v6054_v60 = vld [vmem:[#allocation2 + $0xb8] sm:$0xf]  ;;  %v2401_v19 = vrot.slane %v2399_v54, 4 }
 0x17f   : > { %2518 = vrot.lane.b32.xlu0 %v2387_v31, %s4824_s23  ;;  %v2459_v31 = vsel %vm4959_vm11, %v2454_v35, %v6043_v6  ;;  %v2436_v61 = vshrl.u32 %v6054_v60, 16  ;;  %v6130_v39 = vld [vmem:[#allocation2 + $0x58] sm:$0xf] }
 0x180   : > { %v2739_v9 = vrot.slane %v6130_v39, 5 }
 0x181   : > { %v1938_v3 = vpop.permute.xlu0 %1937  ;;  %v2438_v13 = vrot.slane %v2436_v61, 4  ;;  %v4485_v61 = vld [vmem:[#allocation2 + $0x50] sm:$0x1] }
 0x182   : > { %2492 = vrot.lane.b32.xlu2 %v2229_v49, %s4824_s23  ;;  %2020 = vst.msk [vmem:[#allocation3 + $0x38] sm:$0xf] %vm2005_vm0, %v1938_v3  ;;  %v2397_v49 = vsel %vm4959_vm11, %v2392_v32, %v2396_v20  ;;  %v4455_v3 = vld [vmem:[#allocation2 + $0x98] sm:$0x1]  ;;  %v6105_v32 = vld [vmem:[#allocation2 + $0x1c] sm:$0xf] }
 0x183   : > { %2508 = vrot.lane.b32.xlu1 %v2325_v0, %s4824_s23  ;;  %v2432_v0 = vshll.u32 %v6054_v60, 16 }
 0x184   : > { %v1930_v45 = vpop.permute.xlu2 %1929 }
 0x185   : > { %2016 = vst.msk [vmem:[#allocation3 + $0x28] sm:$0xf] %vm2005_vm0, %v1930_v45  ;;  %v1928_v41 = vpop.permute.xlu1 %1927  ;;  %v6071_v25 = vrot.slane %v2432_v0, 5  ;;  %v4467_v45 = vld [vmem:[#allocation2 + $0xc8] sm:$0x1] }
 0x186   : > { %2015 = vst.msk [vmem:[#allocation3 + $0x24] sm:$0xf] %vm2005_vm0, %v1928_v41  ;;  %v2367_v41 = vor.u32 %v2366_v56, %v6027_v33  ;;  %v2466_v12 = vshll.u32 %v4467_v45, 16  ;;  %v6090_v33 = vld [vmem:[#allocation2 + $0x34] sm:$0xf] }
 0x187   : > { %2524 = vrot.lane.b32.xlu0 %v2421_v21, %s4824_s23  ;;  %v2370_v21 = vshll.u32 %v4455_v3, 16  ;;  %v2435_v58 = vsel %vm4959_vm11, %v2430_v23, %v6071_v25  ;;  %v2718_v52 = vrot.slane %v6090_v33, 5  ;;  %v4483_v0 = vld [vmem:[#allocation2 + $0x48] sm:$0xe]  ;;  %v2439_v38 = vor.u32 %v2438_v13, %v6071_v25  ;;  %v4476_v56 = vld [vmem:[#allocation2 + $0x2c] sm:$0x1] }
 0x188   : > { %v2368_v10 = vrot.slane %v2367_v41, 4  ;;  %v2468_v35 = vrot.slane %v2466_v12, 5  ;;  %v2732_v3 = vrot.slane %v6117_v2, 5  ;;  %v2714_v45 = vrot.slane %v4476_v56, 5  ;;  %v4488_v41 = vld [vmem:[#allocation2 + $0x5c] sm:$0x1] }
 0x189   : > { %v1944_v55 = vpop.permute.xlu0 %1943  ;;  %v2372_v18 = vrot.slane %v2370_v21, 5  ;;  %v2720_v20 = vrot.slane %v2718_v52, 4  ;;  %v2741_v12 = vrot.slane %v2739_v9, 4 }
 0x18a   : > { %2498 = vrot.lane.b32.xlu2 %v2267_v57, %s4824_s23  ;;  %2023 = vst.msk [vmem:[#allocation3 + $0x44] sm:$0xf] %vm2005_vm0, %v1944_v55  ;;  %v2463_v57 = vor.u32 %v2462_v59, %v6043_v6  ;;  %v2712_v55 = vsel %vm5401_vm14, %v4518_v22, %v2711_v24  ;;  %v2742_v22 = vrot.slane %v4488_v41, 5 }
 0x18b   : > { %2514 = vrot.lane.b32.xlu1 %v2363_v26, %s4824_s23  ;;  %v2404_v26 = vrot.slane %v2402_v15, 5  ;;  %v2373_v44 = vsel %vm4959_vm11, %v2368_v10, %v2372_v18  ;;  %v4468_v15 = vld [vmem:[#allocation2 + $0xc] sm:$0xe] }
 0x18c   : > { %v1936_v11 = vpop.permute.xlu2 %1935  ;;  %v2464_v28 = vrot.slane %v2463_v57, 4  ;;  %v6144_v57 = vld [vmem:[#allocation2 + $0x40] sm:$0xf] }
 0x18d   : > { %2019 = vst.msk [vmem:[#allocation3 + $0x34] sm:$0xf] %vm2005_vm0, %v1936_v11  ;;  %v1934_v8 = vpop.permute.xlu1 %1933  ;;  %v2405_v30 = vor.u32 %v2404_v26, %v2401_v19  ;;  %v4471_v11 = vld [vmem:[#allocation2 + $0x18] sm:$0xe]  ;;  %v2725_v19 = vrot.slane %v6144_v57, 5 }
 0x18e   : > { %2018 = vst.msk [vmem:[#allocation3 + $0x30] sm:$0xf] %vm2005_vm0, %v1934_v8  ;;  %v2469_v5 = vsel %vm4959_vm11, %v2464_v28, %v2468_v35  ;;  %v2721_v8 = vrot.slane %v4479_v40, 5  ;;  %v4517_v47 = vrot.slane %v4471_v11, 9  ;;  %v4492_v28 = vld [vmem:[#allocation2 + $0x6c] sm:$0xe] }
 0x18f   : > { %2530 = vrot.lane.b32.xlu0 %v2459_v31, %s4824_s23  ;;  %v2406_v60 = vrot.slane %v2405_v30, 4  ;;  %v4493_v35 = vld [vmem:[#allocation2 + $0x70] sm:$0xf]  ;;  %v4473_v40 = vld [vmem:[#allocation2 + $0x20] sm:$0x1]  ;;  %v2727_v33 = vrot.slane %v2725_v19, 4 }
 0x190   : > { %v2722_v51 = vsel %vm5401_vm14, %v2720_v20, %v2721_v8  ;;  %v2753_v30 = vrot.slane %v4493_v35, 5  ;;  %v6164_v11 = vld [vmem:[#allocation2 + $0x7c] sm:$0xf]  ;;  %v2734_v8 = vrot.slane %v2732_v3, 4 }
 0x191   : > { %v1950_v48 = vpop.permute.xlu0 %1949  ;;  %v2411_v62 = vsel %vm4959_vm11, %v2406_v60, %v5997_v34  ;;  %v2440_v34 = vrot.slane %v2439_v38, 4 }
 0x192   : > { %2504 = vrot.lane.b32.xlu2 %v2301_v42, %s4824_s23  ;;  %2026 = vst.msk [vmem:[#allocation3 + $0x50] sm:$0xf] %vm2005_vm0, %v1950_v48  ;;  %v2704_v42 = vrot.slane %v6105_v32, 5  ;;  %v2442_v48 = vshll.u32 %v4464_v50, 16  ;;  %v4477_v50 = vld [vmem:[#allocation2 + $0x30] sm:$0xe] }
 0x193   : > { %2520 = vrot.lane.b32.xlu1 %v2397_v49, %s4824_s23  ;;  %v4519_v38 = vrot.slane %v4477_v50, 9 }
 0x194   : > { %v1942_v29 = vpop.permute.xlu2 %1941  ;;  %v2705_v23 = vsel %vm5401_vm14, %v4517_v47, %v2704_v42  ;;  %v2444_v25 = vrot.slane %v2442_v48, 5  ;;  %v2706_v46 = vrot.slane %v2704_v42, 4  ;;  %v4497_v47 = vld [vmem:[#allocation2 + $0x80] sm:$0x1] }
 0x195   : > { %2022 = vst.msk [vmem:[#allocation3 + $0x40] sm:$0xf] %vm2005_vm0, %v1942_v29  ;;  %v1940_v37 = vpop.permute.xlu1 %1939  ;;  %v4521_v29 = vrot.slane %v4483_v0, 9  ;;  %v2763_v2 = vrot.slane %v4497_v47, 5 }
 0x196   : > { %2021 = vst.msk [vmem:[#allocation3 + $0x3c] sm:$0xf] %vm2005_vm0, %v1940_v37  ;;  %v2445_v21 = vsel %vm4959_vm11, %v2440_v34, %v2444_v25  ;;  %v4502_v34 = vld [vmem:[#allocation2 + $0x94] sm:$0xf]  ;;  %v2719_v25 = vsel %vm5401_vm14, %v4519_v38, %v2718_v52 }
 0x197   : > { %2809 = vrot.lane.b32.xlu0 %v2701_v63, %s4825_s24  ;;  %v2713_v63 = vrot.slane %v2711_v24, 4  ;;  %v2733_v4 = vsel %vm5401_vm14, %v4521_v29, %v2732_v3 }
 0x199   : > { %v1956_v17 = vpop.permute.xlu0 %1955  ;;  %v2715_v54 = vsel %vm5401_vm14, %v2713_v63, %v2714_v45  ;;  %v4482_v63 = vld [vmem:[#allocation2 + $0x44] sm:$0x1]  ;;  %v4494_v45 = vld [vmem:[#allocation2 + $0x74] sm:$0x1] }
 0x19a   : > { %2510 = vrot.lane.b32.xlu2 %v2339_v43, %s4824_s23  ;;  %2029 = vst.msk [vmem:[#allocation3 + $0x5c] sm:$0xf] %vm2005_vm0, %v1956_v17  ;;  %v4516_v17 = vrot.slane %v4468_v15, 9  ;;  %v2755_v15 = vrot.slane %v2753_v30, 4 }
 0x19b   : > { %2526 = vrot.lane.b32.xlu1 %v2435_v58, %s4824_s23  ;;  %v4480_v58 = vld [vmem:[#allocation2 + $0x3c] sm:$0xe] }
 0x19c   : > { %v1948_v16 = vpop.permute.xlu2 %1947  ;;  %v4520_v18 = vrot.slane %v4480_v58, 9  ;;  %v2756_v58 = vrot.slane %v4494_v45, 5 }
 0x19d   : > { %2025 = vst.msk [vmem:[#allocation3 + $0x4c] sm:$0xf] %vm2005_vm0, %v1948_v16  ;;  %v1946_v6 = vpop.permute.xlu1 %1945  ;;  %v2743_v16 = vsel %vm5401_vm14, %v2741_v12, %v2742_v22 }
 0x19e   : > { %2024 = vst.msk [vmem:[#allocation3 + $0x48] sm:$0xf] %vm2005_vm0, %v1946_v6  ;;  %v2698_v6 = vsel %vm5401_vm14, %v4516_v17, %v2697_v53  ;;  %v2707_v53 = vrot.slane %v4473_v40, 5 }
 0x19f   : > { %2815 = vrot.lane.b32.xlu0 %v2712_v55, %s4825_s24  ;;  %v2726_v55 = vsel %vm5401_vm14, %v4520_v18, %v2725_v19  ;;  %v4486_v18 = vld [vmem:[#allocation2 + $0x54] sm:$0xe]  ;;  %v4498_v19 = vld [vmem:[#allocation2 + $0x84] sm:$0xe] }
 0x1a0   : > { %v2708_v32 = vsel %vm5401_vm14, %v2706_v46, %v2707_v53  ;;  %v4526_v40 = vrot.slane %v4498_v19, 9  ;;  %v6226_v46 = vld [vmem:[#allocation2 + $0xb8] sm:$0xf]  ;;  %v4534_v19 = vld [vmem:[#allocation2 + $0x24] sm:$0xf] }
 0x1a1   : > { %v1962_v31 = vpop.permute.xlu0 %1961 }
 0x1a2   : > { %2516 = vrot.lane.b32.xlu2 %v2373_v44, %s4824_s23  ;;  %2032 = vst.msk [vmem:[#allocation3 + $0x68] sm:$0xf] %vm2005_vm0, %v1962_v31  ;;  %v4524_v44 = vrot.slane %v4492_v28, 9  ;;  %v2735_v31 = vrot.slane %v4485_v61, 5 }
 0x1a3   : > { %2532 = vrot.lane.b32.xlu1 %v2469_v5, %s4824_s23 }
 0x1a4   : > { %v1954_v27 = vpop.permute.xlu2 %1953  ;;  %v2754_v13 = vsel %vm5401_vm14, %v4524_v44, %v2753_v30  ;;  %v2736_v42 = vsel %vm5401_vm14, %v2734_v8, %v2735_v31  ;;  %v4491_v8 = vld [vmem:[#allocation2 + $0x68] sm:$0x1]  ;;  %v4503_v31 = vld [vmem:[#allocation2 + $0x98] sm:$0x1] }
 0x1a5   : > { %2028 = vst.msk [vmem:[#allocation3 + $0x58] sm:$0xf] %vm2005_vm0, %v1954_v27  ;;  %v1952_v49 = vpop.permute.xlu1 %1951  ;;  %v2760_v27 = vrot.slane %v6164_v11, 5 }
 0x1a6   : > { %2027 = vst.msk [vmem:[#allocation3 + $0x54] sm:$0xf] %vm2005_vm0, %v1952_v49  ;;  %v4489_v49 = vld [vmem:[#allocation2 + $0x60] sm:$0xe] }
 0x1a7   : > { %2821 = vrot.lane.b32.xlu0 %v2722_v51, %s4825_s24  ;;  %v6180_v51 = vld [vmem:[#allocation2 + $0x64] sm:$0xf]  ;;  %v2762_v0 = vrot.slane %v2760_v27, 4 }
 0x1a8   : > { %v2746_v56 = vrot.slane %v6180_v51, 5 }
 0x1a9   : > { %v1968_v59 = vpop.permute.xlu0 %1967  ;;  %v2764_v3 = vsel %vm5401_vm14, %v2762_v0, %v2763_v2 }
 0x1aa   : > { %2522 = vrot.lane.b32.xlu2 %v2411_v62, %s4824_s23  ;;  %2035 = vst.msk [vmem:[#allocation3 + $0x74] sm:$0xf] %vm2005_vm0, %v1968_v59  ;;  %v4501_v59 = vld [vmem:[#allocation2 + $0x90] sm:$0xe]  ;;  %v2748_v39 = vrot.slane %v2746_v56, 4 }
 0x1ab   : > { %2811 = vrot.lane.b32.xlu1 %v2705_v23, %s4825_s24  ;;  %v4523_v23 = vrot.slane %v4489_v49, 9  ;;  %v2777_v49 = vrot.slane %v4503_v31, 5 }
 0x1ac   : > { %v1960_v37 = vpop.permute.xlu2 %1959 }
 0x1ad   : > { %2031 = vst.msk [vmem:[#allocation3 + $0x64] sm:$0xf] %vm2005_vm0, %v1960_v37  ;;  %v1958_v43 = vpop.permute.xlu1 %1957  ;;  %v2747_v37 = vsel %vm5401_vm14, %v4523_v23, %v2746_v56  ;;  %v4495_v23 = vld [vmem:[#allocation2 + $0x78] sm:$0xe]  ;;  %v4507_v56 = vld [vmem:[#allocation2 + $0xa8] sm:$0xe] }
 0x1ae   : > { %2030 = vst.msk [vmem:[#allocation3 + $0x60] sm:$0xf] %vm2005_vm0, %v1958_v43  ;;  %v4527_v43 = vrot.slane %v4501_v59, 9  ;;  %v4529_v45 = vrot.slane %v4507_v56, 9 }
 0x1af   : > { %2827 = vrot.lane.b32.xlu0 %v2733_v4, %s4825_s24  ;;  %v2774_v4 = vrot.slane %v4502_v34, 5 }
 0x1b1   : > { %v2471_v24 = vpop.permute.xlu0 %2470  ;;  %v2775_v12 = vsel %vm5401_vm14, %v4527_v43, %v2774_v4  ;;  %v2776_v50 = vrot.slane %v2774_v4, 4 }
 0x1b2   : > { %2528 = vrot.lane.b32.xlu2 %v2445_v21, %s4824_s23  ;;  %2567 = vst.msk [vmem:[#allocation3] sm:$0xf] %vm2566_vm4, %v2471_v24  ;;  %v6200_v21 = vld [vmem:[#allocation2 + $0xa0] sm:$0xf]  ;;  %v4506_v24 = vld [vmem:[#allocation2 + $0xa4] sm:$0x1] }
 0x1b3   : > { %2817 = vrot.lane.b32.xlu1 %v2715_v54, %s4825_s24  ;;  %v2728_v54 = vrot.slane %v4482_v63, 5  ;;  %v2781_v22 = vrot.slane %v6200_v21, 5  ;;  %v2784_v28 = vrot.slane %v4506_v24, 5 }
 0x1b4   : > { %v1966_v10 = vpop.permute.xlu2 %1965 }
 0x1b5   : > { %2034 = vst.msk [vmem:[#allocation3 + $0x70] sm:$0xf] %vm2005_vm0, %v1966_v10  ;;  %v1964_v26 = vpop.permute.xlu1 %1963  ;;  %v2729_v17 = vsel %vm5401_vm14, %v2727_v33, %v2728_v54  ;;  %v2757_v10 = vsel %vm5401_vm14, %v2755_v15, %v2756_v58  ;;  %v4500_v58 = vld [vmem:[#allocation2 + $0x8c] sm:$0x1] }
 0x1b6   : > { %2033 = vst.msk [vmem:[#allocation3 + $0x6c] sm:$0xf] %vm2005_vm0, %v1964_v26  ;;  %v6214_v26 = vld [vmem:[#allocation2 + $0x88] sm:$0xf] }
 0x1b7   : > { %2833 = vrot.lane.b32.xlu0 %v2743_v16, %s4825_s24  ;;  %v2783_v16 = vrot.slane %v2781_v22, 4  ;;  %v2767_v61 = vrot.slane %v6214_v26, 5 }
 0x1b9   : > { %v2477_v5 = vpop.permute.xlu0 %2476  ;;  %v2785_v30 = vsel %vm5401_vm14, %v2783_v16, %v2784_v28  ;;  %v2769_v11 = vrot.slane %v2767_v61, 4 }
 0x1ba   : > { %2807 = vrot.lane.b32.xlu2 %v2698_v6, %s4825_s24  ;;  %2570 = vst.msk [vmem:[#allocation3 + $0xc] sm:$0xf] %vm2566_vm4, %v2477_v5  ;;  %v4522_v6 = vrot.slane %v4486_v18, 9  ;;  %v4510_v5 = vld [vmem:[#allocation2 + $0xb4] sm:$0xe] }
 0x1bb   : > { %2823 = vrot.lane.b32.xlu1 %v2726_v55, %s4825_s24 }
 0x1bc   : > { %v1972_v20 = vpop.permute.xlu2 %1971  ;;  %v2740_v53 = vsel %vm5401_vm14, %v4522_v6, %v2739_v9  ;;  %v2749_v9 = vrot.slane %v4491_v8, 5  ;;  %v4504_v6 = vld [vmem:[#allocation2 + $0x9c] sm:$0xe] }
 0x1bd   : > { %2037 = vst.msk [vmem:[#allocation3 + $0x7c] sm:$0xf] %vm2005_vm0, %v1972_v20  ;;  %v1970_v60 = vpop.permute.xlu1 %1969  ;;  %v2768_v20 = vsel %vm5401_vm14, %v4526_v40, %v2767_v61 }
 0x1be   : > { %2036 = vst.msk [vmem:[#allocation3 + $0x78] sm:$0xf] %vm2005_vm0, %v1970_v60  ;;  %v4530_v60 = vrot.slane %v4510_v5, 9  ;;  %v2750_v38 = vsel %vm5401_vm14, %v2748_v39, %v2749_v9  ;;  %v4528_v5 = vrot.slane %v4504_v6, 9  ;;  %v4532_v39 = vld [vmem:[#allocation2 + $0x18] sm:$0xf] }
 0x1bf   : > { %2839 = vrot.lane.b32.xlu0 %v2754_v13, %s4825_s24  ;;  %v2795_v13 = vrot.slane %v6226_v46, 5  ;;  %v4509_v9 = vld [vmem:[#allocation2 + $0xb0] sm:$0x1]  ;;  %v4633_v6 = vld [vmem:[#allocation2 + $0x6c] sm:$0xe] }
 0x1c1   : > { %v2483_v62 = vpop.permute.xlu0 %2482  ;;  %v2796_v0 = vsel %vm5401_vm14, %v4530_v60, %v2795_v13 }
 0x1c2   : > { %2813 = vrot.lane.b32.xlu2 %v2708_v32, %s4825_s24  ;;  %2573 = vst.msk [vmem:[#allocation3 + $0x18] sm:$0xf] %vm2566_vm4, %v2483_v62  ;;  %v6239_v32 = vld [vmem:[#allocation2 + $0xc4] sm:$0xf]  ;;  %v4515_v62 = vld [vmem:[#allocation2 + $0xc8] sm:$0x1] }
 0x1c3   : > { %2829 = vrot.lane.b32.xlu1 %v2736_v42, %s4825_s24  ;;  %v2802_v2 = vrot.slane %v6239_v32, 5  ;;  %v2805_v59 = vrot.slane %v4515_v62, 5 }
 0x1c4   : > { %v2475_v48 = vpop.permute.xlu2 %2474 }
 0x1c5   : > { %2569 = vst.msk [vmem:[#allocation3 + $0x8] sm:$0xf] %vm2566_vm4, %v2475_v48  ;;  %v2473_v29 = vpop.permute.xlu1 %2472  ;;  %v2778_v48 = vsel %vm5401_vm14, %v2776_v50, %v2777_v49 }
 0x1c6   : > { %2568 = vst.msk [vmem:[#allocation3 + $0x4] sm:$0xf] %vm2566_vm4, %v2473_v29  ;;  %v6253_v29 = vld [vmem:[#allocation2 + $0xac] sm:$0xf] }
 0x1c7   : > { %2845 = vrot.lane.b32.xlu0 %v2764_v3, %s4825_s24  ;;  %v2804_v3 = vrot.slane %v2802_v2, 4  ;;  %v2788_v43 = vrot.slane %v6253_v29, 5  ;;  %v4535_v29 = vld [vmem:[#allocation2 + $0x28] sm:$0xf] }
 0x1c9   : > { %v2489_v41 = vpop.permute.xlu0 %2488  ;;  %v2806_v54 = vsel %vm5401_vm14, %v2804_v3, %v2805_v59  ;;  %v2789_v1 = vsel %vm5401_vm14, %v4529_v45, %v2788_v43  ;;  %v2790_v21 = vrot.slane %v2788_v43, 4 }
 0x1ca   : > { %2819 = vrot.lane.b32.xlu2 %v2719_v25, %s4825_s24  ;;  %2576 = vst.msk [vmem:[#allocation3 + $0x24] sm:$0xf] %vm2566_vm4, %v2489_v41  ;;  %v273_v25 = vld [vmem:[#allocation2 + $0xcc] sm:$0x1]  ;;  %v329_v41 = vld [vmem:[#allocation2 + $0xd4] sm:$0x1] }
 0x1cb   : > { %2835 = vrot.lane.b32.xlu1 %v2747_v37, %s4825_s24  ;;  %v4525_v37 = vrot.slane %v4495_v23, 9  ;;  %v274_v4 = vsel %vm4872_vm3, 0, %v273_v25  ;;  %vm2903_vm3 = vcmask 191648  }
 0x1cc   : > { %v2481_v52 = vpop.permute.xlu2 %2480  ;;  %275 = vst [vmem:[#allocation2 + $0xcc] sm:$0x1] %v274_v4 }
 0x1cd   : > { %2572 = vst.msk [vmem:[#allocation3 + $0x14] sm:$0xf] %vm2566_vm4, %v2481_v52  ;;  %v2479_v57 = vpop.permute.xlu1 %2478  ;;  %v330_v52 = vsel %vm4892_vm5, 0, %v329_v41  ;;  %v2761_v15 = vsel %vm5401_vm14, %v4525_v37, %v2760_v27  ;;  %v2770_v27 = vrot.slane %v4500_v58, 5  ;;  %vm3100_vm5 = vcmask 224448  }
 0x1ce   : > { %2571 = vst.msk [vmem:[#allocation3 + $0x10] sm:$0xf] %vm2566_vm4, %v2479_v57  ;;  %v4512_v57 = vld [vmem:[#allocation2 + $0xbc] sm:$0x1] }
 0x1cf   : > { %2851 = vrot.lane.b32.xlu0 %v2775_v12, %s4825_s24  ;;  %331 = vst [vmem:[#allocation2 + $0xd4] sm:$0x1] %v330_v52  ;;  %v4585_v12 = vld [vmem:[#allocation2 + $0x6c] sm:$0xf]  ;;  %v4587_v52 = vld [vmem:[#allocation2 + $0x74] sm:$0x1] }
 0x1d0   : > { %v3350_v16 = vshrl.u32 %v4585_v12, 16  ;;  %v3353_v28 = vshll.u32 %v4585_v12, 16  ;;  %v3369_v12 = vshll.u32 %v4587_v52, 16 }
 0x1d1   : > { %v2495_v35 = vpop.permute.xlu0 %2494 }
 0x1d2   : > { %2825 = vrot.lane.b32.xlu2 %v2729_v17, %s4825_s24  ;;  %2579 = vst.msk [vmem:[#allocation3 + $0x30] sm:$0xf] %vm2566_vm4, %v2495_v35  ;;  %v2797_v17 = vrot.slane %v2795_v13, 4  ;;  %v2771_v35 = vsel %vm5401_vm14, %v2769_v11, %v2770_v27  ;;  %v3355_v40 = vrot.slane %v3353_v28, 5 }
 0x1d3   : > { %2841 = vrot.lane.b32.xlu1 %v2757_v10, %s4825_s24  ;;  %v2798_v10 = vrot.slane %v4512_v57, 5  ;;  %v4562_v57 = vld [vmem:[#allocation2 + $0xcc] sm:$0xf] }
 0x1d4   : > { %v2487_v55 = vpop.permute.xlu2 %2486 }
 0x1d5   : > { %2575 = vst.msk [vmem:[#allocation3 + $0x20] sm:$0xf] %vm2566_vm4, %v2487_v55  ;;  %v2485_v44 = vpop.permute.xlu1 %2484  ;;  %v2799_v26 = vsel %vm5401_vm14, %v2797_v17, %v2798_v10  ;;  %v3352_v55 = vrot.slane %v3350_v16, 4  ;;  %v4582_v17 = vld [vmem:[#allocation2 + $0x60] sm:$0xf] }
 0x1d6   : > { %2574 = vst.msk [vmem:[#allocation3 + $0x1c] sm:$0xf] %vm2566_vm4, %v2485_v44  ;;  %v4586_v44 = vld [vmem:[#allocation2 + $0x70] sm:$0xf]  ;;  %v4611_v62 = vld [vmem:[#allocation2 + $0xd4] sm:$0x1] }
 0x1d7   : > { %2857 = vrot.lane.b32.xlu0 %v2785_v30, %s4825_s24  ;;  %v4610_v30 = vld [vmem:[#allocation2 + $0xd0] sm:$0xf]  ;;  %v3356_v8 = vor.u32 %v3355_v40, %v3352_v55  ;;  %v3359_v31 = vshll.u32 %v4586_v44, 16  ;;  %v3561_v3 = vshll.u32 %v4611_v62, 16  ;;  %v3363_v25 = vshrl.u32 %v4586_v44, 16 }
 0x1d8   : > { %v3551_v60 = vshll.u32 %v4610_v30, 16  ;;  %v3555_v13 = vshrl.u32 %v4610_v30, 16  ;;  %v3326_v16 = vshrl.u32 %v4582_v17, 16  ;;  %v3329_v28 = vshll.u32 %v4582_v17, 16  ;;  %v6340_v55 = vld [vmem:[#allocation2 + $0x70] sm:$0xf] }
 0x1d9   : > { %v2501_v47 = vpop.permute.xlu0 %2500  ;;  %v3361_v50 = vrot.slane %v3359_v31, 5  ;;  %v3365_v41 = vrot.slane %v3363_v25, 4  ;;  %v4583_v30 = vld [vmem:[#allocation2 + $0x64] sm:$0xf]  ;;  %v4609_v31 = vld [vmem:[#allocation2 + $0xcc] sm:$0xf] }
 0x1da   : > { %2831 = vrot.lane.b32.xlu2 %v2740_v53, %s4825_s24  ;;  %2582 = vst.msk [vmem:[#allocation3 + $0x3c] sm:$0xf] %vm2566_vm4, %v2501_v47  ;;  %v4547_v53 = vld [vmem:[#allocation2 + $0x70] sm:$0xf]  ;;  %v2782_v47 = vsel %vm5401_vm14, %v4528_v5, %v2781_v22  ;;  %v6300_v49 = vrot.slane %v3551_v60, 5  ;;  %v3328_v40 = vrot.slane %v3326_v16, 4 }
 0x1db   : > { %2847 = vrot.lane.b32.xlu1 %v2768_v20, %s4825_s24  ;;  %v4607_v5 = vld [vmem:[#allocation2 + $0xc4] sm:$0xf]  ;;  %v4659_v62 = vld [vmem:[#allocation2 + $0xd4] sm:$0x1] }
 0x1dc   : > { %v2493_v42 = vpop.permute.xlu2 %2492  ;;  %v3900_v25 = vrot.slane %v4659_v62, 5  ;;  %v6373_v17 = vld [vmem:[#allocation2 + $0xc4] sm:$0xf]  ;;  %v4606_v62 = vld [vmem:[#allocation2 + $0xc0] sm:$0xf] }
 0x1dd   : > { %2578 = vst.msk [vmem:[#allocation3 + $0x2c] sm:$0xf] %vm2566_vm4, %v2493_v42  ;;  %v2491_v51 = vpop.permute.xlu1 %2490  ;;  %v3357_v42 = vrot.slane %v3356_v8, 4  ;;  %v4545_v8 = vld [vmem:[#allocation2 + $0x64] sm:$0xf] }
 0x1de   : > { %2577 = vst.msk [vmem:[#allocation3 + $0x28] sm:$0xf] %vm2566_vm4, %v2491_v51  ;;  %v3557_v51 = vrot.slane %v3555_v13, 4 }
 0x1df   : > { %2863 = vrot.lane.b32.xlu0 %v2796_v0, %s4825_s24  ;;  %v3362_v23 = vsel %vm4959_vm11, %v3357_v42, %v3361_v50  ;;  %v4546_v42 = vld [vmem:[#allocation2 + $0x6c] sm:$0xf] }
 0x1e0   : > { %v3558_v56 = vor.u32 %v3557_v51, %v6300_v49  ;;  %v3545_v51 = vshll.u32 %v4609_v31, 16 }
 0x1e1   : > { %v2507_v34 = vpop.permute.xlu0 %2506 }
 0x1e2   : > { %2837 = vrot.lane.b32.xlu2 %v2750_v38, %s4825_s24  ;;  %2585 = vst.msk [vmem:[#allocation3 + $0x48] sm:$0xf] %vm2566_vm4, %v2507_v34  ;;  %v2791_v38 = vrot.slane %v4509_v9, 5  ;;  %v4513_v34 = vld [vmem:[#allocation2 + $0xc0] sm:$0xe]  ;;  %v3559_v37 = vrot.slane %v3558_v56, 4 }
 0x1e3   : > { %2853 = vrot.lane.b32.xlu1 %v2778_v48, %s4825_s24  ;;  %v4531_v43 = vrot.slane %v4513_v34, 9  ;;  %v3531_v9 = vshrl.u32 %v4607_v5, 16  ;;  %v4608_v56 = vld [vmem:[#allocation2 + $0xc8] sm:$0x1] }
 0x1e4   : > { %v2499_v63 = vpop.permute.xlu2 %2498  ;;  %v2792_v59 = vsel %vm5401_vm14, %v2790_v21, %v2791_v38 }
 0x1e5   : > { %2581 = vst.msk [vmem:[#allocation3 + $0x38] sm:$0xf] %vm2566_vm4, %v2499_v63  ;;  %v2497_v33 = vpop.permute.xlu1 %2496  ;;  %v3563_v63 = vrot.slane %v3561_v3, 5  ;;  %v2803_v58 = vsel %vm5401_vm14, %v4531_v43, %v2802_v2  ;;  %v3371_v2 = vrot.slane %v3369_v12, 5  ;;  %v3537_v43 = vshll.u32 %v4608_v56, 16 }
 0x1e6   : > { %2580 = vst.msk [vmem:[#allocation3 + $0x34] sm:$0xf] %vm2566_vm4, %v2497_v33 }
 0x1e7   : > { %2869 = vrot.lane.b32.xlu0 %v2806_v54, %s4825_s24  ;;  %v3564_v54 = vsel %vm4959_vm11, %v3559_v37, %v3563_v63 }
 0x1e9   : > { %v2513_v7 = vpop.permute.xlu0 %2512 }
 0x1ea   : > { %2843 = vrot.lane.b32.xlu2 %v2761_v15, %s4825_s24  ;;  %2588 = vst.msk [vmem:[#allocation3 + $0x54] sm:$0xf] %vm2566_vm4, %v2513_v7  ;;  %v4657_v15 = vld [vmem:[#allocation2 + $0xcc] sm:$0xe]  ;;  %v3366_v7 = vor.u32 %v3365_v41, %v3361_v50  ;;  %v3542_v50 = vshrl.u32 %v4609_v31, 16 }
 0x1eb   : > { %2859 = vrot.lane.b32.xlu1 %v2789_v1, %s4825_s24  ;;  %v6322_v1 = vld [vmem:[#allocation2 + $0xd0] sm:$0xf]  ;;  %v4675_v11 = vrot.slane %v4657_v15, 9  ;;  %v3539_v15 = vrot.slane %v3537_v43, 5  ;;  %v6394_v31 = vld [vmem:[#allocation2 + $0x64] sm:$0xf] }
 0x1ec   : > { %v2505_v24 = vpop.permute.xlu2 %2504  ;;  %v3897_v27 = vrot.slane %v6322_v1, 5  ;;  %v3367_v10 = vrot.slane %v3366_v7, 4  ;;  %v3544_v3 = vrot.slane %v3542_v50, 4 }
 0x1ed   : > { %2584 = vst.msk [vmem:[#allocation3 + $0x44] sm:$0xf] %vm2566_vm4, %v2505_v24  ;;  %v2503_v18 = vpop.permute.xlu1 %2502 }
 0x1ee   : > { %2583 = vst.msk [vmem:[#allocation3 + $0x40] sm:$0xf] %vm2566_vm4, %v2503_v18  ;;  %v3899_v34 = vrot.slane %v3897_v27, 4 }
 0x1ef   : > { %3008 = vrot.lane.b32.xlu0 %v4534_v19, %s4826_s25  ;;  %v3898_v19 = vsel %vm5401_vm14, %v4675_v11, %v3897_v27  ;;  %v4584_v27 = vld [vmem:[#allocation2 + $0x68] sm:$0x1] }
 0x1f1   : > { %v2519_v61 = vpop.permute.xlu0 %2518 }
 0x1f2   : > { %2849 = vrot.lane.b32.xlu2 %v2771_v35, %s4825_s24  ;;  %2591 = vst.msk [vmem:[#allocation3 + $0x60] sm:$0xf] %vm2566_vm4, %v2519_v61  ;;  %v4533_v35 = vld [vmem:[#allocation2 + $0x1c] sm:$0xf]  ;;  %v3331_v61 = vrot.slane %v3329_v28, 5  ;;  %v3890_v28 = vrot.slane %v6373_v17, 5 }
 0x1f3   : > { %2865 = vrot.lane.b32.xlu1 %v2799_v26, %s4825_s24  ;;  %v3372_v26 = vsel %vm4959_vm11, %v3367_v10, %v3371_v2  ;;  %v4560_v10 = vld [vmem:[#allocation2 + $0xc0] sm:$0xf]  ;;  %v4635_v2 = vld [vmem:[#allocation2 + $0x74] sm:$0x1] }
 0x1f4   : > { %v2511_v46 = vpop.permute.xlu2 %2510  ;;  %v3332_v13 = vor.u32 %v3331_v61, %v3328_v40  ;;  %v3844_v40 = vrot.slane %v4635_v2, 5 }
 0x1f5   : > { %2587 = vst.msk [vmem:[#allocation3 + $0x50] sm:$0xf] %vm2566_vm4, %v2511_v46  ;;  %v2509_v20 = vpop.permute.xlu1 %2508 }
 0x1f6   : > { %2586 = vst.msk [vmem:[#allocation3 + $0x4c] sm:$0xf] %vm2566_vm4, %v2509_v20  ;;  %v3841_v20 = vrot.slane %v6340_v55, 5  ;;  %v3333_v21 = vrot.slane %v3332_v13, 4 }
 0x1f7   : > { %3034 = vrot.lane.b32.xlu0 %v4547_v53, %s4826_s25  ;;  %v4667_v53 = vrot.slane %v4633_v6, 9 }
 0x1f8   : > { %v3843_v6 = vrot.slane %v3841_v20, 4 }
 0x1f9   : > { %v2525_v0 = vpop.permute.xlu0 %2524 }
 0x1fa   : > { %2855 = vrot.lane.b32.xlu2 %v2782_v47, %s4825_s24  ;;  %2594 = vst.msk [vmem:[#allocation3 + $0x6c] sm:$0xf] %vm2566_vm4, %v2525_v0  ;;  %v3335_v47 = vshll.u32 %v4583_v30, 16  ;;  %v3842_v0 = vsel %vm5401_vm14, %v4667_v53, %v3841_v20  ;;  %v3845_v55 = vsel %vm5401_vm14, %v3843_v6, %v3844_v40  ;;  %v4651_v6 = vld [vmem:[#allocation2 + $0xb4] sm:$0xe] }
 0x1fb   : > { %3004 = vrot.lane.b32.xlu1 %v4532_v39, %s4826_s25  ;;  %v3527_v39 = vshll.u32 %v4607_v5, 16  ;;  %v6427_v40 = vld [vmem:[#allocation2 + $0xb8] sm:$0xf] }
 0x1fc   : > { %v2517_v22 = vpop.permute.xlu2 %2516  ;;  %v3337_v38 = vrot.slane %v3335_v47, 5 }
 0x1fd   : > { %2590 = vst.msk [vmem:[#allocation3 + $0x5c] sm:$0xf] %vm2566_vm4, %v2517_v22  ;;  %v2515_v48 = vpop.permute.xlu1 %2514  ;;  %v6353_v22 = vrot.slane %v3527_v39, 5  ;;  %v4580_v39 = vld [vmem:[#allocation2 + $0x58] sm:$0xf] }
 0x1fe   : > { %2589 = vst.msk [vmem:[#allocation3 + $0x58] sm:$0xf] %vm2566_vm4, %v2515_v48  ;;  %v3533_v48 = vrot.slane %v3531_v9, 4  ;;  %v3338_v63 = vsel %vm4959_vm11, %v3333_v21, %v3337_v38  ;;  %v4604_v9 = vld [vmem:[#allocation2 + $0xb8] sm:$0xf]  ;;  %v3315_v17 = vshrl.u32 %v4580_v39, 16 }
 0x1ff   : > { %3593 = vrot.lane.b32.xlu0 %v3362_v23, %s4827_s26  ;;  %v3507_v56 = vshrl.u32 %v4604_v9, 16 }
 0x201   : > { %v2531_v45 = vpop.permute.xlu0 %2530  ;;  %v3509_v43 = vrot.slane %v3507_v56, 4  ;;  %v4601_v56 = vld [vmem:[#allocation2 + $0xac] sm:$0xf] }
 0x202   : > { %2861 = vrot.lane.b32.xlu2 %v2792_v59, %s4825_s24  ;;  %2597 = vst.msk [vmem:[#allocation3 + $0x78] sm:$0xf] %vm2566_vm4, %v2531_v45  ;;  %v3547_v59 = vrot.slane %v3545_v51, 5  ;;  %v3534_v45 = vor.u32 %v3533_v48, %v6353_v22  ;;  %v3834_v51 = vrot.slane %v6394_v31, 5  ;;  %v3311_v48 = vshll.u32 %v4580_v39, 16 }
 0x203   : > { %3010 = vrot.lane.b32.xlu1 %v4535_v29, %s4826_s25 }
 0x204   : > { %v2523_v4 = vpop.permute.xlu2 %2522  ;;  %v3548_v41 = vor.u32 %v3547_v59, %v3544_v3  ;;  %v3535_v52 = vrot.slane %v3534_v45, 4  ;;  %v4544_v3 = vld [vmem:[#allocation2 + $0x60] sm:$0xf]  ;;  %v3518_v59 = vshrl.u32 %v4606_v62, 16 }
 0x205   : > { %2593 = vst.msk [vmem:[#allocation3 + $0x68] sm:$0xf] %vm2566_vm4, %v2523_v4  ;;  %v2521_v33 = vpop.permute.xlu1 %2520  ;;  %v4563_v4 = vld [vmem:[#allocation2 + $0xd0] sm:$0xf] }
 0x206   : > { %2592 = vst.msk [vmem:[#allocation3 + $0x64] sm:$0xf] %vm2566_vm4, %v2521_v33  ;;  %v3901_v33 = vsel %vm5401_vm14, %v3899_v34, %v3900_v25  ;;  %v3540_v11 = vsel %vm4959_vm11, %v3535_v52, %v3539_v15  ;;  %v4656_v25 = vld [vmem:[#allocation2 + $0xc8] sm:$0x1]  ;;  %v3892_v15 = vrot.slane %v3890_v28, 4 }
 0x207   : > { %3627 = vrot.lane.b32.xlu0 %v3564_v54, %s4827_s26  ;;  %v3339_v54 = vshrl.u32 %v4583_v30, 16 }
 0x209   : > { %v2810_v24 = vpop.permute.xlu0 %2809  ;;  %v3341_v7 = vrot.slane %v3339_v54, 4 }
 0x20a   : > { %2867 = vrot.lane.b32.xlu2 %v2803_v58, %s4825_s24  ;;  %2905 = vst.msk [vmem:[#allocation3 + $0x4] sm:$0xf] %vm2903_vm3, %v2810_v24  ;;  %v3549_v58 = vrot.slane %v3548_v41, 4  ;;  %v4654_v24 = vld [vmem:[#allocation2 + $0xc0] sm:$0xe] }
 0x20b   : > { %3064 = vrot.lane.b32.xlu1 %v4562_v57, %s4826_s25  ;;  %v4674_v16 = vrot.slane %v4654_v24, 9  ;;  %v4605_v41 = vld [vmem:[#allocation2 + $0xbc] sm:$0x1] }
 0x20c   : > { %v2529_v32 = vpop.permute.xlu2 %2528 }
 0x20d   : > { %2596 = vst.msk [vmem:[#allocation3 + $0x74] sm:$0xf] %vm2566_vm4, %v2529_v32  ;;  %v2527_v18 = vpop.permute.xlu1 %2526  ;;  %v3554_v32 = vsel %vm4959_vm11, %v3549_v58, %v6300_v49  ;;  %v3891_v5 = vsel %vm5401_vm14, %v4674_v16, %v3890_v28  ;;  %v3317_v16 = vrot.slane %v3315_v17, 4 }
 0x20e   : > { %2595 = vst.msk [vmem:[#allocation3 + $0x70] sm:$0xf] %vm2566_vm4, %v2527_v18  ;;  %v3342_v18 = vor.u32 %v3341_v7, %v3337_v38 }
 0x20f   : > { %3962 = vrot.lane.b32.xlu0 %v3898_v19, %s4828_s27  ;;  %v3345_v19 = vshll.u32 %v4584_v27, 16 }
 0x210   : > { %v3343_v61 = vrot.slane %v3342_v18, 4 }
 0x211   : > { %v2816_v44 = vpop.permute.xlu0 %2815 }
 0x212   : > { %3006 = vrot.lane.b32.xlu2 %v4533_v35, %s4826_s25  ;;  %2908 = vst.msk [vmem:[#allocation3 + $0x10] sm:$0xf] %vm2903_vm3, %v2816_v44  ;;  %v3347_v44 = vrot.slane %v3345_v19, 5 }
 0x213   : > { %3595 = vrot.lane.b32.xlu1 %v3372_v26, %s4827_s26  ;;  %v4579_v26 = vld [vmem:[#allocation2 + $0x54] sm:$0xf] }
 0x214   : > { %v2808_v46 = vpop.permute.xlu2 %2807  ;;  %v3305_v53 = vshll.u32 %v4579_v26, 16  ;;  %v3348_v20 = vsel %vm4959_vm11, %v3343_v61, %v3347_v44  ;;  %v4558_v61 = vld [vmem:[#allocation2 + $0xb4] sm:$0xf]  ;;  %v4632_v44 = vld [vmem:[#allocation2 + $0x68] sm:$0x1] }
 0x215   : > { %2904 = vst.msk [vmem:[#allocation3] sm:$0xf] %vm2903_vm3, %v2808_v46  ;;  %v2533_v60 = vpop.permute.xlu1 %2532  ;;  %v3302_v46 = vshrl.u32 %v4579_v26, 16  ;;  %v4581_v26 = vld [vmem:[#allocation2 + $0x5c] sm:$0x1] }
 0x216   : > { %2598 = vst.msk [vmem:[#allocation3 + $0x7c] sm:$0xf] %vm2566_vm4, %v2533_v60  ;;  %v3307_v13 = vrot.slane %v3305_v53, 5  ;;  %v3883_v53 = vrot.slane %v6427_v40, 5 }
 0x217   : > { %3030 = vrot.lane.b32.xlu0 %v4545_v8, %s4826_s25  ;;  %v4630_v8 = vld [vmem:[#allocation2 + $0x60] sm:$0xe]  ;;  %v3304_v60 = vrot.slane %v3302_v46, 4  ;;  %v4673_v46 = vrot.slane %v4651_v6, 9 }
 0x218   : > { %v4666_v50 = vrot.slane %v4630_v8, 9  ;;  %v3836_v8 = vrot.slane %v3834_v51, 4 }
 0x219   : > { %v2822_v23 = vpop.permute.xlu0 %2821  ;;  %v3308_v38 = vor.u32 %v3307_v13, %v3304_v60  ;;  %v3837_v60 = vrot.slane %v4632_v44, 5 }
 0x21a   : > { %3032 = vrot.lane.b32.xlu2 %v4546_v42, %s4826_s25  ;;  %2911 = vst.msk [vmem:[#allocation3 + $0x1c] sm:$0xf] %vm2903_vm3, %v2822_v23  ;;  %v3503_v23 = vshll.u32 %v4604_v9, 16  ;;  %v3835_v34 = vsel %vm5401_vm14, %v4666_v50, %v3834_v51  ;;  %v3884_v9 = vsel %vm5401_vm14, %v4673_v46, %v3883_v53 }
 0x21b   : > { %3930 = vrot.lane.b32.xlu1 %v3842_v0, %s4828_s27  ;;  %v4543_v0 = vld [vmem:[#allocation2 + $0x58] sm:$0xf]  ;;  %v3838_v31 = vsel %vm5401_vm14, %v3836_v8, %v3837_v60  ;;  %v4648_v8 = vld [vmem:[#allocation2 + $0xa8] sm:$0xe]  ;;  %v6481_v60 = vld [vmem:[#allocation2 + $0xac] sm:$0xf] }
 0x21c   : > { %v2814_v29 = vpop.permute.xlu2 %2813  ;;  %v6407_v45 = vrot.slane %v3503_v23, 5  ;;  %v4577_v23 = vld [vmem:[#allocation2 + $0x4c] sm:$0xf] }
 0x21d   : > { %2907 = vst.msk [vmem:[#allocation3 + $0xc] sm:$0xf] %vm2903_vm3, %v2814_v29  ;;  %v2812_v37 = vpop.permute.xlu1 %2811  ;;  %v3521_v29 = vshll.u32 %v4606_v62, 16  ;;  %v6448_v62 = vld [vmem:[#allocation2 + $0x58] sm:$0xf]  ;;  %v3291_v40 = vshrl.u32 %v4577_v23, 16 }
 0x21e   : > { %2906 = vst.msk [vmem:[#allocation3 + $0x8] sm:$0xf] %vm2903_vm3, %v2812_v37  ;;  %v3309_v37 = vrot.slane %v3308_v38, 4  ;;  %v3510_v7 = vor.u32 %v3509_v43, %v6407_v45  ;;  %v3287_v43 = vshll.u32 %v4577_v23, 16 }
 0x21f   : > { %3589 = vrot.lane.b32.xlu0 %v3338_v63, %s4827_s26  ;;  %v3313_v63 = vrot.slane %v3311_v48, 5  ;;  %v3523_v54 = vrot.slane %v3521_v29, 5  ;;  %v3827_v29 = vrot.slane %v6448_v62, 5  ;;  %v3293_v46 = vrot.slane %v3291_v40, 4 }
 0x221   : > { %v2828_v1 = vpop.permute.xlu0 %2827 }
 0x222   : > { %3066 = vrot.lane.b32.xlu2 %v4563_v4, %s4826_s25  ;;  %2914 = vst.msk [vmem:[#allocation3 + $0x28] sm:$0xf] %vm2903_vm3, %v2828_v1  ;;  %v3893_v1 = vrot.slane %v4656_v25, 5  ;;  %v4603_v25 = vld [vmem:[#allocation2 + $0xb4] sm:$0xf] }
 0x223   : > { %3964 = vrot.lane.b32.xlu1 %v3901_v33, %s4828_s27  ;;  %v3520_v33 = vrot.slane %v3518_v59, 4 }
 0x224   : > { %v2820_v57 = vpop.permute.xlu2 %2819  ;;  %v3894_v24 = vsel %vm5401_vm14, %v3892_v15, %v3893_v1  ;;  %v4653_v1 = vld [vmem:[#allocation2 + $0xbc] sm:$0x1] }
 0x225   : > { %2910 = vst.msk [vmem:[#allocation3 + $0x18] sm:$0xf] %vm2903_vm3, %v2820_v57  ;;  %v2818_v12 = vpop.permute.xlu1 %2817  ;;  %v3314_v57 = vsel %vm4959_vm11, %v3309_v37, %v3313_v63  ;;  %v3524_v27 = vor.u32 %v3523_v54, %v3520_v33  ;;  %v4542_v33 = vld [vmem:[#allocation2 + $0x54] sm:$0xf]  ;;  %v3494_v54 = vshrl.u32 %v4603_v25, 16 }
 0x226   : > { %2909 = vst.msk [vmem:[#allocation3 + $0x14] sm:$0xf] %vm2903_vm3, %v2818_v12  ;;  %v3513_v12 = vshll.u32 %v4605_v41, 16  ;;  %v3483_v41 = vshrl.u32 %v4601_v56, 16 }
 0x227   : > { %3623 = vrot.lane.b32.xlu0 %v3540_v11, %s4827_s26  ;;  %v4561_v11 = vld [vmem:[#allocation2 + $0xc4] sm:$0xf]  ;;  %v3525_v18 = vrot.slane %v3524_v27, 4  ;;  %v4602_v27 = vld [vmem:[#allocation2 + $0xb0] sm:$0x1] }
 0x229   : > { %v2834_v35 = vpop.permute.xlu0 %2833 }
 0x22a   : > { %3625 = vrot.lane.b32.xlu2 %v3554_v32, %s4827_s26  ;;  %2917 = vst.msk [vmem:[#allocation3 + $0x34] sm:$0xf] %vm2903_vm3, %v2834_v35  ;;  %v3511_v32 = vrot.slane %v3510_v7, 4 }
 0x22b   : > { %3060 = vrot.lane.b32.xlu1 %v4560_v10, %s4826_s25  ;;  %v3515_v10 = vrot.slane %v3513_v12, 5  ;;  %v3485_v12 = vrot.slane %v3483_v41, 4  ;;  %v4598_v41 = vld [vmem:[#allocation2 + $0xa0] sm:$0xf] }
 0x22c   : > { %v2826_v49 = vpop.permute.xlu2 %2825 }
 0x22d   : > { %2913 = vst.msk [vmem:[#allocation3 + $0x24] sm:$0xf] %vm2903_vm3, %v2826_v49  ;;  %v2824_v30 = vpop.permute.xlu1 %2823  ;;  %v3516_v35 = vsel %vm4959_vm11, %v3511_v32, %v3515_v10  ;;  %v3530_v49 = vsel %vm4959_vm11, %v3525_v18, %v6353_v22  ;;  %v3885_v10 = vrot.slane %v3883_v53, 4 }
 0x22e   : > { %2912 = vst.msk [vmem:[#allocation3 + $0x20] sm:$0xf] %vm2903_vm3, %v2824_v30  ;;  %v3318_v30 = vor.u32 %v3317_v16, %v3313_v63 }
 0x22f   : > { %3958 = vrot.lane.b32.xlu0 %v3891_v5, %s4828_s27  ;;  %v3321_v5 = vshll.u32 %v4581_v26, 16 }
 0x230   : > { %v3319_v13 = vrot.slane %v3318_v30, 4 }
 0x231   : > { %v2840_v47 = vpop.permute.xlu0 %2839 }
 0x232   : > { %3932 = vrot.lane.b32.xlu2 %v3845_v55, %s4828_s27  ;;  %2920 = vst.msk [vmem:[#allocation3 + $0x40] sm:$0xf] %vm2903_vm3, %v2840_v47  ;;  %v3323_v47 = vrot.slane %v3321_v5, 5 }
 0x233   : > { %3591 = vrot.lane.b32.xlu1 %v3348_v20, %s4827_s26  ;;  %v4576_v20 = vld [vmem:[#allocation2 + $0x48] sm:$0xf] }
 0x234   : > { %v2832_v42 = vpop.permute.xlu2 %2831  ;;  %v3281_v50 = vshll.u32 %v4576_v20, 16  ;;  %v3324_v51 = vsel %vm4959_vm11, %v3319_v13, %v3323_v47  ;;  %v4556_v13 = vld [vmem:[#allocation2 + $0xa8] sm:$0xf]  ;;  %v4629_v47 = vld [vmem:[#allocation2 + $0x5c] sm:$0x1] }
 0x235   : > { %2916 = vst.msk [vmem:[#allocation3 + $0x30] sm:$0xf] %vm2903_vm3, %v2832_v42  ;;  %v2830_v21 = vpop.permute.xlu1 %2829  ;;  %v3278_v42 = vshrl.u32 %v4576_v20, 16  ;;  %v4578_v20 = vld [vmem:[#allocation2 + $0x50] sm:$0x1] }
 0x236   : > { %2915 = vst.msk [vmem:[#allocation3 + $0x2c] sm:$0xf] %vm2903_vm3, %v2830_v21  ;;  %v3283_v38 = vrot.slane %v3281_v50, 5  ;;  %v3876_v50 = vrot.slane %v6481_v60, 5 }
 0x237   : > { %3026 = vrot.lane.b32.xlu0 %v4543_v0, %s4826_s25  ;;  %v4627_v0 = vld [vmem:[#allocation2 + $0x54] sm:$0xe]  ;;  %v3280_v21 = vrot.slane %v3278_v42, 4  ;;  %v4672_v42 = vrot.slane %v4648_v8, 9 }
 0x238   : > { %v4665_v59 = vrot.slane %v4627_v0, 9  ;;  %v3829_v0 = vrot.slane %v3827_v29, 4 }
 0x239   : > { %v2846_v4 = vpop.permute.xlu0 %2845  ;;  %v3284_v63 = vor.u32 %v3283_v38, %v3280_v21  ;;  %v3830_v21 = vrot.slane %v4629_v47, 5 }
 0x23a   : > { %3028 = vrot.lane.b32.xlu2 %v4544_v3, %s4826_s25  ;;  %2923 = vst.msk [vmem:[#allocation3 + $0x4c] sm:$0xf] %vm2903_vm3, %v2846_v4  ;;  %v3479_v4 = vshll.u32 %v4601_v56, 16  ;;  %v3828_v15 = vsel %vm5401_vm14, %v4665_v59, %v3827_v29  ;;  %v3877_v56 = vsel %vm5401_vm14, %v4672_v42, %v3876_v50 }
 0x23b   : > { %3926 = vrot.lane.b32.xlu1 %v3835_v34, %s4828_s27  ;;  %v4541_v34 = vld [vmem:[#allocation2 + $0x4c] sm:$0xf]  ;;  %v3831_v62 = vsel %vm5401_vm14, %v3829_v0, %v3830_v21  ;;  %v4645_v0 = vld [vmem:[#allocation2 + $0x9c] sm:$0xe]  ;;  %v6534_v21 = vld [vmem:[#allocation2 + $0xa0] sm:$0xf] }
 0x23c   : > { %v2838_v52 = vpop.permute.xlu2 %2837  ;;  %v6461_v7 = vrot.slane %v3479_v4, 5  ;;  %v4574_v4 = vld [vmem:[#allocation2 + $0x40] sm:$0xf] }
 0x23d   : > { %2919 = vst.msk [vmem:[#allocation3 + $0x3c] sm:$0xf] %vm2903_vm3, %v2838_v52  ;;  %v2836_v58 = vpop.permute.xlu1 %2835  ;;  %v3497_v52 = vshll.u32 %v4603_v25, 16  ;;  %v6502_v25 = vld [vmem:[#allocation2 + $0x4c] sm:$0xf]  ;;  %v3267_v60 = vshrl.u32 %v4574_v4, 16 }
 0x23e   : > { %2918 = vst.msk [vmem:[#allocation3 + $0x38] sm:$0xf] %vm2903_vm3, %v2836_v58  ;;  %v3285_v58 = vrot.slane %v3284_v63, 4  ;;  %v3486_v16 = vor.u32 %v3485_v12, %v6461_v7  ;;  %v3263_v12 = vshll.u32 %v4574_v4, 16 }
 0x23f   : > { %3585 = vrot.lane.b32.xlu0 %v3314_v57, %s4827_s26  ;;  %v3289_v57 = vrot.slane %v3287_v43, 5  ;;  %v3499_v17 = vrot.slane %v3497_v52, 5  ;;  %v3820_v52 = vrot.slane %v6502_v25, 5  ;;  %v3269_v42 = vrot.slane %v3267_v60, 4  ;;  %v4596_v60 = vld [vmem:[#allocation2 + $0x98] sm:$0x1] }
 0x241   : > { %v2852_v2 = vpop.permute.xlu0 %2851 }
 0x242   : > { %3062 = vrot.lane.b32.xlu2 %v4561_v11, %s4826_s25  ;;  %2926 = vst.msk [vmem:[#allocation3 + $0x58] sm:$0xf] %vm2903_vm3, %v2852_v2  ;;  %v3886_v2 = vrot.slane %v4653_v1, 5  ;;  %v4600_v1 = vld [vmem:[#allocation2 + $0xa8] sm:$0xf] }
 0x243   : > { %3960 = vrot.lane.b32.xlu1 %v3894_v24, %s4828_s27  ;;  %v3496_v24 = vrot.slane %v3494_v54, 4 }
 0x244   : > { %v2844_v19 = vpop.permute.xlu2 %2843  ;;  %v3887_v6 = vsel %vm5401_vm14, %v3885_v10, %v3886_v2  ;;  %v4650_v2 = vld [vmem:[#allocation2 + $0xb0] sm:$0x1] }
 0x245   : > { %2922 = vst.msk [vmem:[#allocation3 + $0x48] sm:$0xf] %vm2903_vm3, %v2844_v19  ;;  %v2842_v28 = vpop.permute.xlu1 %2841  ;;  %v3290_v19 = vsel %vm4959_vm11, %v3285_v58, %v3289_v57  ;;  %v3500_v26 = vor.u32 %v3499_v17, %v3496_v24  ;;  %v4540_v24 = vld [vmem:[#allocation2 + $0x48] sm:$0xf]  ;;  %v3470_v17 = vshrl.u32 %v4600_v1, 16 }
 0x246   : > { %2921 = vst.msk [vmem:[#allocation3 + $0x44] sm:$0xf] %vm2903_vm3, %v2842_v28  ;;  %v3489_v28 = vshll.u32 %v4602_v27, 16  ;;  %v3459_v27 = vshrl.u32 %v4598_v41, 16 }
 0x247   : > { %3619 = vrot.lane.b32.xlu0 %v3516_v35, %s4827_s26  ;;  %v4559_v35 = vld [vmem:[#allocation2 + $0xb8] sm:$0xf]  ;;  %v3501_v30 = vrot.slane %v3500_v26, 4  ;;  %v4599_v26 = vld [vmem:[#allocation2 + $0xa4] sm:$0x1] }
 0x249   : > { %v2858_v55 = vpop.permute.xlu0 %2857 }
 0x24a   : > { %3621 = vrot.lane.b32.xlu2 %v3530_v49, %s4827_s26  ;;  %2929 = vst.msk [vmem:[#allocation3 + $0x64] sm:$0xf] %vm2903_vm3, %v2858_v55  ;;  %v3487_v49 = vrot.slane %v3486_v16, 4 }
 0x24b   : > { %3056 = vrot.lane.b32.xlu1 %v4558_v61, %s4826_s25  ;;  %v3491_v61 = vrot.slane %v3489_v28, 5  ;;  %v3461_v28 = vrot.slane %v3459_v27, 4  ;;  %v4595_v27 = vld [vmem:[#allocation2 + $0x94] sm:$0xf] }
 0x24c   : > { %v2850_v22 = vpop.permute.xlu2 %2849 }
 0x24d   : > { %2925 = vst.msk [vmem:[#allocation3 + $0x54] sm:$0xf] %vm2903_vm3, %v2850_v22  ;;  %v2848_v39 = vpop.permute.xlu1 %2847  ;;  %v3492_v55 = vsel %vm4959_vm11, %v3487_v49, %v3491_v61  ;;  %v3506_v22 = vsel %vm4959_vm11, %v3501_v30, %v6407_v45  ;;  %v3878_v61 = vrot.slane %v3876_v50, 4 }
 0x24e   : > { %2924 = vst.msk [vmem:[#allocation3 + $0x50] sm:$0xf] %vm2903_vm3, %v2848_v39  ;;  %v3294_v39 = vor.u32 %v3293_v46, %v3289_v57 }
 0x24f   : > { %3954 = vrot.lane.b32.xlu0 %v3884_v9, %s4828_s27  ;;  %v3297_v9 = vshll.u32 %v4578_v20, 16 }
 0x250   : > { %v3295_v38 = vrot.slane %v3294_v39, 4 }
 0x251   : > { %v2864_v48 = vpop.permute.xlu0 %2863 }
 0x252   : > { %3928 = vrot.lane.b32.xlu2 %v3838_v31, %s4828_s27  ;;  %2932 = vst.msk [vmem:[#allocation3 + $0x70] sm:$0xf] %vm2903_vm3, %v2864_v48  ;;  %v3299_v48 = vrot.slane %v3297_v9, 5 }
 0x253   : > { %3587 = vrot.lane.b32.xlu1 %v3324_v51, %s4827_s26  ;;  %v4573_v51 = vld [vmem:[#allocation2 + $0x3c] sm:$0xf] }
 0x254   : > { %v2856_v3 = vpop.permute.xlu2 %2855  ;;  %v3257_v59 = vshll.u32 %v4573_v51, 16  ;;  %v3300_v29 = vsel %vm4959_vm11, %v3295_v38, %v3299_v48  ;;  %v4554_v38 = vld [vmem:[#allocation2 + $0x9c] sm:$0xf]  ;;  %v4626_v48 = vld [vmem:[#allocation2 + $0x50] sm:$0x1] }
 0x255   : > { %2928 = vst.msk [vmem:[#allocation3 + $0x60] sm:$0xf] %vm2903_vm3, %v2856_v3  ;;  %v2854_v37 = vpop.permute.xlu1 %2853  ;;  %v3254_v3 = vshrl.u32 %v4573_v51, 16  ;;  %v4575_v51 = vld [vmem:[#allocation2 + $0x44] sm:$0x1] }
 0x256   : > { %2927 = vst.msk [vmem:[#allocation3 + $0x5c] sm:$0xf] %vm2903_vm3, %v2854_v37  ;;  %v3259_v63 = vrot.slane %v3257_v59, 5  ;;  %v3869_v59 = vrot.slane %v6534_v21, 5  ;;  %v4555_v21 = vld [vmem:[#allocation2 + $0xa0] sm:$0xf] }
 0x257   : > { %3022 = vrot.lane.b32.xlu0 %v4541_v34, %s4826_s25  ;;  %v4624_v34 = vld [vmem:[#allocation2 + $0x48] sm:$0xe]  ;;  %v3256_v37 = vrot.slane %v3254_v3, 4  ;;  %v4671_v3 = vrot.slane %v4645_v0, 9  ;;  %v3441_v0 = vshll.u32 %v4596_v60, 16 }
 0x259   : > { %v2870_v11 = vpop.permute.xlu0 %2869  ;;  %v3260_v57 = vor.u32 %v3259_v63, %v3256_v37 }
 0x25a   : > { %3024 = vrot.lane.b32.xlu2 %v4542_v33, %s4826_s25  ;;  %2935 = vst.msk [vmem:[#allocation3 + $0x7c] sm:$0xf] %vm2903_vm3, %v2870_v11  ;;  %v4664_v33 = vrot.slane %v4624_v34, 9  ;;  %v3455_v11 = vshll.u32 %v4598_v41, 16  ;;  %v3823_v34 = vrot.slane %v4626_v48, 5  ;;  %v3870_v41 = vsel %vm5401_vm14, %v4671_v3, %v3869_v59 }
 0x25b   : > { %3922 = vrot.lane.b32.xlu1 %v3828_v15, %s4828_s27  ;;  %v4539_v15 = vld [vmem:[#allocation2 + $0x40] sm:$0xf]  ;;  %v3443_v3 = vrot.slane %v3441_v0, 5 }
 0x25c   : > { %v2862_v32 = vpop.permute.xlu2 %2861  ;;  %v3821_v10 = vsel %vm5401_vm14, %v4664_v33, %v3820_v52  ;;  %v6515_v16 = vrot.slane %v3455_v11, 5  ;;  %v4571_v11 = vld [vmem:[#allocation2 + $0x34] sm:$0xf] }
 0x25d   : > { %2931 = vst.msk [vmem:[#allocation3 + $0x6c] sm:$0xf] %vm2903_vm3, %v2862_v32  ;;  %v2860_v18 = vpop.permute.xlu1 %2859  ;;  %v3473_v32 = vshll.u32 %v4600_v1, 16  ;;  %v6556_v1 = vld [vmem:[#allocation2 + $0x40] sm:$0xf] }
 0x25e   : > { %2930 = vst.msk [vmem:[#allocation3 + $0x68] sm:$0xf] %vm2903_vm3, %v2860_v18  ;;  %v3261_v18 = vrot.slane %v3260_v57, 4  ;;  %v3462_v46 = vor.u32 %v3461_v28, %v6515_v16 }
 0x25f   : > { %3581 = vrot.lane.b32.xlu0 %v3290_v19, %s4827_s26  ;;  %v3265_v19 = vrot.slane %v3263_v12, 5  ;;  %v3475_v40 = vrot.slane %v3473_v32, 5  ;;  %v3813_v32 = vrot.slane %v6556_v1, 5 }
 0x261   : > { %v3009_v44 = vpop.permute.xlu0 %3008 }
 0x262   : > { %3058 = vrot.lane.b32.xlu2 %v4559_v35, %s4826_s25  ;;  %3103 = vst.msk [vmem:[#allocation3 + $0x8] sm:$0xf] %vm3100_vm5, %v3009_v44  ;;  %v3879_v44 = vrot.slane %v4650_v2, 5  ;;  %v4597_v2 = vld [vmem:[#allocation2 + $0x9c] sm:$0xf] }
 0x263   : > { %3956 = vrot.lane.b32.xlu1 %v3887_v6, %s4828_s27  ;;  %v3472_v6 = vrot.slane %v3470_v17, 4 }
 0x264   : > { %v2868_v5 = vpop.permute.xlu2 %2867  ;;  %v3880_v8 = vsel %vm5401_vm14, %v3878_v61, %v3879_v44  ;;  %v3446_v61 = vshrl.u32 %v4597_v2, 16  ;;  %v3449_v44 = vshll.u32 %v4597_v2, 16 }
 0x265   : > { %2934 = vst.msk [vmem:[#allocation3 + $0x78] sm:$0xf] %vm2903_vm3, %v2868_v5  ;;  %v2866_v53 = vpop.permute.xlu1 %2865  ;;  %v3266_v5 = vsel %vm4959_vm11, %v3261_v18, %v3265_v19  ;;  %v3476_v20 = vor.u32 %v3475_v40, %v3472_v6  ;;  %v3435_v6 = vshrl.u32 %v4595_v27, 16  ;;  %v4538_v40 = vld [vmem:[#allocation2 + $0x3c] sm:$0xf] }
 0x266   : > { %2933 = vst.msk [vmem:[#allocation3 + $0x74] sm:$0xf] %vm2903_vm3, %v2866_v53  ;;  %v3465_v53 = vshll.u32 %v4599_v26, 16  ;;  %v3431_v26 = vshll.u32 %v4595_v27, 16 }
 0x267   : > { %3615 = vrot.lane.b32.xlu0 %v3492_v55, %s4827_s26  ;;  %v4557_v55 = vld [vmem:[#allocation2 + $0xac] sm:$0xf]  ;;  %v3477_v39 = vrot.slane %v3476_v20, 4  ;;  %v3437_v20 = vrot.slane %v3435_v6, 4 }
 0x269   : > { %v3035_v31 = vpop.permute.xlu0 %3034 }
 0x26a   : > { %3617 = vrot.lane.b32.xlu2 %v3506_v22, %s4827_s26  ;;  %3116 = vst.msk [vmem:[#allocation3 + $0x3c] sm:$0xf] %vm3100_vm5, %v3035_v31  ;;  %v3463_v22 = vrot.slane %v3462_v46, 4 }
 0x26b   : > { %3052 = vrot.lane.b32.xlu1 %v4556_v13, %s4826_s25  ;;  %v3467_v13 = vrot.slane %v3465_v53, 5 }
 0x26c   : > { %v3007_v45 = vpop.permute.xlu2 %3006 }
 0x26d   : > { %3102 = vst.msk [vmem:[#allocation3 + $0x4] sm:$0xf] %vm3100_vm5, %v3007_v45  ;;  %v3005_v23 = vpop.permute.xlu1 %3004  ;;  %v3468_v31 = vsel %vm4959_vm11, %v3463_v22, %v3467_v13  ;;  %v3482_v45 = vsel %vm4959_vm11, %v3477_v39, %v6461_v7  ;;  %v3822_v7 = vrot.slane %v3820_v52, 4  ;;  %v3448_v22 = vrot.slane %v3446_v61, 4 }
 0x26e   : > { %3101 = vst.msk [vmem:[#allocation3] sm:$0xf] %vm3100_vm5, %v3005_v23  ;;  %v3270_v23 = vor.u32 %v3269_v42, %v3265_v19  ;;  %v3451_v13 = vrot.slane %v3449_v44, 5  ;;  %v3871_v39 = vrot.slane %v3869_v59, 4 }
 0x26f   : > { %3950 = vrot.lane.b32.xlu0 %v3877_v56, %s4828_s27  ;;  %v3273_v56 = vshll.u32 %v4575_v51, 16  ;;  %v3824_v25 = vsel %vm5401_vm14, %v3822_v7, %v3823_v34 }
 0x270   : > { %v3271_v63 = vrot.slane %v3270_v23, 4  ;;  %v3243_v23 = vshrl.u32 %v4571_v11, 16 }
 0x271   : > { %v3594_v43 = vpop.permute.xlu0 %3593 }
 0x272   : > { %3924 = vrot.lane.b32.xlu2 %v3831_v62, %s4828_s27  ;;  %v3245_v7 = vrot.slane %v3243_v23, 4 }
 0x273   : > { %3583 = vrot.lane.b32.xlu1 %v3300_v29, %s4827_s26  ;;  %v4570_v29 = vld [vmem:[#allocation2 + $0x30] sm:$0xf] }
 0x274   : > { %v3033_v54 = vpop.permute.xlu2 %3032  ;;  %v3230_v33 = vshrl.u32 %v4570_v29, 16 }
 0x275   : > { %3115 = vst.msk [vmem:[#allocation3 + $0x38] sm:$0xf] %vm3100_vm5, %v3033_v54  ;;  %v3011_v58 = vpop.permute.xlu1 %3010  ;;  %v3233_v54 = vshll.u32 %v4570_v29, 16 }
 0x276   : > { %3104 = vst.msk [vmem:[#allocation3 + $0xc] sm:$0xf] %vm3100_vm5, %v3011_v58  ;;  %v3232_v58 = vrot.slane %v3230_v33, 4  ;;  %v4552_v33 = vld [vmem:[#allocation2 + $0x90] sm:$0xf] }
 0x277   : > { %3676 = vst.msk [vmem:[#allocation3 + $0x38] sm:$0xf] %vm3661_vm6, %v3594_v43  ;;  %3018 = vrot.lane.b32.xlu0 %v4539_v15, %s4826_s25  ;;  %v3275_v43 = vrot.slane %v3273_v56, 5  ;;  %v4621_v15 = vld [vmem:[#allocation2 + $0x3c] sm:$0xe]  ;;  %v3235_v57 = vrot.slane %v3233_v54, 5 }
 0x278   : > { %v4663_v17 = vrot.slane %v4621_v15, 9  ;;  %v4623_v54 = vld [vmem:[#allocation2 + $0x44] sm:$0x1] }
 0x279   : > { %v3628_v35 = vpop.permute.xlu0 %3627  ;;  %v3276_v52 = vsel %vm4959_vm11, %v3271_v63, %v3275_v43  ;;  %v3236_v28 = vor.u32 %v3235_v57, %v3232_v58  ;;  %v4572_v63 = vld [vmem:[#allocation2 + $0x38] sm:$0x1]  ;;  %v4642_v43 = vld [vmem:[#allocation2 + $0x90] sm:$0xe] }
 0x27a   : > { %3020 = vrot.lane.b32.xlu2 %v4540_v24, %s4826_s25  ;;  %v4670_v15 = vrot.slane %v4642_v43, 9 }
 0x27b   : > { %3918 = vrot.lane.b32.xlu1 %v3821_v10, %s4828_s27  ;;  %v4537_v10 = vld [vmem:[#allocation2 + $0x34] sm:$0xf]  ;;  %v3237_v46 = vrot.slane %v3236_v28, 4  ;;  %v4618_v28 = vld [vmem:[#allocation2 + $0x30] sm:$0xe] }
 0x27c   : > { %v3067_v49 = vpop.permute.xlu2 %3066  ;;  %v4662_v44 = vrot.slane %v4618_v28, 9 }
 0x27d   : > { %3132 = vst.msk [vmem:[#allocation3 + $0x7c] sm:$0xf] %vm3100_vm5, %v3067_v49  ;;  %v3065_v30 = vpop.permute.xlu1 %3064 }
 0x27e   : > { %3131 = vst.msk [vmem:[#allocation3 + $0x78] sm:$0xf] %vm3100_vm5, %v3065_v30  ;;  %v3814_v30 = vsel %vm5401_vm14, %v4663_v17, %v3813_v32 }
 0x27f   : > { %3693 = vst.msk [vmem:[#allocation3 + $0x7c] sm:$0xf] %vm3661_vm6, %v3628_v35  ;;  %3577 = vrot.lane.b32.xlu0 %v3266_v5, %s4827_s26  ;;  %v3239_v35 = vshll.u32 %v4571_v11, 16  ;;  %v4647_v5 = vld [vmem:[#allocation2 + $0xa4] sm:$0x1]  ;;  %v3816_v11 = vrot.slane %v4623_v54, 5 }
 0x281   : > { %v3963_v47 = vpop.permute.xlu0 %3962  ;;  %v3241_v53 = vrot.slane %v3239_v35, 5  ;;  %v6612_v35 = vld [vmem:[#allocation2 + $0x34] sm:$0xf] }
 0x282   : > { %3054 = vrot.lane.b32.xlu2 %v4557_v55, %s4826_s25  ;;  %v6570_v55 = vrot.slane %v3431_v26, 5 }
 0x283   : > { %3952 = vrot.lane.b32.xlu1 %v3880_v8, %s4828_s27 }
 0x284   : > { %v3626_v9 = vpop.permute.xlu2 %3625  ;;  %v3438_v51 = vor.u32 %v3437_v20, %v6570_v55 }
 0x285   : > { %3692 = vst.msk [vmem:[#allocation3 + $0x78] sm:$0xf] %vm3661_vm6, %v3626_v9  ;;  %v3596_v50 = vpop.permute.xlu1 %3595  ;;  %v3872_v9 = vrot.slane %v4647_v5, 5  ;;  %v4551_v5 = vld [vmem:[#allocation2 + $0x88] sm:$0xf] }
 0x286   : > { %3677 = vst.msk [vmem:[#allocation3 + $0x3c] sm:$0xf] %vm3661_vm6, %v3596_v50  ;;  %v3439_v56 = vrot.slane %v3438_v51, 4  ;;  %v4644_v51 = vld [vmem:[#allocation2 + $0x98] sm:$0x1] }
 0x287   : > { %4029 = vst.msk [vmem:[#allocation3 + $0x78] sm:$0xf] %vm3998_vm7, %v3963_v47  ;;  %3611 = vrot.lane.b32.xlu0 %v3468_v31, %s4827_s26  ;;  %v3242_v31 = vsel %vm4959_vm11, %v3237_v46, %v3241_v53  ;;  %v3873_v48 = vsel %vm5401_vm14, %v3871_v39, %v3872_v9  ;;  %v4594_v46 = vld [vmem:[#allocation2 + $0x90] sm:$0xf] }
 0x288   : > { %v3422_v39 = vshrl.u32 %v4594_v46, 16  ;;  %v3425_v9 = vshll.u32 %v4594_v46, 16 }
 0x289   : > { %v3031_v62 = vpop.permute.xlu0 %3030 }
 0x28a   : > { %3613 = vrot.lane.b32.xlu2 %v3482_v45, %s4827_s26  ;;  %3114 = vst.msk [vmem:[#allocation3 + $0x34] sm:$0xf] %vm3100_vm5, %v3031_v62  ;;  %v3427_v23 = vrot.slane %v3425_v9, 5 }
 0x28b   : > { %3048 = vrot.lane.b32.xlu1 %v4554_v38, %s4826_s25  ;;  %v3452_v38 = vor.u32 %v3451_v13, %v3448_v22  ;;  %v4567_v22 = vld [vmem:[#allocation2 + $0x24] sm:$0xf]  ;;  %v4536_v13 = vld [vmem:[#allocation2 + $0x30] sm:$0xf] }
 0x28c   : > { %v3933_v37 = vpop.permute.xlu2 %3932 }
 0x28d   : > { %4014 = vst.msk [vmem:[#allocation3 + $0x3c] sm:$0xf] %vm3998_vm7, %v3933_v37  ;;  %v3931_v4 = vpop.permute.xlu1 %3930  ;;  %v3453_v62 = vrot.slane %v3452_v38, 4  ;;  %v3444_v37 = vsel %vm4959_vm11, %v3439_v56, %v3443_v3  ;;  %v6632_v38 = vld [vmem:[#allocation2 + $0x28] sm:$0xf] }
 0x28e   : > { %4013 = vst.msk [vmem:[#allocation3 + $0x38] sm:$0xf] %vm3998_vm7, %v3931_v4  ;;  %v6590_v4 = vld [vmem:[#allocation2 + $0x94] sm:$0xf]  ;;  %v3799_v43 = vrot.slane %v6632_v38, 5 }
 0x28f   : > { %3946 = vrot.lane.b32.xlu0 %v3870_v41, %s4828_s27  ;;  %v3458_v41 = vsel %vm4959_vm11, %v3453_v62, %v6515_v16  ;;  %v3862_v58 = vrot.slane %v6590_v4, 5  ;;  %v3815_v16 = vrot.slane %v3813_v32, 4  ;;  %v4617_v4 = vld [vmem:[#allocation2 + $0x2c] sm:$0x1] }
 0x291   : > { %v3590_v12 = vpop.permute.xlu0 %3589  ;;  %v3863_v2 = vsel %vm5401_vm14, %v4670_v15, %v3862_v58  ;;  %v3817_v1 = vsel %vm5401_vm14, %v3815_v16, %v3816_v11  ;;  %v3864_v3 = vrot.slane %v3862_v58, 4  ;;  %v4565_v11 = vld [vmem:[#allocation2 + $0x1c] sm:$0xf] }
 0x292   : > { %3920 = vrot.lane.b32.xlu2 %v3824_v25, %s4828_s27  ;;  %v3246_v25 = vor.u32 %v3245_v7, %v3241_v53  ;;  %v3195_v28 = vshrl.u32 %v4565_v11, 16 }
 0x293   : > { %3579 = vrot.lane.b32.xlu1 %v3276_v52, %s4827_s26  ;;  %v3249_v52 = vshll.u32 %v4572_v63, 16  ;;  %v6639_v63 = vld [vmem:[#allocation2 + $0x28] sm:$0xf] }
 0x294   : > { %v3029_v24 = vpop.permute.xlu2 %3028  ;;  %v3215_v58 = vshll.u32 %v6639_v63, 16 }
 0x295   : > { %3113 = vst.msk [vmem:[#allocation3 + $0x30] sm:$0xf] %vm3100_vm5, %v3029_v24  ;;  %v3965_v18 = vpop.permute.xlu1 %3964  ;;  %v4753_v19 = vld [vmem:[#allocation3 + $0x38] sm:$0xff]  ;;  %v3247_v24 = vrot.slane %v3246_v25, 4  ;;  %v3251_v17 = vrot.slane %v3249_v52, 5 }
 0x296   : > { %4030 = vst.msk [vmem:[#allocation3 + $0x7c] sm:$0xf] %vm3998_vm7, %v3965_v18  ;;  %v4170_v49 = vsel %vm4144_vm8, %v4753_v19, 0 }
 0x297   : > { %3674 = vst.msk [vmem:[#allocation3 + $0x30] sm:$0xf] %vm3661_vm6, %v3590_v12  ;;  %4196 = vmatpush.bf16.xpose.msra.mxu0 %v4170_v49  ;;  %3014 = vrot.lane.b32.xlu0 %v4537_v10, %s4826_s25  ;;  %v4591_v12 = vld [vmem:[#allocation2 + $0x84] sm:$0xf]  ;;  %v3252_v32 = vsel %vm4959_vm11, %v3247_v24, %v3251_v17  ;;  %v6615_v49 = vld [vmem:[#allocation2 + $0x88] sm:$0xf] }
 0x298   : > { %v3398_v18 = vshrl.u32 %v4591_v12, 16  ;;  %v3401_v19 = vshll.u32 %v4591_v12, 16  ;;  %v3407_v60 = vshll.u32 %v6615_v49, 16  ;;  %v3411_v52 = vshrl.u32 %v6615_v49, 16 }
 0x299   : > { %v3624_v8 = vpop.permute.xlu0 %3623  ;;  %v3802_v12 = vrot.slane %v4617_v4, 5 }
 0x29a   : > { %3016 = vrot.lane.b32.xlu2 %v4538_v40, %s4826_s25  ;;  %v3400_v26 = vrot.slane %v3398_v18, 4  ;;  %v3403_v6 = vrot.slane %v3401_v19, 5 }
 0x29b   : > { %3914 = vrot.lane.b32.xlu1 %v3814_v30, %s4828_s27  ;;  %v3806_v30 = vrot.slane %v6612_v35, 5 }
 0x29c   : > { %v3063_v47 = vpop.permute.xlu2 %3062 }
 0x29d   : > { %3130 = vst.msk [vmem:[#allocation3 + $0x74] sm:$0xf] %vm3100_vm5, %v3063_v47  ;;  %v3061_v42 = vpop.permute.xlu1 %3060  ;;  %v4761_v50 = vld [vmem:[#allocation3 + $0x78] sm:$0xff] }
 0x29e   : > { %3129 = vst.msk [vmem:[#allocation3 + $0x70] sm:$0xf] %vm3100_vm5, %v3061_v42  ;;  %v4194_v45 = vsel %vm4144_vm8, %v4761_v50, 0  ;;  %v3807_v42 = vsel %vm5401_vm14, %v4662_v44, %v3806_v30  ;;  %v3206_v50 = vshrl.u32 %v4567_v22, 16 }
 0x29f   : > { %3691 = vst.msk [vmem:[#allocation3 + $0x74] sm:$0xf] %vm3661_vm6, %v3624_v8  ;;  %4209 = vmatpush.bf16.xpose.msra.mxu1 %v4194_v45  ;;  %3573 = vrot.lane.b32.xlu0 %v3242_v31, %s4827_s26  ;;  %v3404_v8 = vor.u32 %v3403_v6, %v3400_v26  ;;  %v3209_v31 = vshll.u32 %v4567_v22, 16 }
 0x2a0   : > { %v3208_v62 = vrot.slane %v3206_v50, 4  ;;  %v4639_v50 = vld [vmem:[#allocation2 + $0x84] sm:$0xe] }
 0x2a1   : > { %v3959_v59 = vpop.permute.xlu0 %3958  ;;  %v3405_v0 = vrot.slane %v3404_v8, 4 }
 0x2a2   : > { %3050 = vrot.lane.b32.xlu2 %v4555_v21, %s4826_s25  ;;  %v6629_v21 = vrot.slane %v3407_v60, 5 }
 0x2a3   : > { %3948 = vrot.lane.b32.xlu1 %v3873_v48, %s4828_s27  ;;  %v3424_v48 = vrot.slane %v3422_v39, 4 }
 0x2a4   : > { %v3622_v29 = vpop.permute.xlu2 %3621 }
 0x2a5   : > { %3690 = vst.msk [vmem:[#allocation3 + $0x70] sm:$0xf] %vm3661_vm6, %v3622_v29  ;;  %v3592_v34 = vpop.permute.xlu1 %3591  ;;  %v3211_v29 = vrot.slane %v3209_v31, 5  ;;  %v3428_v54 = vor.u32 %v3427_v23, %v3424_v48  ;;  %v6685_v31 = vld [vmem:[#allocation2 + $0x88] sm:$0xf]  ;;  %v4669_v23 = vrot.slane %v4639_v50, 9 }
 0x2a6   : > { %3675 = vst.msk [vmem:[#allocation3 + $0x34] sm:$0xf] %vm3661_vm6, %v3592_v34  ;;  %v4614_v50 = vld [vmem:[#allocation2 + $0x20] sm:$0x1] }
 0x2a7   : > { %4027 = vst.msk [vmem:[#allocation3 + $0x70] sm:$0xf] %vm3998_vm7, %v3959_v59  ;;  %3607 = vrot.lane.b32.xlu0 %v3444_v37, %s4827_s26  ;;  %v3865_v59 = vrot.slane %v4644_v51, 5  ;;  %v3410_v37 = vsel %vm4959_vm11, %v3405_v0, %v6629_v21  ;;  %v3212_v15 = vor.u32 %v3211_v29, %v3208_v62 }
 0x2a9   : > { %v3027_v57 = vpop.permute.xlu0 %3026  ;;  %v3866_v25 = vsel %vm5401_vm14, %v3864_v3, %v3865_v59  ;;  %v3213_v17 = vrot.slane %v3212_v15, 4  ;;  %v4569_v3 = vld [vmem:[#allocation2 + $0x2c] sm:$0x1] }
 0x2aa   : > { %3609 = vrot.lane.b32.xlu2 %v3458_v41, %s4827_s26  ;;  %3112 = vst.msk [vmem:[#allocation3 + $0x2c] sm:$0xf] %vm3100_vm5, %v3027_v57  ;;  %v4553_v41 = vld [vmem:[#allocation2 + $0x94] sm:$0xf]  ;;  %v3801_v57 = vrot.slane %v3799_v43, 4 }
 0x2ab   : > { %3044 = vrot.lane.b32.xlu1 %v4552_v33, %s4826_s25 }
 0x2ac   : > { %v3929_v27 = vpop.permute.xlu2 %3928  ;;  %v3803_v19 = vsel %vm5401_vm14, %v3801_v57, %v3802_v12  ;;  %v6706_v12 = vld [vmem:[#allocation2 + $0x7c] sm:$0xf] }
 0x2ad   : > { %4012 = vst.msk [vmem:[#allocation3 + $0x34] sm:$0xf] %vm3998_vm7, %v3929_v27  ;;  %v3927_v10 = vpop.permute.xlu1 %3926  ;;  %v3429_v27 = vrot.slane %v3428_v54, 4 }
 0x2ae   : > { %4011 = vst.msk [vmem:[#allocation3 + $0x30] sm:$0xf] %vm3998_vm7, %v3927_v10  ;;  %v6654_v10 = vrot.slane %v3215_v58, 5 }
 0x2af   : > { %3942 = vrot.lane.b32.xlu0 %v3863_v2, %s4828_s27  ;;  %v3413_v2 = vrot.slane %v3411_v52, 4  ;;  %v3434_v26 = vsel %vm4959_vm11, %v3429_v27, %v6570_v55  ;;  %v3808_v55 = vrot.slane %v3806_v30, 4 }
 0x2b0   : > { %v3218_v6 = vsel %vm4959_vm11, %v3213_v17, %v6654_v10 }
 0x2b1   : > { %v3586_v40 = vpop.permute.xlu0 %3585  ;;  %v3414_v49 = vor.u32 %v3413_v2, %v6629_v21 }
 0x2b2   : > { %3916 = vrot.lane.b32.xlu2 %v3817_v1, %s4828_s27  ;;  %v4593_v1 = vld [vmem:[#allocation2 + $0x8c] sm:$0x1] }
 0x2b3   : > { %3575 = vrot.lane.b32.xlu1 %v3252_v32, %s4827_s26  ;;  %v3191_v32 = vshll.u32 %v4565_v11, 16  ;;  %v3415_v60 = vrot.slane %v3414_v49, 4 }
 0x2b4   : > { %v3025_v61 = vpop.permute.xlu2 %3024 }
 0x2b5   : > { %3111 = vst.msk [vmem:[#allocation3 + $0x28] sm:$0xf] %vm3100_vm5, %v3025_v61  ;;  %v3961_v53 = vpop.permute.xlu1 %3960  ;;  %v4752_v20 = vld [vmem:[#allocation3 + $0x30] sm:$0xff]  ;;  %v3417_v61 = vshll.u32 %v4593_v1, 16  ;;  %v6669_v44 = vrot.slane %v3191_v32, 5  ;;  %v3848_v1 = vrot.slane %v6706_v12, 5 }
 0x2b6   : > { %4028 = vst.msk [vmem:[#allocation3 + $0x74] sm:$0xf] %vm3998_vm7, %v3961_v53  ;;  %v4167_v47 = vsel %vm4144_vm8, %v4752_v20, 0  ;;  %v4566_v53 = vld [vmem:[#allocation2 + $0x20] sm:$0x1] }
 0x2b7   : > { %3672 = vst.msk [vmem:[#allocation3 + $0x28] sm:$0xf] %vm3661_vm6, %v3586_v40  ;;  %4197 = vmatpush.bf16.xpose.msra.mxu0 %v4167_v47  ;;  %3042 = vrot.lane.b32.xlu0 %v4551_v5, %s4826_s25  ;;  %v4620_v40 = vld [vmem:[#allocation2 + $0x38] sm:$0x1]  ;;  %v3197_v5 = vrot.slane %v3195_v28, 4  ;;  %v3419_v22 = vrot.slane %v3417_v61, 5 }
 0x2b8   : > { %v3809_v20 = vrot.slane %v4620_v40, 5  ;;  %v4548_v47 = vld [vmem:[#allocation2 + $0x78] sm:$0xf]  ;;  %v3201_v9 = vshll.u32 %v4566_v53, 16  ;;  %v4638_v32 = vld [vmem:[#allocation2 + $0x80] sm:$0x1] }
 0x2b9   : > { %v3620_v45 = vpop.permute.xlu0 %3619  ;;  %v3198_v39 = vor.u32 %v3197_v5, %v6669_v44  ;;  %v3420_v30 = vsel %vm4959_vm11, %v3415_v60, %v3419_v22  ;;  %v4615_v40 = vld [vmem:[#allocation2 + $0x24] sm:$0xe]  ;;  %v3850_v5 = vrot.slane %v3848_v1, 4  ;;  %v4564_v22 = vld [vmem:[#allocation2 + $0x18] sm:$0xf] }
 0x2ba   : > { %3012 = vrot.lane.b32.xlu2 %v4536_v13, %s4826_s25  ;;  %v3810_v35 = vsel %vm5401_vm14, %v3808_v55, %v3809_v20  ;;  %v3203_v0 = vrot.slane %v3201_v9, 5  ;;  %v4661_v55 = vrot.slane %v4615_v40, 9  ;;  %v3182_v9 = vshrl.u32 %v4564_v22, 16 }
 0x2bb   : > { %3910 = vrot.lane.b32.xlu1 %v3807_v42, %s4828_s27  ;;  %v3219_v42 = vshrl.u32 %v6639_v63, 16  ;;  %v3199_v51 = vrot.slane %v3198_v39, 4  ;;  %v4550_v63 = vld [vmem:[#allocation2 + $0x84] sm:$0xf] }
 0x2bc   : > { %v3059_v56 = vpop.permute.xlu2 %3058  ;;  %v3800_v39 = vsel %vm5401_vm14, %v4661_v55, %v3799_v43 }
 0x2bd   : > { %3128 = vst.msk [vmem:[#allocation3 + $0x6c] sm:$0xf] %vm3100_vm5, %v3059_v56  ;;  %v3057_v7 = vpop.permute.xlu1 %3056  ;;  %v4760_v34 = vld [vmem:[#allocation3 + $0x70] sm:$0xff]  ;;  %v3855_v56 = vrot.slane %v6685_v31, 5  ;;  %v3204_v29 = vsel %vm4959_vm11, %v3199_v51, %v3203_v0  ;;  %v3184_v0 = vrot.slane %v3182_v9, 4 }
 0x2be   : > { %3127 = vst.msk [vmem:[#allocation3 + $0x68] sm:$0xf] %vm3100_vm5, %v3057_v7  ;;  %v4191_v33 = vsel %vm4144_vm8, %v4760_v34, 0  ;;  %v4588_v7 = vld [vmem:[#allocation2 + $0x78] sm:$0xf] }
 0x2bf   : > { %3689 = vst.msk [vmem:[#allocation3 + $0x6c] sm:$0xf] %vm3661_vm6, %v3620_v45  ;;  %4210 = vmatpush.bf16.xpose.msra.mxu1 %v4191_v33  ;;  %3601 = vrot.lane.b32.xlu0 %v3410_v37, %s4827_s26  ;;  %v3221_v45 = vrot.slane %v3219_v42, 4  ;;  %v4612_v34 = vld [vmem:[#allocation2 + $0x18] sm:$0xe]  ;;  %v3225_v33 = vshll.u32 %v4569_v3, 16  ;;  %v3856_v54 = vsel %vm5401_vm14, %v4669_v23, %v3855_v56 }
 0x2c0   : > { %v6694_v37 = vld [vmem:[#allocation2 + $0x1c] sm:$0xf]  ;;  %v3377_v52 = vshll.u32 %v4588_v7, 16  ;;  %v4660_v15 = vrot.slane %v4612_v34, 9  ;;  %v3185_v42 = vshll.u32 %v4564_v22, 16  ;;  %v3857_v38 = vrot.slane %v3855_v56, 4 }
 0x2c1   : > { %v3955_v16 = vpop.permute.xlu0 %3954  ;;  %v3792_v58 = vrot.slane %v6694_v37, 5  ;;  %v3227_v11 = vrot.slane %v3225_v33, 5  ;;  %v3795_v23 = vrot.slane %v4614_v50, 5 }
 0x2c2   : > { %3046 = vrot.lane.b32.xlu2 %v4553_v41, %s4826_s25  ;;  %v3222_v41 = vor.u32 %v3221_v45, %v6654_v10  ;;  %v3379_v17 = vrot.slane %v3377_v52, 5 }
 0x2c3   : > { %3944 = vrot.lane.b32.xlu1 %v3866_v25, %s4828_s27  ;;  %v3374_v25 = vshrl.u32 %v4588_v7, 16 }
 0x2c4   : > { %v3618_v24 = vpop.permute.xlu2 %3617 }
 0x2c5   : > { %3688 = vst.msk [vmem:[#allocation3 + $0x68] sm:$0xf] %vm3661_vm6, %v3618_v24  ;;  %v3588_v18 = vpop.permute.xlu1 %3587  ;;  %v3376_v24 = vrot.slane %v3374_v25, 4 }
 0x2c6   : > { %3673 = vst.msk [vmem:[#allocation3 + $0x2c] sm:$0xf] %vm3661_vm6, %v3588_v18  ;;  %v3793_v18 = vsel %vm5401_vm14, %v4660_v15, %v3792_v58 }
 0x2c7   : > { %4025 = vst.msk [vmem:[#allocation3 + $0x68] sm:$0xf] %vm3998_vm7, %v3955_v16  ;;  %3908 = vrot.lane.b32.xlu0 %v3803_v19, %s4828_s27  ;;  %v3223_v16 = vrot.slane %v3222_v41, 4  ;;  %v4589_v19 = vld [vmem:[#allocation2 + $0x7c] sm:$0xf]  ;;  %v3380_v49 = vor.u32 %v3379_v17, %v3376_v24 }
 0x2c8   : > { %v3383_v61 = vshll.u32 %v4589_v19, 16  ;;  %v4636_v17 = vld [vmem:[#allocation2 + $0x78] sm:$0xe] }
 0x2c9   : > { %v3023_v46 = vpop.permute.xlu0 %3022  ;;  %v3228_v28 = vsel %vm4959_vm11, %v3223_v16, %v3227_v11 }
 0x2ca   : > { %3605 = vrot.lane.b32.xlu2 %v3434_v26, %s4827_s26  ;;  %3110 = vst.msk [vmem:[#allocation3 + $0x24] sm:$0xf] %vm3100_vm5, %v3023_v46  ;;  %v3851_v46 = vrot.slane %v4638_v32, 5  ;;  %v3385_v60 = vrot.slane %v3383_v61, 5 }
 0x2cb   : > { %3569 = vrot.lane.b32.xlu1 %v3218_v6, %s4827_s26  ;;  %v4549_v6 = vld [vmem:[#allocation2 + $0x7c] sm:$0xf] }
 0x2cc   : > { %v3925_v8 = vpop.permute.xlu2 %3924 }
 0x2cd   : > { %4010 = vst.msk [vmem:[#allocation3 + $0x2c] sm:$0xf] %vm3998_vm7, %v3925_v8  ;;  %v3923_v13 = vpop.permute.xlu1 %3922  ;;  %v3381_v8 = vrot.slane %v3380_v49, 4 }
 0x2ce   : > { %4009 = vst.msk [vmem:[#allocation3 + $0x28] sm:$0xf] %vm3998_vm7, %v3923_v13 }
 0x2cf   : > { %3036 = vrot.lane.b32.xlu0 %v4548_v47, %s4826_s25  ;;  %v3852_v47 = vsel %vm5401_vm14, %v3850_v5, %v3851_v46 }
 0x2d1   : > { %v3582_v21 = vpop.permute.xlu0 %3581 }
 0x2d2   : > { %3912 = vrot.lane.b32.xlu2 %v3810_v35, %s4828_s27  ;;  %v3386_v35 = vsel %vm4959_vm11, %v3381_v8, %v3385_v60 }
 0x2d3   : > { %3603 = vrot.lane.b32.xlu1 %v3420_v30, %s4827_s26  ;;  %v4641_v30 = vld [vmem:[#allocation2 + $0x8c] sm:$0x1] }
 0x2d4   : > { %v3021_v48 = vpop.permute.xlu2 %3020  ;;  %v3858_v43 = vrot.slane %v4641_v30, 5 }
 0x2d5   : > { %3109 = vst.msk [vmem:[#allocation3 + $0x20] sm:$0xf] %vm3100_vm5, %v3021_v48  ;;  %v3957_v59 = vpop.permute.xlu1 %3956  ;;  %v4751_v62 = vld [vmem:[#allocation3 + $0x28] sm:$0xff]  ;;  %v3794_v48 = vrot.slane %v3792_v58, 4 }
 0x2d6   : > { %4026 = vst.msk [vmem:[#allocation3 + $0x6c] sm:$0xf] %vm3998_vm7, %v3957_v59  ;;  %v4164_v4 = vsel %vm4144_vm8, %v4751_v62, 0  ;;  %v3387_v59 = vshrl.u32 %v4589_v19, 16  ;;  %v3859_v62 = vsel %vm5401_vm14, %v3857_v38, %v3858_v43 }
 0x2d7   : > { %3670 = vst.msk [vmem:[#allocation3 + $0x20] sm:$0xf] %vm3661_vm6, %v3582_v21  ;;  %4198 = vmatpush.bf16.xpose.msra.mxu0 %v4164_v4  ;;  %3567 = vrot.lane.b32.xlu0 %v3204_v29, %s4827_s26  ;;  %v3187_v21 = vrot.slane %v3185_v42, 5  ;;  %v3796_v31 = vsel %vm5401_vm14, %v3794_v48, %v3795_v23 }
 0x2d8   : > { %v3389_v34 = vrot.slane %v3387_v59, 4 }
 0x2d9   : > { %v3616_v57 = vpop.permute.xlu0 %3615  ;;  %v3188_v29 = vor.u32 %v3187_v21, %v3184_v0 }
 0x2da   : > { %3040 = vrot.lane.b32.xlu2 %v4550_v63, %s4826_s25  ;;  %v4590_v63 = vld [vmem:[#allocation2 + $0x80] sm:$0x1]  ;;  %v3390_v25 = vor.u32 %v3389_v34, %v3385_v60 }
 0x2db   : > { %3938 = vrot.lane.b32.xlu1 %v3856_v54, %s4828_s27  ;;  %v3189_v7 = vrot.slane %v3188_v29, 4  ;;  %v3393_v52 = vshll.u32 %v4590_v63, 16 }
 0x2dc   : > { %v3055_v27 = vpop.permute.xlu2 %3054  ;;  %v3391_v58 = vrot.slane %v3390_v25, 4 }
 0x2dd   : > { %3126 = vst.msk [vmem:[#allocation3 + $0x64] sm:$0xf] %vm3100_vm5, %v3055_v27  ;;  %v3053_v10 = vpop.permute.xlu1 %3052  ;;  %v4759_v2 = vld [vmem:[#allocation3 + $0x68] sm:$0xff]  ;;  %v3194_v33 = vsel %vm4959_vm11, %v3189_v7, %v6669_v44 }
 0x2de   : > { %3125 = vst.msk [vmem:[#allocation3 + $0x60] sm:$0xf] %vm3100_vm5, %v3053_v10  ;;  %v4188_v26 = vsel %vm4144_vm8, %v4759_v2, 0  ;;  %v4668_v2 = vrot.slane %v4636_v17, 9 }
 0x2df   : > { %3687 = vst.msk [vmem:[#allocation3 + $0x64] sm:$0xf] %vm3661_vm6, %v3616_v57  ;;  %4211 = vmatpush.bf16.xpose.msra.mxu1 %v4188_v26  ;;  %3902 = vrot.lane.b32.xlu0 %v3793_v18, %s4828_s27  ;;  %v3395_v57 = vrot.slane %v3393_v52, 5 }
 0x2e0   : > { %v3849_v14 = vsel %vm5401_vm14, %v4668_v2, %v3848_v1 }
 0x2e1   : > { %v3951_v53 = vpop.permute.xlu0 %3950  ;;  %v3396_v44 = vsel %vm4959_vm11, %v3391_v58, %v3395_v57  ;;  %v4063_v58 = vld [vmem:[%s6837_s1] sm:$0xf]  ;;  %v4829_v57 = vmov 0.0   ;;  %vm4238_vm11 = vcmask 15368  }
 0x2e2   : > { %3571 = vrot.lane.b32.xlu2 %v3228_v28, %s4827_s26  ;;  %867 = vst.msk [vmem:[%s204_s6] sm:$0xff] %vm866_vm9, %v4829_v57 }
 0x2e3   : > { %3038 = vrot.lane.b32.xlu1 %v4549_v6, %s4826_s25 }
 0x2e4   : > { %v3614_v20 = vpop.permute.xlu2 %3613 }
 0x2e5   : > { %3686 = vst.msk [vmem:[#allocation3 + $0x60] sm:$0xf] %vm3661_vm6, %v3614_v20  ;;  %v3584_v13 = vpop.permute.xlu1 %3583 }
 0x2e6   : > { %3671 = vst.msk [vmem:[#allocation3 + $0x24] sm:$0xf] %vm3661_vm6, %v3584_v13 }
 0x2e7   : > { %4023 = vst.msk [vmem:[#allocation3 + $0x60] sm:$0xf] %vm3998_vm7, %v3951_v53  ;;  %3936 = vrot.lane.b32.xlu0 %v3852_v47, %s4828_s27 }
 0x2e9   : > { %v3019_v51 = vpop.permute.xlu0 %3018 }
 0x2ea   : > { %3906 = vrot.lane.b32.xlu2 %v3800_v39, %s4828_s27  ;;  %3108 = vst.msk [vmem:[#allocation3 + $0x1c] sm:$0xf] %vm3100_vm5, %v3019_v51 }
 0x2eb   : > { %3597 = vrot.lane.b32.xlu1 %v3386_v35, %s4827_s26 }
 0x2ec   : > { %v3921_v45 = vpop.permute.xlu2 %3920 }
 0x2ed   : > { %4008 = vst.msk [vmem:[#allocation3 + $0x24] sm:$0xf] %vm3998_vm7, %v3921_v45  ;;  %v3919_v3 = vpop.permute.xlu1 %3918 }
 0x2ee   : > { %4007 = vst.msk [vmem:[#allocation3 + $0x20] sm:$0xf] %vm3998_vm7, %v3919_v3 }
 0x2f1   : > { %v3578_v56 = vpop.permute.xlu0 %3577 }
 0x2f2   : > { %3940 = vrot.lane.b32.xlu2 %v3859_v62, %s4828_s27 }
 0x2f3   : > { %3904 = vrot.lane.b32.xlu1 %v3796_v31, %s4828_s27 }
 0x2f4   : > { %v3017_v37 = vpop.permute.xlu2 %3016 }
 0x2f5   : > { %3107 = vst.msk [vmem:[#allocation3 + $0x18] sm:$0xf] %vm3100_vm5, %v3017_v37  ;;  %v3953_v4 = vpop.permute.xlu1 %3952  ;;  %v4750_v41 = vld [vmem:[#allocation3 + $0x20] sm:$0xff] }
 0x2f6   : > { %4024 = vst.msk [vmem:[#allocation3 + $0x64] sm:$0xf] %vm3998_vm7, %v3953_v4  ;;  %v4161_v54 = vsel %vm4144_vm8, %v4750_v41, 0 }
 0x2f7   : > { %3668 = vst.msk [vmem:[#allocation3 + $0x18] sm:$0xf] %vm3661_vm6, %v3578_v56  ;;  %4199 = vmatpush.bf16.xpose.msra.mxu0 %v4161_v54 }
 0x2f9   : > { %v3612_v15 = vpop.permute.xlu0 %3611 }
 0x2fa   : > { %3565 = vrot.lane.b32.xlu2 %v3194_v33, %s4827_s26 }
 0x2fc   : > { %v3051_v16 = vpop.permute.xlu2 %3050 }
 0x2fd   : > { %3124 = vst.msk [vmem:[#allocation3 + $0x5c] sm:$0xf] %vm3100_vm5, %v3051_v16  ;;  %v3049_v11 = vpop.permute.xlu1 %3048  ;;  %v4758_v27 = vld [vmem:[#allocation3 + $0x60] sm:$0xff] }
 0x2fe   : > { %3123 = vst.msk [vmem:[#allocation3 + $0x58] sm:$0xf] %vm3100_vm5, %v3049_v11  ;;  %v4185_v24 = vsel %vm4144_vm8, %v4758_v27, 0 }
 0x2ff   : > { %3685 = vst.msk [vmem:[#allocation3 + $0x5c] sm:$0xf] %vm3661_vm6, %v3612_v15  ;;  %4212 = vmatpush.bf16.xpose.msra.mxu1 %v4185_v24 }
 0x301   : > { %v3947_v10 = vpop.permute.xlu0 %3946 }
 0x302   : > { %3599 = vrot.lane.b32.xlu2 %v3396_v44, %s4827_s26 }
 0x304   : > { %v3610_v18 = vpop.permute.xlu2 %3609 }
 0x305   : > { %3684 = vst.msk [vmem:[#allocation3 + $0x58] sm:$0xf] %vm3661_vm6, %v3610_v18  ;;  %v3580_v19 = vpop.permute.xlu1 %3579  ;;  %v4224_v18 = vld [vmem:[%s204_s6] sm:$0xff] }
 0x306   : > { %3669 = vst.msk [vmem:[#allocation3 + $0x1c] sm:$0xf] %vm3661_vm6, %v3580_v19 }
 0x307   : > { %4021 = vst.msk [vmem:[#allocation3 + $0x58] sm:$0xf] %vm3998_vm7, %v3947_v10 }
 0x309   : > { %v3015_v32 = vpop.permute.xlu0 %3014 }
 0x30a   : > { %3934 = vrot.lane.b32.xlu2 %v3849_v14, %s4828_s27  ;;  %3106 = vst.msk [vmem:[#allocation3 + $0x14] sm:$0xf] %vm3100_vm5, %v3015_v32 }
 0x30c   : > { %v3917_v28 = vpop.permute.xlu2 %3916 }
 0x30d   : > { %4006 = vst.msk [vmem:[#allocation3 + $0x1c] sm:$0xf] %vm3998_vm7, %v3917_v28  ;;  %v3915_v26 = vpop.permute.xlu1 %3914 }
 0x30e   : > { %4005 = vst.msk [vmem:[#allocation3 + $0x18] sm:$0xf] %vm3998_vm7, %v3915_v26 }
 0x311   : > { %v3574_v6 = vpop.permute.xlu0 %3573 }
 0x314   : > { %v3013_v40 = vpop.permute.xlu2 %3012 }
 0x315   : > { %3105 = vst.msk [vmem:[#allocation3 + $0x10] sm:$0xf] %vm3100_vm5, %v3013_v40  ;;  %v3949_v12 = vpop.permute.xlu1 %3948  ;;  %v4749_v36 = vld [vmem:[#allocation3 + $0x18] sm:$0xff] }
 0x316   : > { %4022 = vst.msk [vmem:[#allocation3 + $0x5c] sm:$0xf] %vm3998_vm7, %v3949_v12  ;;  %v4158_v1 = vsel %vm4144_vm8, %v4749_v36, 0 }
 0x317   : > { %3666 = vst.msk [vmem:[#allocation3 + $0x10] sm:$0xf] %vm3661_vm6, %v3574_v6  ;;  %4200 = vmatpush.bf16.xpose.msra.mxu0 %v4158_v1 }
 0x319   : > { %v3608_v49 = vpop.permute.xlu0 %3607 }
 0x31c   : > { %v3047_v61 = vpop.permute.xlu2 %3046 }
 0x31d   : > { %3122 = vst.msk [vmem:[#allocation3 + $0x54] sm:$0xf] %vm3100_vm5, %v3047_v61  ;;  %v3045_v5 = vpop.permute.xlu1 %3044  ;;  %v4757_v46 = vld [vmem:[#allocation3 + $0x58] sm:$0xff] }
 0x31e   : > { %3121 = vst.msk [vmem:[#allocation3 + $0x50] sm:$0xf] %vm3100_vm5, %v3045_v5  ;;  %v4182_v53 = vsel %vm4144_vm8, %v4757_v46, 0 }
 0x31f   : > { %3683 = vst.msk [vmem:[#allocation3 + $0x54] sm:$0xf] %vm3661_vm6, %v3608_v49  ;;  %4213 = vmatpush.bf16.xpose.msra.mxu1 %v4182_v53 }
 0x321   : > { %v3943_v55 = vpop.permute.xlu0 %3942 }
 0x324   : > { %v3606_v20 = vpop.permute.xlu2 %3605 }
 0x325   : > { %3682 = vst.msk [vmem:[#allocation3 + $0x50] sm:$0xf] %vm3661_vm6, %v3606_v20  ;;  %v3576_v8 = vpop.permute.xlu1 %3575 }
 0x326   : > { %3667 = vst.msk [vmem:[#allocation3 + $0x14] sm:$0xf] %vm3661_vm6, %v3576_v8 }
 0x327   : > { %4019 = vst.msk [vmem:[#allocation3 + $0x50] sm:$0xf] %vm3998_vm7, %v3943_v55 }
 0x329   : > { %v3043_v60 = vpop.permute.xlu0 %3042 }
 0x32a   : > { %3120 = vst.msk [vmem:[#allocation3 + $0x4c] sm:$0xf] %vm3100_vm5, %v3043_v60 }
 0x32c   : > { %v3913_v22 = vpop.permute.xlu2 %3912 }
 0x32d   : > { %4004 = vst.msk [vmem:[#allocation3 + $0x14] sm:$0xf] %vm3998_vm7, %v3913_v22  ;;  %v3911_v13 = vpop.permute.xlu1 %3910 }
 0x32e   : > { %4003 = vst.msk [vmem:[#allocation3 + $0x10] sm:$0xf] %vm3998_vm7, %v3911_v13 }
 0x331   : > { %v3602_v47 = vpop.permute.xlu0 %3601 }
 0x334   : > { %v3041_v39 = vpop.permute.xlu2 %3040 }
 0x335   : > { %3119 = vst.msk [vmem:[#allocation3 + $0x48] sm:$0xf] %vm3100_vm5, %v3041_v39  ;;  %v3945_v9 = vpop.permute.xlu1 %3944  ;;  %v4748_v42 = vld [vmem:[#allocation3 + $0x10] sm:$0xff] }
 0x336   : > { %4020 = vst.msk [vmem:[#allocation3 + $0x54] sm:$0xf] %vm3998_vm7, %v3945_v9  ;;  %v4155_v35 = vsel %vm4144_vm8, %v4748_v42, 0 }
 0x337   : > { %3680 = vst.msk [vmem:[#allocation3 + $0x48] sm:$0xf] %vm3661_vm6, %v3602_v47  ;;  %4201 = vmatpush.bf16.xpose.msra.mxu0 %v4155_v35 }
 0x339   : > { %v3909_v30 = vpop.permute.xlu0 %3908 }
 0x33c   : > { %v3572_v50 = vpop.permute.xlu2 %3571 }
 0x33d   : > { %3665 = vst.msk [vmem:[#allocation3 + $0xc] sm:$0xf] %vm3661_vm6, %v3572_v50  ;;  %v3570_v51 = vpop.permute.xlu1 %3569  ;;  %v4756_v38 = vld [vmem:[#allocation3 + $0x50] sm:$0xff] }
 0x33e   : > { %3664 = vst.msk [vmem:[#allocation3 + $0x8] sm:$0xf] %vm3661_vm6, %v3570_v51  ;;  %v4179_v43 = vsel %vm4144_vm8, %v4756_v38, 0 }
 0x33f   : > { %4002 = vst.msk [vmem:[#allocation3 + $0xc] sm:$0xf] %vm3998_vm7, %v3909_v30  ;;  %4214 = vmatpush.bf16.xpose.msra.mxu1 %v4179_v43 }
 0x341   : > { %v3037_v0 = vpop.permute.xlu0 %3036 }
 0x342   : > { %3117 = vst.msk [vmem:[#allocation3 + $0x40] sm:$0xf] %vm3100_vm5, %v3037_v0 }
 0x344   : > { %v3907_v21 = vpop.permute.xlu2 %3906 }
 0x345   : > { %4001 = vst.msk [vmem:[#allocation3 + $0x8] sm:$0xf] %vm3998_vm7, %v3907_v21  ;;  %v3604_v45 = vpop.permute.xlu1 %3603 }
 0x346   : > { %3681 = vst.msk [vmem:[#allocation3 + $0x4c] sm:$0xf] %vm3661_vm6, %v3604_v45 }
 0x349   : > { %v3568_v48 = vpop.permute.xlu0 %3567 }
 0x34a   : > { %3663 = vst.msk [vmem:[#allocation3 + $0x4] sm:$0xf] %vm3661_vm6, %v3568_v48 }
 0x34c   : > { %v3941_v23 = vpop.permute.xlu2 %3940  ;;  %v4747_v3 = vld [vmem:[#allocation3 + $0x8] sm:$0xff] }
 0x34d   : > { %4018 = vst.msk [vmem:[#allocation3 + $0x4c] sm:$0xf] %vm3998_vm7, %v3941_v23  ;;  %v3939_v59 = vpop.permute.xlu1 %3938  ;;  %v4152_v62 = vsel %vm4144_vm8, %v4747_v3, 0 }
 0x34e   : > { %4017 = vst.msk [vmem:[#allocation3 + $0x48] sm:$0xf] %vm3998_vm7, %v3939_v59  ;;  %4202 = vmatpush.bf16.xpose.msra.mxu0 %v4152_v62 }
 0x351   : > { %v3903_v29 = vpop.permute.xlu0 %3902 }
 0x354   : > { %v3566_v31 = vpop.permute.xlu2 %3565 }
 0x355   : > { %3662 = vst.msk [vmem:[#allocation3] sm:$0xf] %vm3661_vm6, %v3566_v31  ;;  %v3039_v56 = vpop.permute.xlu1 %3038  ;;  %v4755_v7 = vld [vmem:[#allocation3 + $0x48] sm:$0xff] }
 0x356   : > { %3118 = vst.msk [vmem:[#allocation3 + $0x44] sm:$0xf] %vm3100_vm5, %v3039_v56  ;;  %v4176_v34 = vsel %vm4144_vm8, %v4755_v7, 0 }
 0x357   : > { %3999 = vst.msk [vmem:[#allocation3] sm:$0xf] %vm3998_vm7, %v3903_v29  ;;  %4215 = vmatpush.bf16.xpose.msra.mxu1 %v4176_v34 }
 0x359   : > { %v3937_v63 = vpop.permute.xlu0 %3936 }
 0x35c   : > { %v3600_v37 = vpop.permute.xlu2 %3599 }
 0x35d   : > { %3679 = vst.msk [vmem:[#allocation3 + $0x44] sm:$0xf] %vm3661_vm6, %v3600_v37  ;;  %v3598_v4 = vpop.permute.xlu1 %3597 }
 0x35e   : > { %3678 = vst.msk [vmem:[#allocation3 + $0x40] sm:$0xf] %vm3661_vm6, %v3598_v4 }
 0x35f   : > { %4016 = vst.msk [vmem:[#allocation3 + $0x44] sm:$0xf] %vm3998_vm7, %v3937_v63 }
 0x364   : > { %v3935_v41 = vpop.permute.xlu2 %3934 }
 0x365   : > { %4015 = vst.msk [vmem:[#allocation3 + $0x40] sm:$0xf] %vm3998_vm7, %v3935_v41  ;;  %v3905_v33 = vpop.permute.xlu1 %3904 }
 0x366   : > { %4000 = vst.msk [vmem:[#allocation3 + $0x4] sm:$0xf] %vm3998_vm7, %v3905_v33 }
 0x36c   : > { %v4754_v54 = vld [vmem:[#allocation3 + $0x40] sm:$0xff] }
 0x36d   : > { %v4746_v25 = vld [vmem:[#allocation3] sm:$0xff]  ;;  %v4173_v52 = vsel %vm4144_vm8, %v4754_v54, 0 }
 0x36e   : > { %4216 = vmatpush.bf16.xpose.msra.mxu1 %v4173_v52  ;;  %v4149_v15 = vsel %vm4144_vm8, %v4746_v25, 0 }
 0x36f   : > { %4203 = vmatpush.bf16.xpose.msra.mxu0 %v4149_v15 }
 0x375   : > { %4741 = vmatmul.msk.bf16.vlgmr.msra.gmra.mxu1 %vm4144_vm8, %v4063_v58 }
 0x376   : > { %4740 = vmatmul.msk.bf16.vlgmr.msra.gmra.mxu0 %vm4144_vm8, %v4063_v58 }
 0x3f2   : > { %v4218_v16 = vpop.f32.mrf.mxu1 }
 0x3f3   : > { %4223 = vst [vmem:[%s199_s10 + $0x8] sm:$0xff] %v4218_v16  ;;  %v4233_v11 = vmul.f32 %v4218_v16, %v4218_v16  ;;  %v4205_v27 = vpop.f32.mrf.mxu0 }
 0x3f4   : > { %4222 = vst [vmem:[%s199_s10] sm:$0xff] %v4205_v27  ;;  %v4225_v44 = vadd.f32 %v4218_v16, %v4205_v27  ;;  %v4232_v24 = vmul.f32 %v4205_v27, %v4205_v27 }
 0x3f6   : > { %4226 = vadd.xlane.f32.xlu1 %v4225_v44  ;;  %v4234_v17 = vadd.f32 %v4233_v11, %v4232_v24 }
 0x3f8   : > { %4235 = vadd.xlane.f32.xlu2 %v4234_v17 }
 0x3fa   : > { %v4220_v10 = vpop.f32.mrf.mxu1 }
 0x3fb   : > { %v4207_v2 = vpop.f32.mrf.mxu0 }
 0x469   : > { %v4227_v19 = vpop.xlane.xlu1 %4226 }
 0x46a   : > { %v4228_v14 = vadd.f32 %v4227_v19, %v4224_v18 }
 0x46b   : > { %v4236_v32 = vpop.xlane.xlu2 %4235 }
 0x46c   : > { %4230 = vst.msk [vmem:[%s204_s6] sm:$0xff] %vm4229_vm10, %v4228_v14 }
 0x473   : > { %v4231_v28 = vld [vmem:[%s204_s6] sm:$0xff] }
 0x474   : > { %v4237_v26 = vadd.f32 %v4236_v32, %v4231_v28 }
 0x476   : > { %4239 = vst.msk [vmem:[%s204_s6] sm:$0xff] %vm4238_vm11, %v4237_v26 }
 0x477 PF: > { %s14_s14 = sadd.s32 1, %s4818_s14   ;;  %s6852_s12 = smov %s4814_s13 }
 0x478   : > { %p11_p5 = scmp.ge.s32.totalorder %s14_s14, 4   ;;  %s6853_s13 = smov %s6855_s15 }
 0x47a   :  { %13 = sbr.rel (!%p11_p5) target bundleno = 2 (0x2), region = 79 }

</bundles_post_ra>
